<compile_context>
chip_gen: v7x
topology: tpu7x:2x2x1
jax: 0.10.0
libtpu: 0.0.40
codegen_flags: <defaults>
</compile_context>

<pallas_src>
import math
from functools import partial

import jax
import jax.numpy as jnp
from jax.experimental import pallas as pl
from jax.experimental.pallas import tpu as pltpu

_NEG_INF = -1e30
_LN_EPS = 1e-5

# ---------------------------------------------------------------------------
# In-kernel math helpers (operate on values already loaded from VMEM refs)
# ---------------------------------------------------------------------------


def _layernorm(x, gamma, beta, eps=_LN_EPS):
    mu = jnp.mean(x, axis=-1, keepdims=True)
    xc = x - mu
    var = jnp.mean(xc * xc, axis=-1, keepdims=True)
    return xc * jax.lax.rsqrt(var + eps) * gamma + beta


def _mha_heads(q, k, v, key_bias, *, num_heads, scale):
    """Per-head attention on already-projected (rows, D) q/k/v.

    q:(Nq,D)  k,v:(Nk,D)  key_bias:(1,Nk) additive (0 / -1e30) or None.
    Heads are static lane slices of width D//num_heads; per-head context vectors
    are concatenated back along lanes so the caller's output projection is one
    full-width (Nq,D)x(D,D) matmul.  Returns (ctx:(Nq,D), mean_probs:(Nq,Nk)).
    """
    d = q.shape[-1]
    hd = d // num_heads
    ctx = []
    p_acc = None
    for h in range(num_heads):          # static unroll; H is small
        sl = slice(h * hd, (h + 1) * hd)
        s = jax.lax.dot_general(q[:, sl], k[:, sl],
                                (((1,), (1,)), ((), ())),
                                preferred_element_type=jnp.float32) * scale
        if key_bias is not None:
            s = s + key_bias
        s = s - jnp.max(s, axis=-1, keepdims=True)
        p = jnp.exp(s)
        p = p / jnp.sum(p, axis=-1, keepdims=True)   # exact (parity with torch)
        ctx.append(jnp.dot(p, v[:, sl], preferred_element_type=jnp.float32))
        p_acc = p if p_acc is None else p_acc + p
    return jnp.concatenate(ctx, axis=-1), p_acc * (1.0 / num_heads)


# ---------------------------------------------------------------------------
# Stacked-layer kernels: grid = (batch, layer); activation carried in o_ref
# ---------------------------------------------------------------------------


def _encoder_layer_stack_kernel(
        x_ref, qkadd_ref, smask_ref,
        swqk, sbqk, swv, sbv, swo, sbo, ln1g, ln1b,
        fw1, fb1, fw2, fb2, ln2g, ln2b,
        o_ref, *, num_heads, scale):
    layer = pl.program_id(1)

    @pl.when(layer == 0)
    def _():                               # init resident carry from the raw input
        o_ref[...] = x_ref[...]

    x = o_ref[...].astype(jnp.float32)
    d = x.shape[-1]

    # ---- self attention: q = k = x + pos (+ sem), v = x, key-padding bias ----
    qk_in = x + qkadd_ref[...].astype(jnp.float32)
    qk = jnp.dot(qk_in, swqk[...], preferred_element_type=jnp.float32) + sbqk[...]
    v = jnp.dot(x, swv[...], preferred_element_type=jnp.float32) + sbv[...]
    ctx, _ = _mha_heads(qk[:, :d], qk[:, d:], v, smask_ref[...],
                        num_heads=num_heads, scale=scale)
    sa = jnp.dot(ctx, swo[...], preferred_element_type=jnp.float32) + sbo[...]
    x = _layernorm(x + sa, ln1g[...], ln1b[...])

    # ---- feed-forward (ReLU) ----
    h = jnp.maximum(jnp.dot(x, fw1[...], preferred_element_type=jnp.float32) + fb1[...], 0.0)
    ff = jnp.dot(h, fw2[...], preferred_element_type=jnp.float32) + fb2[...]
    x = _layernorm(x + ff, ln2g[...], ln2b[...])

    o_ref[...] = x.astype(o_ref.dtype)


def _decoder_layer_stack_kernel(
        x_ref, sadd_ref, smask_ref, cadd_ref, mem_ref, memk_ref,
        swqk, sbqk, swv, sbv, swo, sbo, ln1g, ln1b,
        cwq, cbq, cwk, cbk, cwv, cbv, cwo, cbo, ln2g, ln2b,
        fw1, fb1, fw2, fb2, ln3g, ln3b,
        o_ref, attn_ref, *, num_heads, scale):
    layer = pl.program_id(1)

    @pl.when(layer == 0)
    def _():                               # init resident carry from the raw tgt
        o_ref[...] = x_ref[...]

    x = o_ref[...].astype(jnp.float32)
    d = x.shape[-1]

    # ---- self attention: q = k = x + pos (+ sem), v = x, key-padding bias ----
    qk_in = x + sadd_ref[...].astype(jnp.float32)
    qk = jnp.dot(qk_in, swqk[...], preferred_element_type=jnp.float32) + sbqk[...]
    v = jnp.dot(x, swv[...], preferred_element_type=jnp.float32) + sbv[...]
    ctx, mean_p = _mha_heads(qk[:, :d], qk[:, d:], v, smask_ref[...],
                             num_heads=num_heads, scale=scale)
    sa = jnp.dot(ctx, swo[...], preferred_element_type=jnp.float32) + sbo[...]
    x = _layernorm(x + sa, ln1g[...], ln1b[...])
    # output block is resident across the layer axis -> the last layer's write wins,
    # matching torch (attn_weights of the last decoder layer, head-averaged)
    attn_ref[...] = mean_p.astype(attn_ref.dtype)

    # ---- cross attention: q = x + pos, k = memory + memory_pos, v = memory ----
    q_in = x + cadd_ref[...].astype(jnp.float32)
    q = jnp.dot(q_in, cwq[...], preferred_element_type=jnp.float32) + cbq[...]
    k = jnp.dot(memk_ref[...].astype(jnp.float32), cwk[...],
                preferred_element_type=jnp.float32) + cbk[...]
    v = jnp.dot(mem_ref[...].astype(jnp.float32), cwv[...],
                preferred_element_type=jnp.float32) + cbv[...]
    ctx, _ = _mha_heads(q, k, v, None, num_heads=num_heads, scale=scale)
    ca = jnp.dot(ctx, cwo[...], preferred_element_type=jnp.float32) + cbo[...]
    x = _layernorm(x + ca, ln2g[...], ln2b[...])

    # ---- feed-forward (ReLU) ----
    h = jnp.maximum(jnp.dot(x, fw1[...], preferred_element_type=jnp.float32) + fb1[...], 0.0)
    ff = jnp.dot(h, fw2[...], preferred_element_type=jnp.float32) + fb2[...]
    x = _layernorm(x + ff, ln3g[...], ln3b[...])

    o_ref[...] = x.astype(o_ref.dtype)


# ---------------------------------------------------------------------------
# pallas_call wrappers
# ---------------------------------------------------------------------------

_ENC_ORDER = ("swqk", "sbqk", "swv", "sbv", "swo", "sbo", "ln1_g", "ln1_b",
              "fw1", "fb1", "fw2", "fb2", "ln2_g", "ln2_b")
_DEC_ORDER = ("swqk", "sbqk", "swv", "sbv", "swo", "sbo", "ln1_g", "ln1_b",
              "cwq", "cbq", "cwk", "cbk", "cwv", "cbv", "cwo", "cbo", "ln2_g", "ln2_b",
              "fw1", "fb1", "fw2", "fb2", "ln3_g", "ln3_b")

_VMEM_LIMIT = 32 * 1024 * 1024  # safe on v5e/v6e/v7x; plenty of headroom at these sizes


def _weight_spec(w):
    # stacked per-layer weight: leading layer axis selected by the layer grid index
    return pl.BlockSpec((None,) + tuple(w.shape[1:]), lambda b, l: (l, 0, 0))


def _encoder_stack(src, qkadd, src_key_bias, eparams, *, num_heads):
    B, S, D = src.shape
    n_layers = eparams["fw1"].shape[0]
    weights = [eparams[name] for name in _ENC_ORDER]
    per_b = lambda b, l: (b, 0, 0)
    act_specs = [pl.BlockSpec((None, S, D), per_b),
                 pl.BlockSpec((None, S, D), per_b),
                 pl.BlockSpec((None, 1, S), per_b)]
    return pl.pallas_call(
        partial(_encoder_layer_stack_kernel, num_heads=num_heads,
                scale=1.0 / math.sqrt(D // num_heads)),
        grid=(B, n_layers),
        in_specs=act_specs + [_weight_spec(w) for w in weights],
        out_specs=pl.BlockSpec((None, S, D), per_b),
        out_shape=jax.ShapeDtypeStruct((B, S, D), src.dtype),
        compiler_params=pltpu.CompilerParams(
            dimension_semantics=("parallel", "arbitrary"),
            vmem_limit_bytes=_VMEM_LIMIT),
    )(src, qkadd, src_key_bias, *weights)


def _decoder_stack(tgt, sadd, tgt_key_bias, cadd, mem, memk, dparams, *, num_heads):
    B, T, D = tgt.shape
    S = mem.shape[1]
    n_layers = dparams["fw1"].shape[0]
    weights = [dparams[name] for name in _DEC_ORDER]
    per_b = lambda b, l: (b, 0, 0)
    act_specs = [
        pl.BlockSpec((None, T, D), per_b),   # tgt (read only at layer 0)
        pl.BlockSpec((None, T, D), per_b),   # self-attn q/k additive (pos + sem)
        pl.BlockSpec((None, 1, T), per_b),   # key-padding additive bias
        pl.BlockSpec((None, T, D), per_b),   # cross-attn q additive (pos only)
        pl.BlockSpec((None, S, D), per_b),   # memory (raw src)
        pl.BlockSpec((None, S, D), per_b),   # memory + memory_pos (cross-attn keys)
    ]
    out, attn = pl.pallas_call(
        partial(_decoder_layer_stack_kernel, num_heads=num_heads,
                scale=1.0 / math.sqrt(D // num_heads)),
        grid=(B, n_layers),
        in_specs=act_specs + [_weight_spec(w) for w in weights],
        out_specs=(pl.BlockSpec((None, T, D), per_b),
                   pl.BlockSpec((None, T, T), per_b)),
        out_shape=(jax.ShapeDtypeStruct((B, T, D), tgt.dtype),
                   jax.ShapeDtypeStruct((B, T, T), jnp.float32)),
        compiler_params=pltpu.CompilerParams(
            dimension_semantics=("parallel", "arbitrary"),
            vmem_limit_bytes=_VMEM_LIMIT),
    )(tgt, sadd, tgt_key_bias, cadd, mem, memk, *weights)
    return out, attn


# ---------------------------------------------------------------------------
# Mask handling (compact (B, 1, L) additive bias; no dense (N,N) masks)
# ---------------------------------------------------------------------------


def _mask_to_ignore(mask):
    """Mirror of torch `_mask_to_bool`: bool -> True means ignore that key;
    non-bool -> nonzero means VALID, so invert after casting to bool."""
    if mask is None:
        return None
    if mask.dtype != jnp.bool_:
        return jnp.logical_not(mask.astype(jnp.bool_))
    return mask


def _key_padding_bias(ignore, batch, length):
    if ignore is None:
        return jnp.zeros((batch, 1, length), jnp.float32)
    return jnp.where(ignore, _NEG_INF, 0.0).astype(jnp.float32).reshape(batch, 1, length)


# ---------------------------------------------------------------------------
# Full transformer forward
# ---------------------------------------------------------------------------


@partial(jax.jit, static_argnames=("num_heads", "run_encoder"))
def transformer_forward(params, src, tgt, src_mask, tgt_mask,
                        src_pos_embed, tgt_pos_embed, sem_embed=None,
                        *, num_heads, run_encoder=False):
    B, S, D = src.shape
    T = tgt.shape[1]
    assert D % num_heads == 0

    spos = jnp.broadcast_to(src_pos_embed, src.shape)
    tpos = jnp.broadcast_to(tgt_pos_embed, tgt.shape)
    src_bias = _key_padding_bias(_mask_to_ignore(src_mask), B, S)
    tgt_bias = _key_padding_bias(_mask_to_ignore(tgt_mask), B, T)

    enc_qkadd = spos + sem_embed if sem_embed is not None else spos
    dec_sadd = tpos + sem_embed if sem_embed is not None else tpos
    memk = src + spos          # cross-attn keys: memory + memory_pos

    if run_encoder:
        # The reference forward discards the encoder output (decoder consumes the
        # RAW src), so the encoder is dead code at inference; not traced by default.
        _mem = _encoder_stack(src, enc_qkadd, src_bias, params["encoder"],
                              num_heads=num_heads)
        del _mem

    out, attn_w = _decoder_stack(tgt, dec_sadd, tgt_bias, tpos, src, memk,
                                 params["decoder"], num_heads=num_heads)
    return out, attn_w


# ---------------------------------------------------------------------------
# Deterministic parameter init (weights stored directly in stacked kernel layout)
# ---------------------------------------------------------------------------


def _xavier(key, shape):
    fan_in, fan_out = shape
    bound = math.sqrt(6.0 / (fan_in + fan_out))
    return jax.random.uniform(key, shape, jnp.float32, -bound, bound)


def _init_encoder_layer(key, d, f):
    k = jax.random.split(key, 6)
    wq, wk, wv, wo = (_xavier(kk, (d, d)) for kk in k[:4])
    zb = jnp.zeros((1, d), jnp.float32)
    return {
        "swqk": jnp.concatenate([wq, wk], axis=1),
        "sbqk": jnp.zeros((1, 2 * d), jnp.float32),
        "swv": wv, "sbv": zb, "swo": wo, "sbo": zb,
        "ln1_g": jnp.ones((1, d), jnp.float32), "ln1_b": zb,
        "fw1": _xavier(k[4], (d, f)), "fb1": jnp.zeros((1, f), jnp.float32),
        "fw2": _xavier(k[5], (f, d)), "fb2": zb,
        "ln2_g": jnp.ones((1, d), jnp.float32), "ln2_b": zb,
    }


def _init_decoder_layer(key, d, f):
    k = jax.random.split(key, 10)
    wq, wk, wv, wo = (_xavier(kk, (d, d)) for kk in k[:4])
    cwq, cwk, cwv, cwo = (_xavier(kk, (d, d)) for kk in k[4:8])
    zb = jnp.zeros((1, d), jnp.float32)
    return {
        "swqk": jnp.concatenate([wq, wk], axis=1),
        "sbqk": jnp.zeros((1, 2 * d), jnp.float32),
        "swv": wv, "sbv": zb, "swo": wo, "sbo": zb,
        "ln1_g": jnp.ones((1, d), jnp.float32), "ln1_b": zb,
        "cwq": cwq, "cbq": zb, "cwk": cwk, "cbk": zb,
        "cwv": cwv, "cbv": zb, "cwo": cwo, "cbo": zb,
        "ln2_g": jnp.ones((1, d), jnp.float32), "ln2_b": zb,
        "fw1": _xavier(k[8], (d, f)), "fb1": jnp.zeros((1, f), jnp.float32),
        "fw2": _xavier(k[9], (f, d)), "fb2": zb,
        "ln3_g": jnp.ones((1, d), jnp.float32), "ln3_b": zb,
    }


def _stack_layers(layer_dicts):
    return jax.tree_util.tree_map(lambda *xs: jnp.stack(xs, axis=0), *layer_dicts)


def init_params(key, dim, dim_ff, num_heads, num_enc, num_dec):
    assert dim % num_heads == 0
    keys = jax.random.split(key, num_enc + num_dec)
    enc = _stack_layers([_init_encoder_layer(keys[i], dim, dim_ff)
                         for i in range(num_enc)])
    dec = _stack_layers([_init_decoder_layer(keys[num_enc + i], dim, dim_ff)
                         for i in range(num_dec)])
    return {"encoder": enc, "decoder": dec}


# ---------------------------------------------------------------------------

if __name__ == "__main__":
    B, S, T = 2, 8, 8
    D, H, F = 32, 4, 64
    NUM_ENC, NUM_DEC = 2, 2

    key = jax.random.PRNGKey(0)
    key, k_src, k_tgt, k_sp, k_tp, k_par = jax.random.split(key, 6)

    src = jax.random.normal(k_src, (B, S, D), jnp.float32)
    tgt = jax.random.normal(k_tgt, (B, T, D), jnp.float32)
    src_pos = jax.random.normal(k_sp, (B, S, D), jnp.float32)
    tgt_pos = jax.random.normal(k_tp, (B, T, D), jnp.float32)

    # key_padding_masks: boolean, True == ignore that key (last position padded)
    src_mask = jnp.zeros((B, S), jnp.bool_).at[:, -1].set(True)
    tgt_mask = jnp.zeros((B, T), jnp.bool_).at[:, -1].set(True)

    params = init_params(k_par, D, F, H, NUM_ENC, NUM_DEC)

    out, attn_w = transformer_forward(params, src, tgt, src_mask, tgt_mask,
                                      src_pos, tgt_pos, sem_embed=None, num_heads=H)
    jax.block_until_ready((out, attn_w))

    assert out.shape == (B, T, D)
    assert attn_w.shape == (B, T, T)
    assert bool(jnp.all(jnp.isfinite(out))) and bool(jnp.all(jnp.isfinite(attn_w)))
    # softmax rows sum to 1 over unmasked keys; the masked (last) key gets zero weight
    assert bool(jnp.all(jnp.abs(jnp.sum(attn_w, axis=-1) - 1.0) < 1e-3))
    assert bool(jnp.all(attn_w[:, :, -1] < 1e-6))

    # smoke-test the encoder stack too (dead code in the reference forward, so it is
    # skipped inside transformer_forward per the perf review, but verified here)
    src_bias = _key_padding_bias(_mask_to_ignore(src_mask), B, S)
    mem = _encoder_stack(src, src_pos, src_bias, params["encoder"], num_heads=H)
    jax.block_until_ready(mem)
    assert mem.shape == (B, S, D) and bool(jnp.all(jnp.isfinite(mem)))

    print("KERNEL_OK")
</pallas_src>

<mosaic_0001>
module attributes {stable_mosaic.version = 11 : i64} {
  func.func @_decoder_layer_stack_kernel(%arg0: i32, %arg1: i32, %arg2: memref<1x8x32xf32, #tpu.memory_space<vmem>>, %arg3: memref<1x8x32xf32, #tpu.memory_space<vmem>>, %arg4: memref<1x1x8xf32, #tpu.memory_space<vmem>>, %arg5: memref<1x8x32xf32, #tpu.memory_space<vmem>>, %arg6: memref<1x8x32xf32, #tpu.memory_space<vmem>>, %arg7: memref<1x8x32xf32, #tpu.memory_space<vmem>>, %arg8: memref<1x32x64xf32, #tpu.memory_space<vmem>>, %arg9: memref<1x1x64xf32, #tpu.memory_space<vmem>>, %arg10: memref<1x32x32xf32, #tpu.memory_space<vmem>>, %arg11: memref<1x1x32xf32, #tpu.memory_space<vmem>>, %arg12: memref<1x32x32xf32, #tpu.memory_space<vmem>>, %arg13: memref<1x1x32xf32, #tpu.memory_space<vmem>>, %arg14: memref<1x1x32xf32, #tpu.memory_space<vmem>>, %arg15: memref<1x1x32xf32, #tpu.memory_space<vmem>>, %arg16: memref<1x32x32xf32, #tpu.memory_space<vmem>>, %arg17: memref<1x1x32xf32, #tpu.memory_space<vmem>>, %arg18: memref<1x32x32xf32, #tpu.memory_space<vmem>>, %arg19: memref<1x1x32xf32, #tpu.memory_space<vmem>>, %arg20: memref<1x32x32xf32, #tpu.memory_space<vmem>>, %arg21: memref<1x1x32xf32, #tpu.memory_space<vmem>>, %arg22: memref<1x32x32xf32, #tpu.memory_space<vmem>>, %arg23: memref<1x1x32xf32, #tpu.memory_space<vmem>>, %arg24: memref<1x1x32xf32, #tpu.memory_space<vmem>>, %arg25: memref<1x1x32xf32, #tpu.memory_space<vmem>>, %arg26: memref<1x32x64xf32, #tpu.memory_space<vmem>>, %arg27: memref<1x1x64xf32, #tpu.memory_space<vmem>>, %arg28: memref<1x64x32xf32, #tpu.memory_space<vmem>>, %arg29: memref<1x1x32xf32, #tpu.memory_space<vmem>>, %arg30: memref<1x1x32xf32, #tpu.memory_space<vmem>>, %arg31: memref<1x1x32xf32, #tpu.memory_space<vmem>>, %arg32: memref<1x8x32xf32, #tpu.memory_space<vmem>>, %arg33: memref<1x8x8xf32, #tpu.memory_space<vmem>>) attributes {dimension_semantics = [#tpu.dimension_semantics<parallel>, #tpu.dimension_semantics<arbitrary>], iteration_bounds = array<i64: 2, 2>, scalar_prefetch = 0 : i64, scratch_operands = 0 : i64, tpu.core_type = #tpu.core_type<tc>, window_params = [{transform_indices = @transform_0, window_bounds = array<i64: 1, 8, 32>}, {transform_indices = @transform_1, window_bounds = array<i64: 1, 8, 32>}, {transform_indices = @transform_2, window_bounds = array<i64: 1, 1, 8>}, {transform_indices = @transform_3, window_bounds = array<i64: 1, 8, 32>}, {transform_indices = @transform_4, window_bounds = array<i64: 1, 8, 32>}, {transform_indices = @transform_5, window_bounds = array<i64: 1, 8, 32>}, {transform_indices = @transform_6, window_bounds = array<i64: 1, 32, 64>}, {transform_indices = @transform_7, window_bounds = array<i64: 1, 1, 64>}, {transform_indices = @transform_8, window_bounds = array<i64: 1, 32, 32>}, {transform_indices = @transform_9, window_bounds = array<i64: 1, 1, 32>}, {transform_indices = @transform_10, window_bounds = array<i64: 1, 32, 32>}, {transform_indices = @transform_11, window_bounds = array<i64: 1, 1, 32>}, {transform_indices = @transform_12, window_bounds = array<i64: 1, 1, 32>}, {transform_indices = @transform_13, window_bounds = array<i64: 1, 1, 32>}, {transform_indices = @transform_14, window_bounds = array<i64: 1, 32, 32>}, {transform_indices = @transform_15, window_bounds = array<i64: 1, 1, 32>}, {transform_indices = @transform_16, window_bounds = array<i64: 1, 32, 32>}, {transform_indices = @transform_17, window_bounds = array<i64: 1, 1, 32>}, {transform_indices = @transform_18, window_bounds = array<i64: 1, 32, 32>}, {transform_indices = @transform_19, window_bounds = array<i64: 1, 1, 32>}, {transform_indices = @transform_20, window_bounds = array<i64: 1, 32, 32>}, {transform_indices = @transform_21, window_bounds = array<i64: 1, 1, 32>}, {transform_indices = @transform_22, window_bounds = array<i64: 1, 1, 32>}, {transform_indices = @transform_23, window_bounds = array<i64: 1, 1, 32>}, {transform_indices = @transform_24, window_bounds = array<i64: 1, 32, 64>}, {transform_indices = @transform_25, window_bounds = array<i64: 1, 1, 64>}, {transform_indices = @transform_26, window_bounds = array<i64: 1, 64, 32>}, {transform_indices = @transform_27, window_bounds = array<i64: 1, 1, 32>}, {transform_indices = @transform_28, window_bounds = array<i64: 1, 1, 32>}, {transform_indices = @transform_29, window_bounds = array<i64: 1, 1, 32>}, {transform_indices = @transform_30, window_bounds = array<i64: 1, 8, 32>}, {transform_indices = @transform_31, window_bounds = array<i64: 1, 8, 8>}]} {
    %c0_i32 = arith.constant 0 : i32
    %0 = arith.cmpi eq, %arg1, %c0_i32 : i32
    %1 = arith.extui %0 : i1 to i32
    %c0_i32_0 = arith.constant 0 : i32
    %2 = arith.cmpi ne, %1, %c0_i32_0 : i32
    scf.if %2 {
      %c0_161 = arith.constant 0 : index
      %c0_162 = arith.constant 0 : index
      %c0_163 = arith.constant 0 : index
      %308 = vector.load %arg2[%c0_161, %c0_162, %c0_163] : memref<1x8x32xf32, #tpu.memory_space<vmem>>, vector<1x8x32xf32>
      %309 = vector.shape_cast %308 : vector<1x8x32xf32> to vector<8x32xf32>
      %c0_164 = arith.constant 0 : index
      %c0_165 = arith.constant 0 : index
      %c0_166 = arith.constant 0 : index
      %310 = vector.load %arg32[%c0_164, %c0_165, %c0_166] : memref<1x8x32xf32, #tpu.memory_space<vmem>>, vector<1x8x32xf32>
      %311 = vector.shape_cast %310 : vector<1x8x32xf32> to vector<8x32xf32>
      %312 = vector.shape_cast %309 : vector<8x32xf32> to vector<1x8x32xf32>
      tpu.vector_store %arg32[%c0_164, %c0_165, %c0_166], %312 {strides = array<i32>} : memref<1x8x32xf32, #tpu.memory_space<vmem>>, vector<1x8x32xf32>,
    } else {
    }
    %c0 = arith.constant 0 : index
    %c0_1 = arith.constant 0 : index
    %c0_2 = arith.constant 0 : index
    %3 = vector.load %arg32[%c0, %c0_1, %c0_2] : memref<1x8x32xf32, #tpu.memory_space<vmem>>, vector<1x8x32xf32>
    %4 = vector.shape_cast %3 : vector<1x8x32xf32> to vector<8x32xf32>
    %c0_3 = arith.constant 0 : index
    %c0_4 = arith.constant 0 : index
    %c0_5 = arith.constant 0 : index
    %5 = vector.load %arg3[%c0_3, %c0_4, %c0_5] : memref<1x8x32xf32, #tpu.memory_space<vmem>>, vector<1x8x32xf32>
    %6 = vector.shape_cast %5 : vector<1x8x32xf32> to vector<8x32xf32>
    %7 = arith.addf %4, %6 : vector<8x32xf32>
    %c0_6 = arith.constant 0 : index
    %c0_7 = arith.constant 0 : index
    %c0_8 = arith.constant 0 : index
    %8 = vector.load %arg8[%c0_6, %c0_7, %c0_8] : memref<1x32x64xf32, #tpu.memory_space<vmem>>, vector<1x32x64xf32>
    %9 = vector.shape_cast %8 : vector<1x32x64xf32> to vector<32x64xf32>
    %cst = arith.constant dense<0.000000e+00> : vector<8x64xf32>
    %10 = tpu.matmul %7, %9, %cst {dimension_numbers = #tpu.dot_dimension_numbers<[1], [0], [0], [1], [0, 0, 1, 1], [], []>} : vector<8x32xf32>, vector<32x64xf32>, vector<8x64xf32> -> vector<8x64xf32>
    %c0_9 = arith.constant 0 : index
    %c0_10 = arith.constant 0 : index
    %c0_11 = arith.constant 0 : index
    %11 = vector.load %arg9[%c0_9, %c0_10, %c0_11] : memref<1x1x64xf32, #tpu.memory_space<vmem>>, vector<1x1x64xf32>
    %12 = vector.shape_cast %11 : vector<1x1x64xf32> to vector<1x64xf32>
    %13 = vector.broadcast %12 : vector<1x64xf32> to vector<8x64xf32>
    %14 = arith.addf %10, %13 : vector<8x64xf32>
    %c0_12 = arith.constant 0 : index
    %c0_13 = arith.constant 0 : index
    %c0_14 = arith.constant 0 : index
    %15 = vector.load %arg10[%c0_12, %c0_13, %c0_14] : memref<1x32x32xf32, #tpu.memory_space<vmem>>, vector<1x32x32xf32>
    %16 = vector.shape_cast %15 : vector<1x32x32xf32> to vector<32x32xf32>
    %cst_15 = arith.constant dense<0.000000e+00> : vector<8x32xf32>
    %17 = tpu.matmul %4, %16, %cst_15 {dimension_numbers = #tpu.dot_dimension_numbers<[1], [0], [0], [1], [0, 0, 1, 1], [], []>} : vector<8x32xf32>, vector<32x32xf32>, vector<8x32xf32> -> vector<8x32xf32>
    %c0_16 = arith.constant 0 : index
    %c0_17 = arith.constant 0 : index
    %c0_18 = arith.constant 0 : index
    %18 = vector.load %arg11[%c0_16, %c0_17, %c0_18] : memref<1x1x32xf32, #tpu.memory_space<vmem>>, vector<1x1x32xf32>
    %19 = vector.shape_cast %18 : vector<1x1x32xf32> to vector<1x32xf32>
    %20 = vector.broadcast %19 : vector<1x32xf32> to vector<8x32xf32>
    %21 = arith.addf %17, %20 : vector<8x32xf32>
    %22 = vector.extract_strided_slice %14 {offsets = [0, 0], sizes = [8, 32], strides = [1, 1]} : vector<8x64xf32> to vector<8x32xf32>
    %23 = vector.extract_strided_slice %14 {offsets = [0, 32], sizes = [8, 32], strides = [1, 1]} : vector<8x64xf32> to vector<8x32xf32>
    %c0_19 = arith.constant 0 : index
    %c0_20 = arith.constant 0 : index
    %c0_21 = arith.constant 0 : index
    %24 = vector.load %arg4[%c0_19, %c0_20, %c0_21] : memref<1x1x8xf32, #tpu.memory_space<vmem>>, vector<1x1x8xf32>
    %25 = vector.shape_cast %24 : vector<1x1x8xf32> to vector<1x8xf32>
    %26 = vector.extract_strided_slice %22 {offsets = [0, 0], sizes = [8, 8], strides = [1, 1]} : vector<8x32xf32> to vector<8x8xf32>
    %27 = vector.extract_strided_slice %23 {offsets = [0, 0], sizes = [8, 8], strides = [1, 1]} : vector<8x32xf32> to vector<8x8xf32>
    %cst_22 = arith.constant dense<0.000000e+00> : vector<8x8xf32>
    %28 = tpu.matmul %26, %27, %cst_22 {dimension_numbers = #tpu.dot_dimension_numbers<[1], [1], [0], [0], [0, 0, 1, 0], [], []>} : vector<8x8xf32>, vector<8x8xf32>, vector<8x8xf32> -> vector<8x8xf32>
    %cst_23 = arith.constant 0.353553385 : f32
    %29 = vector.broadcast %cst_23 : f32 to vector<8x8xf32>
    %30 = arith.mulf %28, %29 : vector<8x8xf32>
    %31 = vector.broadcast %25 : vector<1x8xf32> to vector<8x8xf32>
    %32 = arith.addf %30, %31 : vector<8x8xf32>
    %cst_24 = arith.constant dense<0xFF800000> : vector<8xf32>
    %33 = vector.multi_reduction <maximumf>, %32, %cst_24 [1] : vector<8x8xf32> to vector<8xf32>
    %34 = vector.shape_cast %33 : vector<8xf32> to vector<8x1xf32>
    %35 = vector.broadcast %34 : vector<8x1xf32> to vector<8x8xf32>
    %36 = arith.subf %32, %35 : vector<8x8xf32>
    %37 = math.exp %36 : vector<8x8xf32>
    %cst_25 = arith.constant dense<0.000000e+00> : vector<8xf32>
    %38 = vector.multi_reduction <add>, %37, %cst_25 [1] : vector<8x8xf32> to vector<8xf32>
    %39 = vector.shape_cast %38 : vector<8xf32> to vector<8x1xf32>
    %40 = vector.broadcast %39 : vector<8x1xf32> to vector<8x8xf32>
    %41 = arith.divf %37, %40 : vector<8x8xf32>
    %42 = vector.extract_strided_slice %21 {offsets = [0, 0], sizes = [8, 8], strides = [1, 1]} : vector<8x32xf32> to vector<8x8xf32>
    %cst_26 = arith.constant dense<0.000000e+00> : vector<8x8xf32>
    %43 = tpu.matmul %41, %42, %cst_26 {dimension_numbers = #tpu.dot_dimension_numbers<[1], [0], [0], [1], [0, 0, 1, 1], [], []>} : vector<8x8xf32>, vector<8x8xf32>, vector<8x8xf32> -> vector<8x8xf32>
    %44 = vector.extract_strided_slice %22 {offsets = [0, 8], sizes = [8, 8], strides = [1, 1]} : vector<8x32xf32> to vector<8x8xf32>
    %45 = vector.extract_strided_slice %23 {offsets = [0, 8], sizes = [8, 8], strides = [1, 1]} : vector<8x32xf32> to vector<8x8xf32>
    %cst_27 = arith.constant dense<0.000000e+00> : vector<8x8xf32>
    %46 = tpu.matmul %44, %45, %cst_27 {dimension_numbers = #tpu.dot_dimension_numbers<[1], [1], [0], [0], [0, 0, 1, 0], [], []>} : vector<8x8xf32>, vector<8x8xf32>, vector<8x8xf32> -> vector<8x8xf32>
    %cst_28 = arith.constant 0.353553385 : f32
    %47 = vector.broadcast %cst_28 : f32 to vector<8x8xf32>
    %48 = arith.mulf %46, %47 : vector<8x8xf32>
    %49 = vector.broadcast %25 : vector<1x8xf32> to vector<8x8xf32>
    %50 = arith.addf %48, %49 : vector<8x8xf32>
    %cst_29 = arith.constant dense<0xFF800000> : vector<8xf32>
    %51 = vector.multi_reduction <maximumf>, %50, %cst_29 [1] : vector<8x8xf32> to vector<8xf32>
    %52 = vector.shape_cast %51 : vector<8xf32> to vector<8x1xf32>
    %53 = vector.broadcast %52 : vector<8x1xf32> to vector<8x8xf32>
    %54 = arith.subf %50, %53 : vector<8x8xf32>
    %55 = math.exp %54 : vector<8x8xf32>
    %cst_30 = arith.constant dense<0.000000e+00> : vector<8xf32>
    %56 = vector.multi_reduction <add>, %55, %cst_30 [1] : vector<8x8xf32> to vector<8xf32>
    %57 = vector.shape_cast %56 : vector<8xf32> to vector<8x1xf32>
    %58 = vector.broadcast %57 : vector<8x1xf32> to vector<8x8xf32>
    %59 = arith.divf %55, %58 : vector<8x8xf32>
    %60 = vector.extract_strided_slice %21 {offsets = [0, 8], sizes = [8, 8], strides = [1, 1]} : vector<8x32xf32> to vector<8x8xf32>
    %cst_31 = arith.constant dense<0.000000e+00> : vector<8x8xf32>
    %61 = tpu.matmul %59, %60, %cst_31 {dimension_numbers = #tpu.dot_dimension_numbers<[1], [0], [0], [1], [0, 0, 1, 1], [], []>} : vector<8x8xf32>, vector<8x8xf32>, vector<8x8xf32> -> vector<8x8xf32>
    %62 = arith.addf %41, %59 : vector<8x8xf32>
    %63 = vector.extract_strided_slice %22 {offsets = [0, 16], sizes = [8, 8], strides = [1, 1]} : vector<8x32xf32> to vector<8x8xf32>
    %64 = vector.extract_strided_slice %23 {offsets = [0, 16], sizes = [8, 8], strides = [1, 1]} : vector<8x32xf32> to vector<8x8xf32>
    %cst_32 = arith.constant dense<0.000000e+00> : vector<8x8xf32>
    %65 = tpu.matmul %63, %64, %cst_32 {dimension_numbers = #tpu.dot_dimension_numbers<[1], [1], [0], [0], [0, 0, 1, 0], [], []>} : vector<8x8xf32>, vector<8x8xf32>, vector<8x8xf32> -> vector<8x8xf32>
    %cst_33 = arith.constant 0.353553385 : f32
    %66 = vector.broadcast %cst_33 : f32 to vector<8x8xf32>
    %67 = arith.mulf %65, %66 : vector<8x8xf32>
    %68 = vector.broadcast %25 : vector<1x8xf32> to vector<8x8xf32>
    %69 = arith.addf %67, %68 : vector<8x8xf32>
    %cst_34 = arith.constant dense<0xFF800000> : vector<8xf32>
    %70 = vector.multi_reduction <maximumf>, %69, %cst_34 [1] : vector<8x8xf32> to vector<8xf32>
    %71 = vector.shape_cast %70 : vector<8xf32> to vector<8x1xf32>
    %72 = vector.broadcast %71 : vector<8x1xf32> to vector<8x8xf32>
    %73 = arith.subf %69, %72 : vector<8x8xf32>
    %74 = math.exp %73 : vector<8x8xf32>
    %cst_35 = arith.constant dense<0.000000e+00> : vector<8xf32>
    %75 = vector.multi_reduction <add>, %74, %cst_35 [1] : vector<8x8xf32> to vector<8xf32>
    %76 = vector.shape_cast %75 : vector<8xf32> to vector<8x1xf32>
    %77 = vector.broadcast %76 : vector<8x1xf32> to vector<8x8xf32>
    %78 = arith.divf %74, %77 : vector<8x8xf32>
    %79 = vector.extract_strided_slice %21 {offsets = [0, 16], sizes = [8, 8], strides = [1, 1]} : vector<8x32xf32> to vector<8x8xf32>
    %cst_36 = arith.constant dense<0.000000e+00> : vector<8x8xf32>
    %80 = tpu.matmul %78, %79, %cst_36 {dimension_numbers = #tpu.dot_dimension_numbers<[1], [0], [0], [1], [0, 0, 1, 1], [], []>} : vector<8x8xf32>, vector<8x8xf32>, vector<8x8xf32> -> vector<8x8xf32>
    %81 = arith.addf %62, %78 : vector<8x8xf32>
    %82 = vector.extract_strided_slice %22 {offsets = [0, 24], sizes = [8, 8], strides = [1, 1]} : vector<8x32xf32> to vector<8x8xf32>
    %83 = vector.extract_strided_slice %23 {offsets = [0, 24], sizes = [8, 8], strides = [1, 1]} : vector<8x32xf32> to vector<8x8xf32>
    %cst_37 = arith.constant dense<0.000000e+00> : vector<8x8xf32>
    %84 = tpu.matmul %82, %83, %cst_37 {dimension_numbers = #tpu.dot_dimension_numbers<[1], [1], [0], [0], [0, 0, 1, 0], [], []>} : vector<8x8xf32>, vector<8x8xf32>, vector<8x8xf32> -> vector<8x8xf32>
    %cst_38 = arith.constant 0.353553385 : f32
    %85 = vector.broadcast %cst_38 : f32 to vector<8x8xf32>
    %86 = arith.mulf %84, %85 : vector<8x8xf32>
    %87 = vector.broadcast %25 : vector<1x8xf32> to vector<8x8xf32>
    %88 = arith.addf %86, %87 : vector<8x8xf32>
    %cst_39 = arith.constant dense<0xFF800000> : vector<8xf32>
    %89 = vector.multi_reduction <maximumf>, %88, %cst_39 [1] : vector<8x8xf32> to vector<8xf32>
    %90 = vector.shape_cast %89 : vector<8xf32> to vector<8x1xf32>
    %91 = vector.broadcast %90 : vector<8x1xf32> to vector<8x8xf32>
    %92 = arith.subf %88, %91 : vector<8x8xf32>
    %93 = math.exp %92 : vector<8x8xf32>
    %cst_40 = arith.constant dense<0.000000e+00> : vector<8xf32>
    %94 = vector.multi_reduction <add>, %93, %cst_40 [1] : vector<8x8xf32> to vector<8xf32>
    %95 = vector.shape_cast %94 : vector<8xf32> to vector<8x1xf32>
    %96 = vector.broadcast %95 : vector<8x1xf32> to vector<8x8xf32>
    %97 = arith.divf %93, %96 : vector<8x8xf32>
    %98 = vector.extract_strided_slice %21 {offsets = [0, 24], sizes = [8, 8], strides = [1, 1]} : vector<8x32xf32> to vector<8x8xf32>
    %cst_41 = arith.constant dense<0.000000e+00> : vector<8x8xf32>
    %99 = tpu.matmul %97, %98, %cst_41 {dimension_numbers = #tpu.dot_dimension_numbers<[1], [0], [0], [1], [0, 0, 1, 1], [], []>} : vector<8x8xf32>, vector<8x8xf32>, vector<8x8xf32> -> vector<8x8xf32>
    %100 = arith.addf %81, %97 : vector<8x8xf32>
    %101 = tpu.concatenate %43, %61, %80, %99 in 1 : vector<8x8xf32>, vector<8x8xf32>, vector<8x8xf32>, vector<8x8xf32> -> vector<8x32xf32>
    %cst_42 = arith.constant 2.500000e-01 : f32
    %102 = vector.broadcast %cst_42 : f32 to vector<8x8xf32>
    %103 = arith.mulf %100, %102 : vector<8x8xf32>
    %c0_43 = arith.constant 0 : index
    %c0_44 = arith.constant 0 : index
    %c0_45 = arith.constant 0 : index
    %104 = vector.load %arg12[%c0_43, %c0_44, %c0_45] : memref<1x32x32xf32, #tpu.memory_space<vmem>>, vector<1x32x32xf32>
    %105 = vector.shape_cast %104 : vector<1x32x32xf32> to vector<32x32xf32>
    %cst_46 = arith.constant dense<0.000000e+00> : vector<8x32xf32>
    %106 = tpu.matmul %101, %105, %cst_46 {dimension_numbers = #tpu.dot_dimension_numbers<[1], [0], [0], [1], [0, 0, 1, 1], [], []>} : vector<8x32xf32>, vector<32x32xf32>, vector<8x32xf32> -> vector<8x32xf32>
    %c0_47 = arith.constant 0 : index
    %c0_48 = arith.constant 0 : index
    %c0_49 = arith.constant 0 : index
    %107 = vector.load %arg13[%c0_47, %c0_48, %c0_49] : memref<1x1x32xf32, #tpu.memory_space<vmem>>, vector<1x1x32xf32>
    %108 = vector.shape_cast %107 : vector<1x1x32xf32> to vector<1x32xf32>
    %109 = vector.broadcast %108 : vector<1x32xf32> to vector<8x32xf32>
    %110 = arith.addf %106, %109 : vector<8x32xf32>
    %111 = arith.addf %4, %110 : vector<8x32xf32>
    %c0_50 = arith.constant 0 : index
    %c0_51 = arith.constant 0 : index
    %c0_52 = arith.constant 0 : index
    %112 = vector.load %arg14[%c0_50, %c0_51, %c0_52] : memref<1x1x32xf32, #tpu.memory_space<vmem>>, vector<1x1x32xf32>
    %113 = vector.shape_cast %112 : vector<1x1x32xf32> to vector<1x32xf32>
    %c0_53 = arith.constant 0 : index
    %c0_54 = arith.constant 0 : index
    %c0_55 = arith.constant 0 : index
    %114 = vector.load %arg15[%c0_53, %c0_54, %c0_55] : memref<1x1x32xf32, #tpu.memory_space<vmem>>, vector<1x1x32xf32>
    %115 = vector.shape_cast %114 : vector<1x1x32xf32> to vector<1x32xf32>
    %cst_56 = arith.constant dense<0.000000e+00> : vector<8xf32>
    %116 = vector.multi_reduction <add>, %111, %cst_56 [1] : vector<8x32xf32> to vector<8xf32>
    %117 = vector.shape_cast %116 : vector<8xf32> to vector<8x1xf32>
    %cst_57 = arith.constant 3.200000e+01 : f32
    %118 = vector.broadcast %cst_57 : f32 to vector<8x1xf32>
    %119 = arith.divf %117, %118 : vector<8x1xf32>
    %120 = vector.broadcast %119 : vector<8x1xf32> to vector<8x32xf32>
    %121 = arith.subf %111, %120 : vector<8x32xf32>
    %122 = arith.mulf %121, %121 : vector<8x32xf32>
    %cst_58 = arith.constant dense<0.000000e+00> : vector<8xf32>
    %123 = vector.multi_reduction <add>, %122, %cst_58 [1] : vector<8x32xf32> to vector<8xf32>
    %124 = vector.shape_cast %123 : vector<8xf32> to vector<8x1xf32>
    %cst_59 = arith.constant 3.200000e+01 : f32
    %125 = vector.broadcast %cst_59 : f32 to vector<8x1xf32>
    %126 = arith.divf %124, %125 : vector<8x1xf32>
    %cst_60 = arith.constant 9.99999974E-6 : f32
    %127 = vector.broadcast %cst_60 : f32 to vector<8x1xf32>
    %128 = arith.addf %126, %127 : vector<8x1xf32>
    %129 = math.rsqrt %128 : vector<8x1xf32>
    %130 = vector.broadcast %129 : vector<8x1xf32> to vector<8x32xf32>
    %131 = arith.mulf %121, %130 : vector<8x32xf32>
    %132 = vector.broadcast %113 : vector<1x32xf32> to vector<8x32xf32>
    %133 = arith.mulf %131, %132 : vector<8x32xf32>
    %134 = vector.broadcast %115 : vector<1x32xf32> to vector<8x32xf32>
    %135 = arith.addf %133, %134 : vector<8x32xf32>
    %c0_61 = arith.constant 0 : index
    %c0_62 = arith.constant 0 : index
    %c0_63 = arith.constant 0 : index
    %136 = vector.load %arg33[%c0_61, %c0_62, %c0_63] : memref<1x8x8xf32, #tpu.memory_space<vmem>>, vector<1x8x8xf32>
    %137 = vector.shape_cast %136 : vector<1x8x8xf32> to vector<8x8xf32>
    %138 = vector.shape_cast %103 : vector<8x8xf32> to vector<1x8x8xf32>
    tpu.vector_store %arg33[%c0_61, %c0_62, %c0_63], %138 {strides = array<i32>} : memref<1x8x8xf32, #tpu.memory_space<vmem>>, vector<1x8x8xf32>,
    %c0_64 = arith.constant 0 : index
    %c0_65 = arith.constant 0 : index
    %c0_66 = arith.constant 0 : index
    %139 = vector.load %arg5[%c0_64, %c0_65, %c0_66] : memref<1x8x32xf32, #tpu.memory_space<vmem>>, vector<1x8x32xf32>
    %140 = vector.shape_cast %139 : vector<1x8x32xf32> to vector<8x32xf32>
    %141 = arith.addf %135, %140 : vector<8x32xf32>
    %c0_67 = arith.constant 0 : index
    %c0_68 = arith.constant 0 : index
    %c0_69 = arith.constant 0 : index
    %142 = vector.load %arg16[%c0_67, %c0_68, %c0_69] : memref<1x32x32xf32, #tpu.memory_space<vmem>>, vector<1x32x32xf32>
    %143 = vector.shape_cast %142 : vector<1x32x32xf32> to vector<32x32xf32>
    %cst_70 = arith.constant dense<0.000000e+00> : vector<8x32xf32>
    %144 = tpu.matmul %141, %143, %cst_70 {dimension_numbers = #tpu.dot_dimension_numbers<[1], [0], [0], [1], [0, 0, 1, 1], [], []>} : vector<8x32xf32>, vector<32x32xf32>, vector<8x32xf32> -> vector<8x32xf32>
    %c0_71 = arith.constant 0 : index
    %c0_72 = arith.constant 0 : index
    %c0_73 = arith.constant 0 : index
    %145 = vector.load %arg17[%c0_71, %c0_72, %c0_73] : memref<1x1x32xf32, #tpu.memory_space<vmem>>, vector<1x1x32xf32>
    %146 = vector.shape_cast %145 : vector<1x1x32xf32> to vector<1x32xf32>
    %147 = vector.broadcast %146 : vector<1x32xf32> to vector<8x32xf32>
    %148 = arith.addf %144, %147 : vector<8x32xf32>
    %c0_74 = arith.constant 0 : index
    %c0_75 = arith.constant 0 : index
    %c0_76 = arith.constant 0 : index
    %149 = vector.load %arg7[%c0_74, %c0_75, %c0_76] : memref<1x8x32xf32, #tpu.memory_space<vmem>>, vector<1x8x32xf32>
    %150 = vector.shape_cast %149 : vector<1x8x32xf32> to vector<8x32xf32>
    %c0_77 = arith.constant 0 : index
    %c0_78 = arith.constant 0 : index
    %c0_79 = arith.constant 0 : index
    %151 = vector.load %arg18[%c0_77, %c0_78, %c0_79] : memref<1x32x32xf32, #tpu.memory_space<vmem>>, vector<1x32x32xf32>
    %152 = vector.shape_cast %151 : vector<1x32x32xf32> to vector<32x32xf32>
    %cst_80 = arith.constant dense<0.000000e+00> : vector<8x32xf32>
    %153 = tpu.matmul %150, %152, %cst_80 {dimension_numbers = #tpu.dot_dimension_numbers<[1], [0], [0], [1], [0, 0, 1, 1], [], []>} : vector<8x32xf32>, vector<32x32xf32>, vector<8x32xf32> -> vector<8x32xf32>
    %c0_81 = arith.constant 0 : index
    %c0_82 = arith.constant 0 : index
    %c0_83 = arith.constant 0 : index
    %154 = vector.load %arg19[%c0_81, %c0_82, %c0_83] : memref<1x1x32xf32, #tpu.memory_space<vmem>>, vector<1x1x32xf32>
    %155 = vector.shape_cast %154 : vector<1x1x32xf32> to vector<1x32xf32>
    %156 = vector.broadcast %155 : vector<1x32xf32> to vector<8x32xf32>
    %157 = arith.addf %153, %156 : vector<8x32xf32>
    %c0_84 = arith.constant 0 : index
    %c0_85 = arith.constant 0 : index
    %c0_86 = arith.constant 0 : index
    %158 = vector.load %arg6[%c0_84, %c0_85, %c0_86] : memref<1x8x32xf32, #tpu.memory_space<vmem>>, vector<1x8x32xf32>
    %159 = vector.shape_cast %158 : vector<1x8x32xf32> to vector<8x32xf32>
    %c0_87 = arith.constant 0 : index
    %c0_88 = arith.constant 0 : index
    %c0_89 = arith.constant 0 : index
    %160 = vector.load %arg20[%c0_87, %c0_88, %c0_89] : memref<1x32x32xf32, #tpu.memory_space<vmem>>, vector<1x32x32xf32>
    %161 = vector.shape_cast %160 : vector<1x32x32xf32> to vector<32x32xf32>
    %cst_90 = arith.constant dense<0.000000e+00> : vector<8x32xf32>
    %162 = tpu.matmul %159, %161, %cst_90 {dimension_numbers = #tpu.dot_dimension_numbers<[1], [0], [0], [1], [0, 0, 1, 1], [], []>} : vector<8x32xf32>, vector<32x32xf32>, vector<8x32xf32> -> vector<8x32xf32>
    %c0_91 = arith.constant 0 : index
    %c0_92 = arith.constant 0 : index
    %c0_93 = arith.constant 0 : index
    %163 = vector.load %arg21[%c0_91, %c0_92, %c0_93] : memref<1x1x32xf32, #tpu.memory_space<vmem>>, vector<1x1x32xf32>
    %164 = vector.shape_cast %163 : vector<1x1x32xf32> to vector<1x32xf32>
    %165 = vector.broadcast %164 : vector<1x32xf32> to vector<8x32xf32>
    %166 = arith.addf %162, %165 : vector<8x32xf32>
    %167 = vector.extract_strided_slice %148 {offsets = [0, 0], sizes = [8, 8], strides = [1, 1]} : vector<8x32xf32> to vector<8x8xf32>
    %168 = vector.extract_strided_slice %157 {offsets = [0, 0], sizes = [8, 8], strides = [1, 1]} : vector<8x32xf32> to vector<8x8xf32>
    %cst_94 = arith.constant dense<0.000000e+00> : vector<8x8xf32>
    %169 = tpu.matmul %167, %168, %cst_94 {dimension_numbers = #tpu.dot_dimension_numbers<[1], [1], [0], [0], [0, 0, 1, 0], [], []>} : vector<8x8xf32>, vector<8x8xf32>, vector<8x8xf32> -> vector<8x8xf32>
    %cst_95 = arith.constant 0.353553385 : f32
    %170 = vector.broadcast %cst_95 : f32 to vector<8x8xf32>
    %171 = arith.mulf %169, %170 : vector<8x8xf32>
    %cst_96 = arith.constant dense<0xFF800000> : vector<8xf32>
    %172 = vector.multi_reduction <maximumf>, %171, %cst_96 [1] : vector<8x8xf32> to vector<8xf32>
    %173 = vector.shape_cast %172 : vector<8xf32> to vector<8x1xf32>
    %174 = vector.broadcast %173 : vector<8x1xf32> to vector<8x8xf32>
    %175 = arith.subf %171, %174 : vector<8x8xf32>
    %176 = math.exp %175 : vector<8x8xf32>
    %cst_97 = arith.constant dense<0.000000e+00> : vector<8xf32>
    %177 = vector.multi_reduction <add>, %176, %cst_97 [1] : vector<8x8xf32> to vector<8xf32>
    %178 = vector.shape_cast %177 : vector<8xf32> to vector<8x1xf32>
    %179 = vector.broadcast %178 : vector<8x1xf32> to vector<8x8xf32>
    %180 = arith.divf %176, %179 : vector<8x8xf32>
    %181 = vector.extract_strided_slice %166 {offsets = [0, 0], sizes = [8, 8], strides = [1, 1]} : vector<8x32xf32> to vector<8x8xf32>
    %cst_98 = arith.constant dense<0.000000e+00> : vector<8x8xf32>
    %182 = tpu.matmul %180, %181, %cst_98 {dimension_numbers = #tpu.dot_dimension_numbers<[1], [0], [0], [1], [0, 0, 1, 1], [], []>} : vector<8x8xf32>, vector<8x8xf32>, vector<8x8xf32> -> vector<8x8xf32>
    %183 = vector.extract_strided_slice %148 {offsets = [0, 8], sizes = [8, 8], strides = [1, 1]} : vector<8x32xf32> to vector<8x8xf32>
    %184 = vector.extract_strided_slice %157 {offsets = [0, 8], sizes = [8, 8], strides = [1, 1]} : vector<8x32xf32> to vector<8x8xf32>
    %cst_99 = arith.constant dense<0.000000e+00> : vector<8x8xf32>
    %185 = tpu.matmul %183, %184, %cst_99 {dimension_numbers = #tpu.dot_dimension_numbers<[1], [1], [0], [0], [0, 0, 1, 0], [], []>} : vector<8x8xf32>, vector<8x8xf32>, vector<8x8xf32> -> vector<8x8xf32>
    %cst_100 = arith.constant 0.353553385 : f32
    %186 = vector.broadcast %cst_100 : f32 to vector<8x8xf32>
    %187 = arith.mulf %185, %186 : vector<8x8xf32>
    %cst_101 = arith.constant dense<0xFF800000> : vector<8xf32>
    %188 = vector.multi_reduction <maximumf>, %187, %cst_101 [1] : vector<8x8xf32> to vector<8xf32>
    %189 = vector.shape_cast %188 : vector<8xf32> to vector<8x1xf32>
    %190 = vector.broadcast %189 : vector<8x1xf32> to vector<8x8xf32>
    %191 = arith.subf %187, %190 : vector<8x8xf32>
    %192 = math.exp %191 : vector<8x8xf32>
    %cst_102 = arith.constant dense<0.000000e+00> : vector<8xf32>
    %193 = vector.multi_reduction <add>, %192, %cst_102 [1] : vector<8x8xf32> to vector<8xf32>
    %194 = vector.shape_cast %193 : vector<8xf32> to vector<8x1xf32>
    %195 = vector.broadcast %194 : vector<8x1xf32> to vector<8x8xf32>
    %196 = arith.divf %192, %195 : vector<8x8xf32>
    %197 = vector.extract_strided_slice %166 {offsets = [0, 8], sizes = [8, 8], strides = [1, 1]} : vector<8x32xf32> to vector<8x8xf32>
    %cst_103 = arith.constant dense<0.000000e+00> : vector<8x8xf32>
    %198 = tpu.matmul %196, %197, %cst_103 {dimension_numbers = #tpu.dot_dimension_numbers<[1], [0], [0], [1], [0, 0, 1, 1], [], []>} : vector<8x8xf32>, vector<8x8xf32>, vector<8x8xf32> -> vector<8x8xf32>
    %199 = vector.extract_strided_slice %148 {offsets = [0, 16], sizes = [8, 8], strides = [1, 1]} : vector<8x32xf32> to vector<8x8xf32>
    %200 = vector.extract_strided_slice %157 {offsets = [0, 16], sizes = [8, 8], strides = [1, 1]} : vector<8x32xf32> to vector<8x8xf32>
    %cst_104 = arith.constant dense<0.000000e+00> : vector<8x8xf32>
    %201 = tpu.matmul %199, %200, %cst_104 {dimension_numbers = #tpu.dot_dimension_numbers<[1], [1], [0], [0], [0, 0, 1, 0], [], []>} : vector<8x8xf32>, vector<8x8xf32>, vector<8x8xf32> -> vector<8x8xf32>
    %cst_105 = arith.constant 0.353553385 : f32
    %202 = vector.broadcast %cst_105 : f32 to vector<8x8xf32>
    %203 = arith.mulf %201, %202 : vector<8x8xf32>
    %cst_106 = arith.constant dense<0xFF800000> : vector<8xf32>
    %204 = vector.multi_reduction <maximumf>, %203, %cst_106 [1] : vector<8x8xf32> to vector<8xf32>
    %205 = vector.shape_cast %204 : vector<8xf32> to vector<8x1xf32>
    %206 = vector.broadcast %205 : vector<8x1xf32> to vector<8x8xf32>
    %207 = arith.subf %203, %206 : vector<8x8xf32>
    %208 = math.exp %207 : vector<8x8xf32>
    %cst_107 = arith.constant dense<0.000000e+00> : vector<8xf32>
    %209 = vector.multi_reduction <add>, %208, %cst_107 [1] : vector<8x8xf32> to vector<8xf32>
    %210 = vector.shape_cast %209 : vector<8xf32> to vector<8x1xf32>
    %211 = vector.broadcast %210 : vector<8x1xf32> to vector<8x8xf32>
    %212 = arith.divf %208, %211 : vector<8x8xf32>
    %213 = vector.extract_strided_slice %166 {offsets = [0, 16], sizes = [8, 8], strides = [1, 1]} : vector<8x32xf32> to vector<8x8xf32>
    %cst_108 = arith.constant dense<0.000000e+00> : vector<8x8xf32>
    %214 = tpu.matmul %212, %213, %cst_108 {dimension_numbers = #tpu.dot_dimension_numbers<[1], [0], [0], [1], [0, 0, 1, 1], [], []>} : vector<8x8xf32>, vector<8x8xf32>, vector<8x8xf32> -> vector<8x8xf32>
    %215 = vector.extract_strided_slice %148 {offsets = [0, 24], sizes = [8, 8], strides = [1, 1]} : vector<8x32xf32> to vector<8x8xf32>
    %216 = vector.extract_strided_slice %157 {offsets = [0, 24], sizes = [8, 8], strides = [1, 1]} : vector<8x32xf32> to vector<8x8xf32>
    %cst_109 = arith.constant dense<0.000000e+00> : vector<8x8xf32>
    %217 = tpu.matmul %215, %216, %cst_109 {dimension_numbers = #tpu.dot_dimension_numbers<[1], [1], [0], [0], [0, 0, 1, 0], [], []>} : vector<8x8xf32>, vector<8x8xf32>, vector<8x8xf32> -> vector<8x8xf32>
    %cst_110 = arith.constant 0.353553385 : f32
    %218 = vector.broadcast %cst_110 : f32 to vector<8x8xf32>
    %219 = arith.mulf %217, %218 : vector<8x8xf32>
    %cst_111 = arith.constant dense<0xFF800000> : vector<8xf32>
    %220 = vector.multi_reduction <maximumf>, %219, %cst_111 [1] : vector<8x8xf32> to vector<8xf32>
    %221 = vector.shape_cast %220 : vector<8xf32> to vector<8x1xf32>
    %222 = vector.broadcast %221 : vector<8x1xf32> to vector<8x8xf32>
    %223 = arith.subf %219, %222 : vector<8x8xf32>
    %224 = math.exp %223 : vector<8x8xf32>
    %cst_112 = arith.constant dense<0.000000e+00> : vector<8xf32>
    %225 = vector.multi_reduction <add>, %224, %cst_112 [1] : vector<8x8xf32> to vector<8xf32>
    %226 = vector.shape_cast %225 : vector<8xf32> to vector<8x1xf32>
    %227 = vector.broadcast %226 : vector<8x1xf32> to vector<8x8xf32>
    %228 = arith.divf %224, %227 : vector<8x8xf32>
    %229 = vector.extract_strided_slice %166 {offsets = [0, 24], sizes = [8, 8], strides = [1, 1]} : vector<8x32xf32> to vector<8x8xf32>
    %cst_113 = arith.constant dense<0.000000e+00> : vector<8x8xf32>
    %230 = tpu.matmul %228, %229, %cst_113 {dimension_numbers = #tpu.dot_dimension_numbers<[1], [0], [0], [1], [0, 0, 1, 1], [], []>} : vector<8x8xf32>, vector<8x8xf32>, vector<8x8xf32> -> vector<8x8xf32>
    %231 = tpu.concatenate %182, %198, %214, %230 in 1 : vector<8x8xf32>, vector<8x8xf32>, vector<8x8xf32>, vector<8x8xf32> -> vector<8x32xf32>
    %c0_114 = arith.constant 0 : index
    %c0_115 = arith.constant 0 : index
    %c0_116 = arith.constant 0 : index
    %232 = vector.load %arg22[%c0_114, %c0_115, %c0_116] : memref<1x32x32xf32, #tpu.memory_space<vmem>>, vector<1x32x32xf32>
    %233 = vector.shape_cast %232 : vector<1x32x32xf32> to vector<32x32xf32>
    %cst_117 = arith.constant dense<0.000000e+00> : vector<8x32xf32>
    %234 = tpu.matmul %231, %233, %cst_117 {dimension_numbers = #tpu.dot_dimension_numbers<[1], [0], [0], [1], [0, 0, 1, 1], [], []>} : vector<8x32xf32>, vector<32x32xf32>, vector<8x32xf32> -> vector<8x32xf32>
    %c0_118 = arith.constant 0 : index
    %c0_119 = arith.constant 0 : index
    %c0_120 = arith.constant 0 : index
    %235 = vector.load %arg23[%c0_118, %c0_119, %c0_120] : memref<1x1x32xf32, #tpu.memory_space<vmem>>, vector<1x1x32xf32>
    %236 = vector.shape_cast %235 : vector<1x1x32xf32> to vector<1x32xf32>
    %237 = vector.broadcast %236 : vector<1x32xf32> to vector<8x32xf32>
    %238 = arith.addf %234, %237 : vector<8x32xf32>
    %239 = arith.addf %135, %238 : vector<8x32xf32>
    %c0_121 = arith.constant 0 : index
    %c0_122 = arith.constant 0 : index
    %c0_123 = arith.constant 0 : index
    %240 = vector.load %arg24[%c0_121, %c0_122, %c0_123] : memref<1x1x32xf32, #tpu.memory_space<vmem>>, vector<1x1x32xf32>
    %241 = vector.shape_cast %240 : vector<1x1x32xf32> to vector<1x32xf32>
    %c0_124 = arith.constant 0 : index
    %c0_125 = arith.constant 0 : index
    %c0_126 = arith.constant 0 : index
    %242 = vector.load %arg25[%c0_124, %c0_125, %c0_126] : memref<1x1x32xf32, #tpu.memory_space<vmem>>, vector<1x1x32xf32>
    %243 = vector.shape_cast %242 : vector<1x1x32xf32> to vector<1x32xf32>
    %cst_127 = arith.constant dense<0.000000e+00> : vector<8xf32>
    %244 = vector.multi_reduction <add>, %239, %cst_127 [1] : vector<8x32xf32> to vector<8xf32>
    %245 = vector.shape_cast %244 : vector<8xf32> to vector<8x1xf32>
    %cst_128 = arith.constant 3.200000e+01 : f32
    %246 = vector.broadcast %cst_128 : f32 to vector<8x1xf32>
    %247 = arith.divf %245, %246 : vector<8x1xf32>
    %248 = vector.broadcast %247 : vector<8x1xf32> to vector<8x32xf32>
    %249 = arith.subf %239, %248 : vector<8x32xf32>
    %250 = arith.mulf %249, %249 : vector<8x32xf32>
    %cst_129 = arith.constant dense<0.000000e+00> : vector<8xf32>
    %251 = vector.multi_reduction <add>, %250, %cst_129 [1] : vector<8x32xf32> to vector<8xf32>
    %252 = vector.shape_cast %251 : vector<8xf32> to vector<8x1xf32>
    %cst_130 = arith.constant 3.200000e+01 : f32
    %253 = vector.broadcast %cst_130 : f32 to vector<8x1xf32>
    %254 = arith.divf %252, %253 : vector<8x1xf32>
    %cst_131 = arith.constant 9.99999974E-6 : f32
    %255 = vector.broadcast %cst_131 : f32 to vector<8x1xf32>
    %256 = arith.addf %254, %255 : vector<8x1xf32>
    %257 = math.rsqrt %256 : vector<8x1xf32>
    %258 = vector.broadcast %257 : vector<8x1xf32> to vector<8x32xf32>
    %259 = arith.mulf %249, %258 : vector<8x32xf32>
    %260 = vector.broadcast %241 : vector<1x32xf32> to vector<8x32xf32>
    %261 = arith.mulf %259, %260 : vector<8x32xf32>
    %262 = vector.broadcast %243 : vector<1x32xf32> to vector<8x32xf32>
    %263 = arith.addf %261, %262 : vector<8x32xf32>
    %c0_132 = arith.constant 0 : index
    %c0_133 = arith.constant 0 : index
    %c0_134 = arith.constant 0 : index
    %264 = vector.load %arg26[%c0_132, %c0_133, %c0_134] : memref<1x32x64xf32, #tpu.memory_space<vmem>>, vector<1x32x64xf32>
    %265 = vector.shape_cast %264 : vector<1x32x64xf32> to vector<32x64xf32>
    %cst_135 = arith.constant dense<0.000000e+00> : vector<8x64xf32>
    %266 = tpu.matmul %263, %265, %cst_135 {dimension_numbers = #tpu.dot_dimension_numbers<[1], [0], [0], [1], [0, 0, 1, 1], [], []>} : vector<8x32xf32>, vector<32x64xf32>, vector<8x64xf32> -> vector<8x64xf32>
    %c0_136 = arith.constant 0 : index
    %c0_137 = arith.constant 0 : index
    %c0_138 = arith.constant 0 : index
    %267 = vector.load %arg27[%c0_136, %c0_137, %c0_138] : memref<1x1x64xf32, #tpu.memory_space<vmem>>, vector<1x1x64xf32>
    %268 = vector.shape_cast %267 : vector<1x1x64xf32> to vector<1x64xf32>
    %269 = vector.broadcast %268 : vector<1x64xf32> to vector<8x64xf32>
    %270 = arith.addf %266, %269 : vector<8x64xf32>
    %cst_139 = arith.constant 0.000000e+00 : f32
    %271 = vector.broadcast %cst_139 : f32 to vector<8x64xf32>
    %272 = arith.maximumf %270, %271 : vector<8x64xf32>
    %c0_140 = arith.constant 0 : index
    %c0_141 = arith.constant 0 : index
    %c0_142 = arith.constant 0 : index
    %273 = vector.load %arg28[%c0_140, %c0_141, %c0_142] : memref<1x64x32xf32, #tpu.memory_space<vmem>>, vector<1x64x32xf32>
    %274 = vector.shape_cast %273 : vector<1x64x32xf32> to vector<64x32xf32>
    %cst_143 = arith.constant dense<0.000000e+00> : vector<8x32xf32>
    %275 = tpu.matmul %272, %274, %cst_143 {dimension_numbers = #tpu.dot_dimension_numbers<[1], [0], [0], [1], [0, 0, 1, 1], [], []>} : vector<8x64xf32>, vector<64x32xf32>, vector<8x32xf32> -> vector<8x32xf32>
    %c0_144 = arith.constant 0 : index
    %c0_145 = arith.constant 0 : index
    %c0_146 = arith.constant 0 : index
    %276 = vector.load %arg29[%c0_144, %c0_145, %c0_146] : memref<1x1x32xf32, #tpu.memory_space<vmem>>, vector<1x1x32xf32>
    %277 = vector.shape_cast %276 : vector<1x1x32xf32> to vector<1x32xf32>
    %278 = vector.broadcast %277 : vector<1x32xf32> to vector<8x32xf32>
    %279 = arith.addf %275, %278 : vector<8x32xf32>
    %280 = arith.addf %263, %279 : vector<8x32xf32>
    %c0_147 = arith.constant 0 : index
    %c0_148 = arith.constant 0 : index
    %c0_149 = arith.constant 0 : index
    %281 = vector.load %arg30[%c0_147, %c0_148, %c0_149] : memref<1x1x32xf32, #tpu.memory_space<vmem>>, vector<1x1x32xf32>
    %282 = vector.shape_cast %281 : vector<1x1x32xf32> to vector<1x32xf32>
    %c0_150 = arith.constant 0 : index
    %c0_151 = arith.constant 0 : index
    %c0_152 = arith.constant 0 : index
    %283 = vector.load %arg31[%c0_150, %c0_151, %c0_152] : memref<1x1x32xf32, #tpu.memory_space<vmem>>, vector<1x1x32xf32>
    %284 = vector.shape_cast %283 : vector<1x1x32xf32> to vector<1x32xf32>
    %cst_153 = arith.constant dense<0.000000e+00> : vector<8xf32>
    %285 = vector.multi_reduction <add>, %280, %cst_153 [1] : vector<8x32xf32> to vector<8xf32>
    %286 = vector.shape_cast %285 : vector<8xf32> to vector<8x1xf32>
    %cst_154 = arith.constant 3.200000e+01 : f32
    %287 = vector.broadcast %cst_154 : f32 to vector<8x1xf32>
    %288 = arith.divf %286, %287 : vector<8x1xf32>
    %289 = vector.broadcast %288 : vector<8x1xf32> to vector<8x32xf32>
    %290 = arith.subf %280, %289 : vector<8x32xf32>
    %291 = arith.mulf %290, %290 : vector<8x32xf32>
    %cst_155 = arith.constant dense<0.000000e+00> : vector<8xf32>
    %292 = vector.multi_reduction <add>, %291, %cst_155 [1] : vector<8x32xf32> to vector<8xf32>
    %293 = vector.shape_cast %292 : vector<8xf32> to vector<8x1xf32>
    %cst_156 = arith.constant 3.200000e+01 : f32
    %294 = vector.broadcast %cst_156 : f32 to vector<8x1xf32>
    %295 = arith.divf %293, %294 : vector<8x1xf32>
    %cst_157 = arith.constant 9.99999974E-6 : f32
    %296 = vector.broadcast %cst_157 : f32 to vector<8x1xf32>
    %297 = arith.addf %295, %296 : vector<8x1xf32>
    %298 = math.rsqrt %297 : vector<8x1xf32>
    %299 = vector.broadcast %298 : vector<8x1xf32> to vector<8x32xf32>
    %300 = arith.mulf %290, %299 : vector<8x32xf32>
    %301 = vector.broadcast %282 : vector<1x32xf32> to vector<8x32xf32>
    %302 = arith.mulf %300, %301 : vector<8x32xf32>
    %303 = vector.broadcast %284 : vector<1x32xf32> to vector<8x32xf32>
    %304 = arith.addf %302, %303 : vector<8x32xf32>
    %c0_158 = arith.constant 0 : index
    %c0_159 = arith.constant 0 : index
    %c0_160 = arith.constant 0 : index
    %305 = vector.load %arg32[%c0_158, %c0_159, %c0_160] : memref<1x8x32xf32, #tpu.memory_space<vmem>>, vector<1x8x32xf32>
    %306 = vector.shape_cast %305 : vector<1x8x32xf32> to vector<8x32xf32>
    %307 = vector.shape_cast %304 : vector<8x32xf32> to vector<1x8x32xf32>
    tpu.vector_store %arg32[%c0_158, %c0_159, %c0_160], %307 {strides = array<i32>} : memref<1x8x32xf32, #tpu.memory_space<vmem>>, vector<1x8x32xf32>,
    return
  }
  func.func @transform_0(%arg0: i32, %arg1: i32) -> (i32, i32, i32) {
    %c0_i32 = arith.constant 0 : i32
    %c0_i32_0 = arith.constant 0 : i32
    %c0_i32_1 = arith.constant 0 : i32
    return %arg0, %c0_i32, %c0_i32_0 : i32, i32, i32
  }
  func.func @transform_1(%arg0: i32, %arg1: i32) -> (i32, i32, i32) {
    %c0_i32 = arith.constant 0 : i32
    %c0_i32_0 = arith.constant 0 : i32
    %c0_i32_1 = arith.constant 0 : i32
    return %arg0, %c0_i32, %c0_i32_0 : i32, i32, i32
  }
  func.func @transform_2(%arg0: i32, %arg1: i32) -> (i32, i32, i32) {
    %c0_i32 = arith.constant 0 : i32
    %c0_i32_0 = arith.constant 0 : i32
    %c0_i32_1 = arith.constant 0 : i32
    return %arg0, %c0_i32, %c0_i32_0 : i32, i32, i32
  }
  func.func @transform_3(%arg0: i32, %arg1: i32) -> (i32, i32, i32) {
    %c0_i32 = arith.constant 0 : i32
    %c0_i32_0 = arith.constant 0 : i32
    %c0_i32_1 = arith.constant 0 : i32
    return %arg0, %c0_i32, %c0_i32_0 : i32, i32, i32
  }
  func.func @transform_4(%arg0: i32, %arg1: i32) -> (i32, i32, i32) {
    %c0_i32 = arith.constant 0 : i32
    %c0_i32_0 = arith.constant 0 : i32
    %c0_i32_1 = arith.constant 0 : i32
    return %arg0, %c0_i32, %c0_i32_0 : i32, i32, i32
  }
  func.func @transform_5(%arg0: i32, %arg1: i32) -> (i32, i32, i32) {
    %c0_i32 = arith.constant 0 : i32
    %c0_i32_0 = arith.constant 0 : i32
    %c0_i32_1 = arith.constant 0 : i32
    return %arg0, %c0_i32, %c0_i32_0 : i32, i32, i32
  }
  func.func @transform_6(%arg0: i32, %arg1: i32) -> (i32, i32, i32) {
    %c0_i32 = arith.constant 0 : i32
    %c0_i32_0 = arith.constant 0 : i32
    %c0_i32_1 = arith.constant 0 : i32
    return %arg1, %c0_i32, %c0_i32_0 : i32, i32, i32
  }
  func.func @transform_7(%arg0: i32, %arg1: i32) -> (i32, i32, i32) {
    %c0_i32 = arith.constant 0 : i32
    %c0_i32_0 = arith.constant 0 : i32
    %c0_i32_1 = arith.constant 0 : i32
    return %arg1, %c0_i32, %c0_i32_0 : i32, i32, i32
  }
  func.func @transform_8(%arg0: i32, %arg1: i32) -> (i32, i32, i32) {
    %c0_i32 = arith.constant 0 : i32
    %c0_i32_0 = arith.constant 0 : i32
    %c0_i32_1 = arith.constant 0 : i32
    return %arg1, %c0_i32, %c0_i32_0 : i32, i32, i32
  }
  func.func @transform_9(%arg0: i32, %arg1: i32) -> (i32, i32, i32) {
    %c0_i32 = arith.constant 0 : i32
    %c0_i32_0 = arith.constant 0 : i32
    %c0_i32_1 = arith.constant 0 : i32
    return %arg1, %c0_i32, %c0_i32_0 : i32, i32, i32
  }
  func.func @transform_10(%arg0: i32, %arg1: i32) -> (i32, i32, i32) {
    %c0_i32 = arith.constant 0 : i32
    %c0_i32_0 = arith.constant 0 : i32
    %c0_i32_1 = arith.constant 0 : i32
    return %arg1, %c0_i32, %c0_i32_0 : i32, i32, i32
  }
  func.func @transform_11(%arg0: i32, %arg1: i32) -> (i32, i32, i32) {
    %c0_i32 = arith.constant 0 : i32
    %c0_i32_0 = arith.constant 0 : i32
    %c0_i32_1 = arith.constant 0 : i32
    return %arg1, %c0_i32, %c0_i32_0 : i32, i32, i32
  }
  func.func @transform_12(%arg0: i32, %arg1: i32) -> (i32, i32, i32) {
    %c0_i32 = arith.constant 0 : i32
    %c0_i32_0 = arith.constant 0 : i32
    %c0_i32_1 = arith.constant 0 : i32
    return %arg1, %c0_i32, %c0_i32_0 : i32, i32, i32
  }
  func.func @transform_13(%arg0: i32, %arg1: i32) -> (i32, i32, i32) {
    %c0_i32 = arith.constant 0 : i32
    %c0_i32_0 = arith.constant 0 : i32
    %c0_i32_1 = arith.constant 0 : i32
    return %arg1, %c0_i32, %c0_i32_0 : i32, i32, i32
  }
  func.func @transform_14(%arg0: i32, %arg1: i32) -> (i32, i32, i32) {
    %c0_i32 = arith.constant 0 : i32
    %c0_i32_0 = arith.constant 0 : i32
    %c0_i32_1 = arith.constant 0 : i32
    return %arg1, %c0_i32, %c0_i32_0 : i32, i32, i32
  }
  func.func @transform_15(%arg0: i32, %arg1: i32) -> (i32, i32, i32) {
    %c0_i32 = arith.constant 0 : i32
    %c0_i32_0 = arith.constant 0 : i32
    %c0_i32_1 = arith.constant 0 : i32
    return %arg1, %c0_i32, %c0_i32_0 : i32, i32, i32
  }
  func.func @transform_16(%arg0: i32, %arg1: i32) -> (i32, i32, i32) {
    %c0_i32 = arith.constant 0 : i32
    %c0_i32_0 = arith.constant 0 : i32
    %c0_i32_1 = arith.constant 0 : i32
    return %arg1, %c0_i32, %c0_i32_0 : i32, i32, i32
  }
  func.func @transform_17(%arg0: i32, %arg1: i32) -> (i32, i32, i32) {
    %c0_i32 = arith.constant 0 : i32
    %c0_i32_0 = arith.constant 0 : i32
    %c0_i32_1 = arith.constant 0 : i32
    return %arg1, %c0_i32, %c0_i32_0 : i32, i32, i32
  }
  func.func @transform_18(%arg0: i32, %arg1: i32) -> (i32, i32, i32) {
    %c0_i32 = arith.constant 0 : i32
    %c0_i32_0 = arith.constant 0 : i32
    %c0_i32_1 = arith.constant 0 : i32
    return %arg1, %c0_i32, %c0_i32_0 : i32, i32, i32
  }
  func.func @transform_19(%arg0: i32, %arg1: i32) -> (i32, i32, i32) {
    %c0_i32 = arith.constant 0 : i32
    %c0_i32_0 = arith.constant 0 : i32
    %c0_i32_1 = arith.constant 0 : i32
    return %arg1, %c0_i32, %c0_i32_0 : i32, i32, i32
  }
  func.func @transform_20(%arg0: i32, %arg1: i32) -> (i32, i32, i32) {
    %c0_i32 = arith.constant 0 : i32
    %c0_i32_0 = arith.constant 0 : i32
    %c0_i32_1 = arith.constant 0 : i32
    return %arg1, %c0_i32, %c0_i32_0 : i32, i32, i32
  }
  func.func @transform_21(%arg0: i32, %arg1: i32) -> (i32, i32, i32) {
    %c0_i32 = arith.constant 0 : i32
    %c0_i32_0 = arith.constant 0 : i32
    %c0_i32_1 = arith.constant 0 : i32
    return %arg1, %c0_i32, %c0_i32_0 : i32, i32, i32
  }
  func.func @transform_22(%arg0: i32, %arg1: i32) -> (i32, i32, i32) {
    %c0_i32 = arith.constant 0 : i32
    %c0_i32_0 = arith.constant 0 : i32
    %c0_i32_1 = arith.constant 0 : i32
    return %arg1, %c0_i32, %c0_i32_0 : i32, i32, i32
  }
  func.func @transform_23(%arg0: i32, %arg1: i32) -> (i32, i32, i32) {
    %c0_i32 = arith.constant 0 : i32
    %c0_i32_0 = arith.constant 0 : i32
    %c0_i32_1 = arith.constant 0 : i32
    return %arg1, %c0_i32, %c0_i32_0 : i32, i32, i32
  }
  func.func @transform_24(%arg0: i32, %arg1: i32) -> (i32, i32, i32) {
    %c0_i32 = arith.constant 0 : i32
    %c0_i32_0 = arith.constant 0 : i32
    %c0_i32_1 = arith.constant 0 : i32
    return %arg1, %c0_i32, %c0_i32_0 : i32, i32, i32
  }
  func.func @transform_25(%arg0: i32, %arg1: i32) -> (i32, i32, i32) {
    %c0_i32 = arith.constant 0 : i32
    %c0_i32_0 = arith.constant 0 : i32
    %c0_i32_1 = arith.constant 0 : i32
    return %arg1, %c0_i32, %c0_i32_0 : i32, i32, i32
  }
  func.func @transform_26(%arg0: i32, %arg1: i32) -> (i32, i32, i32) {
    %c0_i32 = arith.constant 0 : i32
    %c0_i32_0 = arith.constant 0 : i32
    %c0_i32_1 = arith.constant 0 : i32
    return %arg1, %c0_i32, %c0_i32_0 : i32, i32, i32
  }
  func.func @transform_27(%arg0: i32, %arg1: i32) -> (i32, i32, i32) {
    %c0_i32 = arith.constant 0 : i32
    %c0_i32_0 = arith.constant 0 : i32
    %c0_i32_1 = arith.constant 0 : i32
    return %arg1, %c0_i32, %c0_i32_0 : i32, i32, i32
  }
  func.func @transform_28(%arg0: i32, %arg1: i32) -> (i32, i32, i32) {
    %c0_i32 = arith.constant 0 : i32
    %c0_i32_0 = arith.constant 0 : i32
    %c0_i32_1 = arith.constant 0 : i32
    return %arg1, %c0_i32, %c0_i32_0 : i32, i32, i32
  }
  func.func @transform_29(%arg0: i32, %arg1: i32) -> (i32, i32, i32) {
    %c0_i32 = arith.constant 0 : i32
    %c0_i32_0 = arith.constant 0 : i32
    %c0_i32_1 = arith.constant 0 : i32
    return %arg1, %c0_i32, %c0_i32_0 : i32, i32, i32
  }
  func.func @transform_30(%arg0: i32, %arg1: i32) -> (i32, i32, i32) {
    %c0_i32 = arith.constant 0 : i32
    %c0_i32_0 = arith.constant 0 : i32
    %c0_i32_1 = arith.constant 0 : i32
    return %arg0, %c0_i32, %c0_i32_0 : i32, i32, i32
  }
  func.func @transform_31(%arg0: i32, %arg1: i32) -> (i32, i32, i32) {
    %c0_i32 = arith.constant 0 : i32
    %c0_i32_0 = arith.constant 0 : i32
    %c0_i32_1 = arith.constant 0 : i32
    return %arg0, %c0_i32, %c0_i32_0 : i32, i32, i32
  }
}

</mosaic_0001>

<bundles_post_ra>
// kernel: transformer_forward.1
= control target key start
LH: loop header
LB: loop body
LE: loop exit
PB: predicated region body
PF: predicated region fallthrough
CT: control target
= control target key end

     0   :  { %s6081_s6 = smov 1   ;;  %s6082_s10 = smov 2   ;;  %s7341_s0 = inlined_call_operand.smem [shape: u32[32], index: -1, kind: input, shape index: {}] }
   0x1   :  { %s6156_s5 = sld [smem:[%s7341_s0]]   ;;  %s6083_s14 = smov 3  }
   0x2   :  { %s6161_s9 = sld [smem:[%s7341_s0 + %s6081_s6]]   ;;  %s6084_s18 = smov 4  }
   0x3   :  { %s6166_s13 = sld [smem:[%s7341_s0 + %s6082_s10]]   ;;  %s6085_s22 = smov 5  }
   0x4   :  { %s6171_s17 = sld [smem:[%s7341_s0 + %s6083_s14]]   ;;  %s6086_s26 = smov 6  }
   0x5   :  { %s6176_s21 = sld [smem:[%s7341_s0 + %s6084_s18]]   ;;  %s6087_s30 = smov 7  }
   0x6   :  { %s6181_s25 = sld [smem:[%s7341_s0 + %s6085_s22]]   ;;  %s6088_s4 = smov 8  }
   0x7   :  { %7406 = sst [smem:[#allocation47_spill]] %s6156_s5  ;;  %s6089_s10 = smov 9  }
   0x8   :  { %7407 = sst [smem:[#allocation48_spill]] %s6161_s9  ;;  %s6090_s15 = smov 10  }
   0x9   :  { %7408 = sst [smem:[#allocation49_spill]] %s6166_s13  ;;  %s6091_s20 = smov 11  }
   0xa   :  { %7409 = sst [smem:[#allocation50_spill]] %s6171_s17  ;;  %s6093_s1 = smov 13  }
   0xb   :  { %7410 = sst [smem:[#allocation51_spill]] %s6176_s21  ;;  %s6094_s7 = smov 14  }
   0xc   :  { %7411 = sst [smem:[#allocation52_spill]] %s6181_s25  ;;  %s6096_s22 = smov 16  }
   0xd   :  { %s6186_s29 = sld [smem:[%s7341_s0 + %s6086_s26]]   ;;  %s6092_s26 = smov 12  }
   0xe   :  { %s6191_s3 = sld [smem:[%s7341_s0 + %s6087_s30]]   ;;  %s6097_s28 = smov 17  }
   0xf   :  { %s6196_s8 = sld [smem:[%s7341_s0 + %s6088_s4]]  }
  0x10   :  { %s6201_s14 = sld [smem:[%s7341_s0 + %s6089_s10]]  }
  0x11   :  { %s6206_s19 = sld [smem:[%s7341_s0 + %s6090_s15]]   ;;  %s6095_s15 = smov 15  }
  0x12   :  { %s6211_s24 = sld [smem:[%s7341_s0 + %s6091_s20]]  }
  0x13   :  { %7412 = sst [smem:[#allocation53_spill]] %s6186_s29 }
  0x14   :  { %7413 = sst [smem:[#allocation54_spill]] %s6191_s3 }
  0x15   :  { %7414 = sst [smem:[#allocation55_spill]] %s6196_s8 }
  0x16   :  { %7415 = sst [smem:[#allocation56_spill]] %s6201_s14 }
  0x17   :  { %7416 = sst [smem:[#allocation57_spill]] %s6206_s19 }
  0x18   :  { %7417 = sst [smem:[#allocation58_spill]] %s6211_s24 }
  0x19   :  { %s6216_s30 = sld [smem:[%s7341_s0 + %s6092_s26]]  }
  0x1a   :  { %s6221_s6 = sld [smem:[%s7341_s0 + %s6093_s1]]  }
  0x1b   :  { %s6226_s12 = sld [smem:[%s7341_s0 + %s6094_s7]]   ;;  %s6098_s7 = smov 18  }
  0x1c   :  { %s6231_s20 = sld [smem:[%s7341_s0 + %s6095_s15]]   ;;  %s6099_s15 = smov 19  }
  0x1d   :  { %s6236_s27 = sld [smem:[%s7341_s0 + %s6096_s22]]   ;;  %s6100_s22 = smov 20  }
  0x1e   :  { %s6241_s4 = sld [smem:[%s7341_s0 + %s6097_s28]]   ;;  %s6101_s28 = smov 21  }
  0x1f   :  { %7418 = sst [smem:[#allocation59_spill]] %s6216_s30 }
  0x20   :  { %7419 = sst [smem:[#allocation60_spill]] %s6221_s6 }
  0x21   :  { %7420 = sst [smem:[#allocation61_spill]] %s6226_s12 }
  0x22   :  { %7421 = sst [smem:[#allocation62_spill]] %s6231_s20 }
  0x23   :  { %7422 = sst [smem:[#allocation63_spill]] %s6236_s27 }
  0x24   :  { %7423 = sst [smem:[#allocation64_spill]] %s6241_s4 }
  0x25   :  { %s6246_s19 = sld [smem:[%s7341_s0 + %s6098_s7]]   ;;  %s6102_s7 = smov 22  }
  0x26   :  { %s6251_s8 = sld [smem:[%s7341_s0 + %s6099_s15]]   ;;  %s6103_s15 = smov 23  }
  0x27   :  { %s6256_s29 = sld [smem:[%s7341_s0 + %s6100_s22]]   ;;  %s6104_s22 = smov 24  }
  0x28   :  { %s6261_s3 = sld [smem:[%s7341_s0 + %s6101_s28]]   ;;  %s6105_s28 = smov 25  }
  0x29   :  { %s6266_s25 = sld [smem:[%s7341_s0 + %s6102_s7]]   ;;  %s6106_s7 = smov 26  }
  0x2a   :  { %s6271_s21 = sld [smem:[%s7341_s0 + %s6103_s15]]   ;;  %s6107_s15 = smov 27  }
  0x2b   :  { %7424 = sst [smem:[#allocation65_spill]] %s6246_s19 }
  0x2c   :  { %7425 = sst [smem:[#allocation66_spill]] %s6251_s8 }
  0x2d   :  { %7426 = sst [smem:[#allocation67_spill]] %s6256_s29 }
  0x2e   :  { %7427 = sst [smem:[#allocation68_spill]] %s6261_s3 }
  0x2f   :  { %7428 = sst [smem:[#allocation69_spill]] %s6266_s25 }
  0x30   :  { %7429 = sst [smem:[#allocation70_spill]] %s6271_s21 }
  0x31   :  { %s6276_s17 = sld [smem:[%s7341_s0 + %s6104_s22]]   ;;  %s6108_s22 = smov 28  }
  0x32   :  { %s6281_s9 = sld [smem:[%s7341_s0 + %s6105_s28]]   ;;  %s6109_s28 = smov 29  }
  0x33   :  { %s6286_s5 = sld [smem:[%s7341_s0 + %s6106_s7]]   ;;  %s6110_s7 = smov 30  }
  0x34   :  { %s6291_s13 = sld [smem:[%s7341_s0 + %s6107_s15]]   ;;  %s6111_s15 = smov 31  }
  0x35   :  { %s6301_s25 = sld [smem:[%s7341_s0 + %s6109_s28]]  }
  0x37   :  { %7430 = sst [smem:[#allocation71_spill]] %s6276_s17 }
  0x38   :  { %7431 = sst [smem:[#allocation72_spill]] %s6281_s9 }
  0x39   :  { %7432 = sst [smem:[#allocation73_spill]] %s6286_s5 }
  0x3a   :  { %7433 = sst [smem:[#allocation74_spill]] %s6291_s13 }
  0x3b   :  { %s6296_s17 = sld [smem:[%s7341_s0 + %s6108_s22]]  }
  0x3c   :  { %7435 = sst [smem:[#allocation76_spill]] %s6301_s25 }
  0x3d   :  { %s6306_s5 = sld [smem:[%s7341_s0 + %s6110_s7]]  }
  0x3e   :  { %s6311_s13 = sld [smem:[%s7341_s0 + %s6111_s15]]  }
  0x41   :  { %7434 = sst [smem:[#allocation75_spill]] %s6296_s17 }
  0x43   :  { %7436 = sst [smem:[#allocation77_spill]] %s6306_s5 }
  0x44   :  { %7437 = sst [smem:[#allocation78_spill]] %s6311_s13 }
  0x45   :  { %69 = vsyncpa [#allocation3], 0 }
  0x46   :  { %71 = vsyncpa [#allocation3 + $0x1], 0 }
  0x47   :  { %72 = vsyncpa [#allocation6], 0 }
  0x48   :  { %74 = vsyncpa [#allocation6 + $0x1], 0 }
  0x49   :  { %75 = vsyncpa [#allocation9], 0 }
  0x4a   :  { %77 = vsyncpa [#allocation9 + $0x1], 0 }
  0x4b   :  { %78 = vsyncpa [#allocation12], 0 }
  0x4c   :  { %80 = vsyncpa [#allocation12 + $0x1], 0 }
  0x4d   :  { %81 = vsyncpa [#allocation15], 0 }
  0x4e   :  { %83 = vsyncpa [#allocation15 + $0x1], 0 }
  0x4f   :  { %84 = vsyncpa [#allocation18], 0 }
  0x50   :  { %86 = vsyncpa [#allocation18 + $0x1], 0 }
  0x51   :  { %87 = vsyncpa [#allocation21], 0 }
  0x52   :  { %89 = vsyncpa [#allocation21 + $0x1], 0 }
  0x53   :  { %90 = vsyncpa [#allocation24], 0 }
  0x54   :  { %92 = vsyncpa [#allocation24 + $0x1], 0 }
  0x55   :  { %93 = vsyncpa [#allocation27], 0 }
  0x56   :  { %95 = vsyncpa [#allocation27 + $0x1], 0 }
  0x57   :  { %96 = vsyncpa [#allocation30], 0 }
  0x58   :  { %98 = vsyncpa [#allocation30 + $0x1], 0 }
  0x59   :  { %99 = vsyncpa [#allocation4], 0 }
  0x5a   :  { %101 = vsyncpa [#allocation4 + $0x1], 0 }
  0x5b   :  { %102 = vsyncpa [#allocation34], 0 }
  0x5c   :  { %104 = vsyncpa [#allocation34 + $0x1], 0  ;;  %s6313_s0 = smov 0   ;;  %s6315_s22 = smov 0  }
  0x5d   :  { %s6317_s23 = smov 0   ;;  %s6319_s26 = smov 0  }
  0x5e   :  { %s6321_s28 = smov 0   ;;  %s6323_s1 = smov 0  }
  0x5f   :  { %s6325_s2 = smov 0   ;;  %s6327_s7 = smov 0  }
  0x60   :  { %s6329_s10 = smov 0   ;;  %s6331_s11 = smov 0  }
  0x61   :  { %s6333_s15 = smov 0  }
  0x62 LB: > { %s7438_s30 = sld [smem:[#allocation59_spill]]  ;;  %s7439_s21 = sld [smem:[#allocation70_spill]]  ;;  %s6079_s15 = sphi %s6333_s15, %s110_s15   ;;  %s6075_s11 = sphi %s6331_s11, %s7555_s11   ;;  %s6071_s10 = sphi %s6329_s10, %s7554_s10   ;;  %s6067_s7 = sphi %s6327_s7, %s7553_s7   ;;  %s6063_s2 = sphi %s6325_s2, %s7552_s2   ;;  %s6059_s1 = sphi %s6323_s1, %s7551_s1   ;;  %s6055_s28 = sphi %s6321_s28, %s7550_s28   ;;  %s6051_s26 = sphi %s6319_s26, %s7549_s26   ;;  %s6047_s23 = sphi %s6317_s23, %s7548_s23   ;;  %s6043_s22 = sphi %s6315_s22, %s7547_s22   ;;  %s6039_s0 = sphi %s6313_s0, %s7546_s0  }
  0x63   : > { %s7440_s20 = sld [smem:[#allocation62_spill]]  ;;  %s7441_s17 = sld [smem:[#allocation75_spill]] }
  0x64   : > { %s7442_s14 = sld [smem:[#allocation56_spill]]  ;;  %s7444_s8 = sld [smem:[#allocation66_spill]] }
  0x65   : > { %s7443_s9 = sld [smem:[#allocation72_spill]]  ;;  %s7445_s6 = sld [smem:[#allocation60_spill]] }
  0x66   : > { %s7446_s4 = sld [smem:[#allocation64_spill]]  ;;  %s7447_s3 = sld [smem:[#allocation68_spill]] }
  0x67   : > { %s7448_s24 = sld [smem:[#allocation58_spill]]  ;;  %7449 = sst [smem:[#allocation79_spill]] %s6039_s0 }
  0x68   : > { %7450 = sst [smem:[#allocation80_spill]] %s6043_s22  ;;  %s6367_s16 = sadd.s32 4294967295, %s6079_s15  }
  0x69   : > { %7451 = sst [smem:[#allocation81_spill]] %s6047_s23  ;;  %s4689_s18 = sadd.s32 4294967294, %s6079_s15  }
  0x6a   : > { %7452 = sst [smem:[#allocation82_spill]] %s6055_s28  ;;  %s119_s5 = sadd.s32 1, %s6071_s10 }
  0x6b   : > { %7453 = sst [smem:[#allocation83_spill]] %s6059_s1  ;;  %s122_s13 = sadd.s32 1, %s6075_s11 }
  0x6c   : > { %7454 = sst [smem:[#allocation84_spill]] %s6063_s2  ;;  %p120_p0 = scmp.ge.s32.totalorder %s119_s5, 2 }
  0x6d   : > { %7455 = sst [smem:[#allocation85_spill]] %s6067_s7  ;;  %s363_s2 = sadd.s32 1, %s6059_s1 }
  0x6e   : > { %7456 = sst [smem:[#allocation86_spill]] %s6071_s10  ;;  %p370_p1 = scmp.ne.s32.totalorder %s6059_s1, %s6055_s28 }
  0x6f   : > { %7457 = sst [smem:[#allocation87_spill]] %s6075_s11  ;;  %p371_p2 = scmp.eq.s32.totalorder %s6079_s15, 0 }
  0x70   : > { %7458 = sst [smem:[#allocation88_spill]] %s6079_s15  ;;  %s7557_s5 = smov (%p120_p0, %s119_s5), 0 }
  0x71   : > { %7459 = sst [smem:[#allocation89_spill]] %s7557_s5  ;;  %s7559_s13 = smov (!%p120_p0, %s122_s13), %s6075_s11 }
  0x72   : > { %s360_s7 = ssub.s32 %s6071_s10, %s7557_s5  ;;  %p6381_p3 = por %p371_p2, %p370_p1 }
  0x73   : > { %p124_p4 = scmp.ge.s32.totalorder %s7559_s13, 2  ;;  %p361_p5 = scmp.eq.s32.totalorder %s360_s7, 0 }
  0x74   : > { %p376_p6 = scmp.ne.s32.totalorder %s6055_s28, %s6051_s26  ;;  %p377_p7 = scmp.eq.s32.totalorder %s6367_s16, 0 }
  0x75   : > { %s7561_s13 = smov (%p124_p4, %s7559_s13), 0  ;;  %s909_s27 = sadd.s32 1, %s6047_s23 }
  0x76   : > { %7461 = sst [smem:[#allocation90_spill]] %s7561_s13  ;;  %p6392_p8 = por %p377_p7, %p376_p6 }
  0x77   : > { %s6390_s29 = scalar_select %p361_p5, %s6059_s1, %s363_s2  }
  0x78   : > { %s7463_s19 = scalar_select %p6392_p8, 1, 0 }
  0x79   : > { %7462 = sst [smem:[#allocation91_spill]] %s6390_s29  ;;  %s906_s5 = ssub.s32 %s6075_s11, %s7561_s13 }
  0x7a   : > { %p907_p9 = scmp.eq.s32.totalorder %s906_s5, 0  ;;  %p919_p10 = scmp.ne.s32.totalorder %s6047_s23, %s6043_s22 }
  0x7b   : > { %p920_p11 = scmp.eq.s32.totalorder %s6367_s16, 3  ;;  %p925_p13 = scmp.ne.s32.totalorder %s6043_s22, %s6039_s0 }
  0x7c   : > { %s6403_s12 = scalar_select %p907_p9, %s6047_s23, %s909_s27  }
  0x7d   : > { %p6405_p12 = por %p920_p11, %p919_p10  ;;  %p926_p0 = scmp.eq.s32.totalorder %s4689_s18, 3 }
  0x7e   : > { %7464 = sst [smem:[#allocation92_spill]] %s6403_s12  ;;  %p4691_p2 = scmp.ge.s32.totalorder %s6079_s15, 4 }
  0x7f   : > { %s7465_s7 = scalar_select %p6405_p12, 1, 0 }
  0x80   : > { %p6411_p1 = por %p926_p0, %p925_p13  ;;  %968 = sbr.rel (%p4691_p2) target bundleno = 618 (0x26a), region = 16 }
  0x81   : > { %7466 = sst [smem:[#allocation93_spill]] %s7465_s7  ;;  %s6417_s5 = sand.u32 (!%p4691_p2), 1, %s6059_s1  }
  0x82   : > { %s7467_s26 = scalar_select %p6411_p1, 1, 0 }
  0x83   : > { %s6420_s27 = sshll.u32 (!%p4691_p2), %s6071_s10, 4  ;;  %s6423_s2 = sand.u32 (!%p4691_p2), 1, %s6079_s15  }
  0x84   : > { %7468 = sst [smem:[#allocation94_spill]] %s7467_s26  ;;  %s6427_s18 = scalar_lea.hbm (!%p4691_p2), %s7448_s24, %s6420_s27 }
  0x85   : > { %s1063_s13 = scalar_lea.vmem (!%p4691_p2), [#allocation5], %s6417_s5  ;;  %s5357_s12 = scalar_lea.hbm (!%p4691_p2), %s6427_s18, 16 }
  0x86   : > { %s1070_s11 = sshll.u32 (!%p4691_p2), %s1063_s13, 4  ;;  %p5358_p4 = scmp.ne.s32.totalorder (!%p4691_p2), %s6427_s18, %s5357_s12  ;;  %s1071_s11 = int_to_ptr.vmem [resolvable:$true] %s1070_s11 }
  0x87   : > { %s5361_s1 = scalar_lea.hbm %s7448_s24, 32  ;;  %p5362_p7 = scmp.lt.u32.totalorder %s6427_s18, %s7448_s24 }
  0x88   : > { %p5359_p5 = pnand %p5358_p4, %p6381_p3  ;;  %p5363_p9 = scmp.lt.u32.totalorder %s5361_s1, %s5357_s12 }
  0x89   : > { %p5365_p11 = scmp.lt.u32.totalorder %s5357_s12, %s6427_s18 }
  0x8a   : > { %p5360_p6 = pneg %p5359_p5  ;;  %p5364_p10 = por %p5363_p9, %p5362_p7 }
  0x8c   : > { %p5366_p13 = por %p5365_p11, %p5364_p10 }
  0x8e   : > { %p5367_p0 = pnand %p5366_p13, %p5360_p6 }
  0x90   : > { %5370 = shalt.err (!%p5367_p0)
}
  0x91   : > { %s5371_s23 = scalar_lea.vmem %s1071_s11, 16  ;;  %s6112_s13 = smov [#allocation5]  }
  0x92   : > { %p5372_p2 = scmp.ne.s32.totalorder %s1071_s11, %s5371_s23  ;;  %s5375_s29 = sshll.u32 %s6112_s13, 4  ;;  %s5376_s29 = int_to_ptr.vmem [resolvable:$false] %s5375_s29 }
  0x93   : > { %s5377_s26 = scalar_lea.vmem %s5376_s29, 32  ;;  %p5378_p4 = scmp.lt.s32.totalorder %s1071_s11, %s5376_s29 }
  0x94   : > { %p5373_p1 = pnand %p5372_p2, %p6381_p3  ;;  %p5379_p5 = scmp.lt.s32.totalorder %s5377_s26, %s5371_s23 }
  0x96   : > { %p5374_p12 = pneg %p5373_p1  ;;  %p5380_p8 = por %p5379_p5, %p5378_p4 }
  0x98   : > { %p5381_p7 = pnand %p5380_p8, %p5374_p12 }
  0x9a   : > { %5384 = shalt.err (!%p5381_p7)
}
  0x9b   : > { %s7469_s12 = scalar_lea.sflag [#allocation6], %s6423_s2  ;;  %s6448_s1 = scalar_lea.hbm %s7445_s6, %s6420_s27 }
  0x9c   : > { %5136 = dma.hbm_to_vmem [thread:$0]  (%p6381_p3), %s6427_s18, 16, %s1071_s11, %s7469_s12  }
  0x9d   : > { %s1097_s29 = scalar_lea.vmem [#allocation8], %s6417_s5  ;;  %s7364_s26 = scalar_lea.sflag [#allocation9], %s6423_s2 }
  0x9e   : > { %s1104_s23 = sshll.u32 %s1097_s29, 4  ;;  %s5385_s13 = scalar_lea.hbm %s6448_s1, 16  ;;  %s1105_s23 = int_to_ptr.vmem [resolvable:$true] %s1104_s23 }
  0x9f   : > { %p5386_p8 = scmp.ne.s32.totalorder %s6448_s1, %s5385_s13  ;;  %s5389_s24 = scalar_lea.hbm %s7445_s6, 32 }
  0xa0   : > { %p5390_p6 = scmp.lt.u32.totalorder %s6448_s1, %s7445_s6  ;;  %p5391_p9 = scmp.lt.u32.totalorder %s5389_s24, %s5385_s13 }
  0xa1   : > { %p5387_p12 = pnand %p5386_p8, %p6381_p3  ;;  %p5393_p11 = scmp.lt.u32.totalorder %s5385_s13, %s6448_s1 }
  0xa2   : > { %p5392_p10 = por %p5391_p9, %p5390_p6 }
  0xa3   : > { %p5388_p1 = pneg %p5387_p12 }
  0xa4   : > { %p5394_p13 = por %p5393_p11, %p5392_p10 }
  0xa6   : > { %p5395_p0 = pnand %p5394_p13, %p5388_p1 }
  0xa8   : > { %5398 = shalt.err (!%p5395_p0)
}
  0xa9   : > { %s5399_s11 = scalar_lea.vmem %s1105_s23, 16  ;;  %s6113_s18 = smov [#allocation8]  }
  0xaa   : > { %p5400_p2 = scmp.ne.s32.totalorder %s1105_s23, %s5399_s11  ;;  %s5403_s12 = sshll.u32 %s6113_s18, 4  ;;  %s5404_s12 = int_to_ptr.vmem [resolvable:$false] %s5403_s12 }
  0xab   : > { %s5405_s29 = scalar_lea.vmem %s5404_s12, 32  ;;  %p5406_p7 = scmp.lt.s32.totalorder %s1105_s23, %s5404_s12 }
  0xac   : > { %p5401_p4 = pnand %p5400_p2, %p6381_p3  ;;  %p5407_p8 = scmp.lt.s32.totalorder %s5405_s29, %s5399_s11 }
  0xae   : > { %p5402_p5 = pneg %p5401_p4  ;;  %p5408_p12 = por %p5407_p8, %p5406_p7 }
  0xb0   : > { %p5409_p6 = pnand %p5408_p12, %p5402_p5 }
  0xb2   : > { %5412 = shalt.err (!%p5409_p6)
}
  0xb3   : > { %5138 = dma.hbm_to_vmem [thread:$0]  (%p6381_p3), %s6448_s1, 16, %s1105_s23, %s7364_s26  }
  0xb4   : > { %s6469_s24 = scalar_lea.hbm %s7440_s20, %s6420_s27  ;;  %s1135_s13 = scalar_lea.vmem [#allocation11], %s6417_s5 }
  0xb5   : > { %s1142_s11 = sshll.u32 %s1135_s13, 4  ;;  %s7365_s18 = scalar_lea.sflag [#allocation12], %s6423_s2  ;;  %s1143_s11 = int_to_ptr.vmem [resolvable:$true] %s1142_s11 }
  0xb6   : > { %s5413_s12 = scalar_lea.hbm %s6469_s24, 16  ;;  %s5417_s29 = scalar_lea.hbm %s7440_s20, 32 }
  0xb7   : > { %p5414_p1 = scmp.ne.s32.totalorder %s6469_s24, %s5413_s12  ;;  %p5418_p11 = scmp.lt.u32.totalorder %s6469_s24, %s7440_s20 }
  0xb8   : > { %p5419_p13 = scmp.lt.u32.totalorder %s5417_s29, %s5413_s12  ;;  %p5421_p2 = scmp.lt.u32.totalorder %s5413_s12, %s6469_s24 }
  0xb9   : > { %p5415_p9 = pnand %p5414_p1, %p6381_p3 }
  0xba   : > { %p5420_p0 = por %p5419_p13, %p5418_p11 }
  0xbb   : > { %p5416_p10 = pneg %p5415_p9 }
  0xbc   : > { %p5422_p4 = por %p5421_p2, %p5420_p0 }
  0xbe   : > { %p5423_p5 = pnand %p5422_p4, %p5416_p10 }
  0xc0   : > { %5426 = shalt.err (!%p5423_p5)
}
  0xc1   : > { %s5427_s1 = scalar_lea.vmem %s1143_s11, 16  ;;  %s6114_s23 = smov [#allocation11]  }
  0xc2   : > { %p5428_p7 = scmp.ne.s32.totalorder %s1143_s11, %s5427_s1  ;;  %s5431_s13 = sshll.u32 %s6114_s23, 4  ;;  %s5432_s13 = int_to_ptr.vmem [resolvable:$false] %s5431_s13 }
  0xc3   : > { %s5433_s26 = scalar_lea.vmem %s5432_s13, 32  ;;  %p5434_p6 = scmp.lt.s32.totalorder %s1143_s11, %s5432_s13 }
  0xc4   : > { %p5429_p8 = pnand %p5428_p7, %p6381_p3  ;;  %p5435_p1 = scmp.lt.s32.totalorder %s5433_s26, %s5427_s1 }
  0xc6   : > { %p5430_p12 = pneg %p5429_p8  ;;  %p5436_p9 = por %p5435_p1, %p5434_p6 }
  0xc8   : > { %p5437_p11 = pnand %p5436_p9, %p5430_p12 }
  0xca   : > { %5440 = shalt.err (!%p5437_p11)
}
  0xcb   : > { %5140 = dma.hbm_to_vmem [thread:$0]  (%p6381_p3), %s6469_s24, 16, %s1143_s11, %s7365_s18  }
  0xcc   : > { %s6490_s12 = scalar_lea.hbm %s7446_s4, %s6420_s27  ;;  %s1173_s26 = scalar_lea.vmem [#allocation14], %s6417_s5 }
  0xcd   : > { %s1180_s29 = sshll.u32 %s1173_s26, 4  ;;  %s7366_s1 = scalar_lea.sflag [#allocation15], %s6423_s2  ;;  %s1181_s29 = int_to_ptr.vmem [resolvable:$true] %s1180_s29 }
  0xce   : > { %s5441_s23 = scalar_lea.hbm %s6490_s12, 16  ;;  %s5445_s13 = scalar_lea.hbm %s7446_s4, 32 }
  0xcf   : > { %p5442_p10 = scmp.ne.s32.totalorder %s6490_s12, %s5441_s23  ;;  %p5446_p2 = scmp.lt.u32.totalorder %s6490_s12, %s7446_s4 }
  0xd0   : > { %p5447_p4 = scmp.lt.u32.totalorder %s5445_s13, %s5441_s23  ;;  %p5449_p7 = scmp.lt.u32.totalorder %s5441_s23, %s6490_s12 }
  0xd1   : > { %p5443_p13 = pnand %p5442_p10, %p6381_p3 }
  0xd2   : > { %p5448_p5 = por %p5447_p4, %p5446_p2 }
  0xd3   : > { %p5444_p0 = pneg %p5443_p13 }
  0xd4   : > { %p5450_p8 = por %p5449_p7, %p5448_p5 }
  0xd6   : > { %p5451_p12 = pnand %p5450_p8, %p5444_p0 }
  0xd8   : > { %5454 = shalt.err (!%p5451_p12)
}
  0xd9   : > { %s5455_s24 = scalar_lea.vmem %s1181_s29, 16  ;;  %s6115_s11 = smov [#allocation14]  }
  0xda   : > { %p5456_p6 = scmp.ne.s32.totalorder %s1181_s29, %s5455_s24  ;;  %s5459_s26 = sshll.u32 %s6115_s11, 4  ;;  %s5460_s26 = int_to_ptr.vmem [resolvable:$false] %s5459_s26 }
  0xdb   : > { %s5461_s18 = scalar_lea.vmem %s5460_s26, 32  ;;  %p5462_p11 = scmp.lt.s32.totalorder %s1181_s29, %s5460_s26 }
  0xdc   : > { %p5457_p1 = pnand %p5456_p6, %p6381_p3  ;;  %p5463_p10 = scmp.lt.s32.totalorder %s5461_s18, %s5455_s24 }
  0xde   : > { %p5458_p9 = pneg %p5457_p1  ;;  %p5464_p13 = por %p5463_p10, %p5462_p11 }
  0xe0   : > { %p5465_p2 = pnand %p5464_p13, %p5458_p9 }
  0xe2   : > { %5468 = shalt.err (!%p5465_p2)
}
  0xe3   : > { %5142 = dma.hbm_to_vmem [thread:$0]  (%p6381_p3), %s6490_s12, 16, %s1181_s29, %s7366_s1  }
  0xe4   : > { %s6511_s23 = scalar_lea.hbm %s7444_s8, %s6420_s27  ;;  %s1211_s18 = scalar_lea.vmem [#allocation17], %s6417_s5 }
  0xe5   : > { %s1218_s13 = sshll.u32 %s1211_s18, 4  ;;  %s7367_s24 = scalar_lea.sflag [#allocation18], %s6423_s2  ;;  %s1219_s13 = int_to_ptr.vmem [resolvable:$true] %s1218_s13 }
  0xe6   : > { %s5469_s11 = scalar_lea.hbm %s6511_s23, 16  ;;  %s5473_s26 = scalar_lea.hbm %s7444_s8, 32 }
  0xe7   : > { %p5470_p0 = scmp.ne.s32.totalorder %s6511_s23, %s5469_s11  ;;  %p5474_p7 = scmp.lt.u32.totalorder %s6511_s23, %s7444_s8 }
  0xe8   : > { %p5475_p8 = scmp.lt.u32.totalorder %s5473_s26, %s5469_s11  ;;  %p5477_p6 = scmp.lt.u32.totalorder %s5469_s11, %s6511_s23 }
  0xe9   : > { %p5471_p4 = pnand %p5470_p0, %p6381_p3 }
  0xea   : > { %p5476_p12 = por %p5475_p8, %p5474_p7 }
  0xeb   : > { %p5472_p5 = pneg %p5471_p4 }
  0xec   : > { %p5478_p1 = por %p5477_p6, %p5476_p12 }
  0xee   : > { %p5479_p9 = pnand %p5478_p1, %p5472_p5 }
  0xf0   : > { %5482 = shalt.err (!%p5479_p9)
}
  0xf1   : > { %s5483_s12 = scalar_lea.vmem %s1219_s13, 16  ;;  %s6116_s29 = smov [#allocation17]  }
  0xf2   : > { %p5484_p11 = scmp.ne.s32.totalorder %s1219_s13, %s5483_s12  ;;  %s5487_s18 = sshll.u32 %s6116_s29, 4  ;;  %s5488_s18 = int_to_ptr.vmem [resolvable:$false] %s5487_s18 }
  0xf3   : > { %s5489_s1 = scalar_lea.vmem %s5488_s18, 32  ;;  %p5490_p2 = scmp.lt.s32.totalorder %s1219_s13, %s5488_s18 }
  0xf4   : > { %p5485_p10 = pnand %p5484_p11, %p6381_p3  ;;  %p5491_p0 = scmp.lt.s32.totalorder %s5489_s1, %s5483_s12 }
  0xf6   : > { %p5486_p13 = pneg %p5485_p10  ;;  %p5492_p4 = por %p5491_p0, %p5490_p2 }
  0xf8   : > { %p5493_p7 = pnand %p5492_p4, %p5486_p13 }
  0xfa   : > { %5496 = shalt.err (!%p5493_p7)
}
  0xfb   : > { %5144 = dma.hbm_to_vmem [thread:$0]  (%p6381_p3), %s6511_s23, 16, %s1219_s13, %s7367_s24  }
  0xfc   : > { %s6532_s11 = scalar_lea.hbm %s7447_s3, %s6420_s27  ;;  %s1249_s1 = scalar_lea.vmem [#allocation20], %s6417_s5 }
  0xfd   : > { %s1256_s26 = sshll.u32 %s1249_s1, 4  ;;  %s7368_s12 = scalar_lea.sflag [#allocation21], %s6423_s2  ;;  %s1257_s26 = int_to_ptr.vmem [resolvable:$true] %s1256_s26 }
  0xfe   : > { %s5497_s29 = scalar_lea.hbm %s6532_s11, 16  ;;  %s5501_s18 = scalar_lea.hbm %s7447_s3, 32 }
  0xff   : > { %p5498_p5 = scmp.ne.s32.totalorder %s6532_s11, %s5497_s29  ;;  %p5502_p6 = scmp.lt.u32.totalorder %s6532_s11, %s7447_s3 }
 0x100   : > { %p5503_p1 = scmp.lt.u32.totalorder %s5501_s18, %s5497_s29  ;;  %p5505_p11 = scmp.lt.u32.totalorder %s5497_s29, %s6532_s11 }
 0x101   : > { %p5499_p8 = pnand %p5498_p5, %p6381_p3 }
 0x102   : > { %p5504_p9 = por %p5503_p1, %p5502_p6 }
 0x103   : > { %p5500_p12 = pneg %p5499_p8 }
 0x104   : > { %p5506_p10 = por %p5505_p11, %p5504_p9 }
 0x106   : > { %p5507_p13 = pnand %p5506_p10, %p5500_p12 }
 0x108   : > { %5510 = shalt.err (!%p5507_p13)
}
 0x109   : > { %s5511_s23 = scalar_lea.vmem %s1257_s26, 16  ;;  %s6117_s13 = smov [#allocation20]  }
 0x10a   : > { %p5512_p2 = scmp.ne.s32.totalorder %s1257_s26, %s5511_s23  ;;  %s5515_s1 = sshll.u32 %s6117_s13, 4  ;;  %s5516_s1 = int_to_ptr.vmem [resolvable:$false] %s5515_s1 }
 0x10b   : > { %s5517_s24 = scalar_lea.vmem %s5516_s1, 32  ;;  %p5518_p7 = scmp.lt.s32.totalorder %s1257_s26, %s5516_s1 }
 0x10c   : > { %p5513_p0 = pnand %p5512_p2, %p6381_p3  ;;  %p5519_p5 = scmp.lt.s32.totalorder %s5517_s24, %s5511_s23 }
 0x10e   : > { %p5514_p4 = pneg %p5513_p0  ;;  %p5520_p8 = por %p5519_p5, %p5518_p7 }
 0x110   : > { %p5521_p1 = pnand %p5520_p8, %p5514_p4 }
 0x112   : > { %5524 = shalt.err (!%p5521_p1)
}
 0x113   : > { %5146 = dma.hbm_to_vmem [thread:$0]  (%p6381_p3), %s6532_s11, 16, %s1257_s26, %s7368_s12  }
 0x114   : > { %s6553_s29 = scalar_lea.hbm %s7439_s21, %s6420_s27  ;;  %s1283_s24 = scalar_lea.vmem [#allocation23], %s6417_s5 }
 0x115   : > { %s1290_s18 = sshll.u32 %s1283_s24, 4  ;;  %s7369_s23 = scalar_lea.sflag [#allocation24], %s6423_s2  ;;  %s1291_s18 = int_to_ptr.vmem [resolvable:$true] %s1290_s18 }
 0x116   : > { %s5525_s13 = scalar_lea.hbm %s6553_s29, 16  ;;  %s5529_s1 = scalar_lea.hbm %s7439_s21, 32 }
 0x117   : > { %p5526_p12 = scmp.ne.s32.totalorder %s6553_s29, %s5525_s13  ;;  %p5530_p11 = scmp.lt.u32.totalorder %s6553_s29, %s7439_s21 }
 0x118   : > { %p5531_p10 = scmp.lt.u32.totalorder %s5529_s1, %s5525_s13  ;;  %p5533_p2 = scmp.lt.u32.totalorder %s5525_s13, %s6553_s29 }
 0x119   : > { %p5527_p6 = pnand %p5526_p12, %p6381_p3 }
 0x11a   : > { %p5532_p13 = por %p5531_p10, %p5530_p11 }
 0x11b   : > { %p5528_p9 = pneg %p5527_p6 }
 0x11c   : > { %p5534_p0 = por %p5533_p2, %p5532_p13 }
 0x11e   : > { %p5535_p4 = pnand %p5534_p0, %p5528_p9 }
 0x120   : > { %5538 = shalt.err (!%p5535_p4)
}
 0x121   : > { %s5539_s11 = scalar_lea.vmem %s1291_s18, 16  ;;  %s6118_s26 = smov [#allocation23]  }
 0x122   : > { %p5540_p7 = scmp.ne.s32.totalorder %s1291_s18, %s5539_s11  ;;  %s5543_s24 = sshll.u32 %s6118_s26, 4  ;;  %s5544_s24 = int_to_ptr.vmem [resolvable:$false] %s5543_s24 }
 0x123   : > { %s5545_s12 = scalar_lea.vmem %s5544_s24, 32  ;;  %p5546_p1 = scmp.lt.s32.totalorder %s1291_s18, %s5544_s24 }
 0x124   : > { %p5541_p5 = pnand %p5540_p7, %p6381_p3  ;;  %p5547_p12 = scmp.lt.s32.totalorder %s5545_s12, %s5539_s11 }
 0x126   : > { %p5542_p8 = pneg %p5541_p5  ;;  %p5548_p6 = por %p5547_p12, %p5546_p1 }
 0x128   : > { %p5549_p10 = pnand %p5548_p6, %p5542_p8 }
 0x12a   : > { %5552 = shalt.err (!%p5549_p10)
}
 0x12b   : > { %5148 = dma.hbm_to_vmem [thread:$0]  (%p6381_p3), %s6553_s29, 16, %s1291_s18, %s7369_s23  }
 0x12c   : > { %s6574_s13 = scalar_lea.hbm %s7443_s9, %s6420_s27  ;;  %s1321_s12 = scalar_lea.vmem [#allocation26], %s6417_s5 }
 0x12d   : > { %s1328_s1 = sshll.u32 %s1321_s12, 4  ;;  %s7370_s11 = scalar_lea.sflag [#allocation27], %s6423_s2  ;;  %s1329_s1 = int_to_ptr.vmem [resolvable:$true] %s1328_s1 }
 0x12e   : > { %s5553_s26 = scalar_lea.hbm %s6574_s13, 16  ;;  %s5557_s24 = scalar_lea.hbm %s7443_s9, 32 }
 0x12f   : > { %p5554_p9 = scmp.ne.s32.totalorder %s6574_s13, %s5553_s26  ;;  %p5558_p2 = scmp.lt.u32.totalorder %s6574_s13, %s7443_s9 }
 0x130   : > { %p5559_p0 = scmp.lt.u32.totalorder %s5557_s24, %s5553_s26  ;;  %p5561_p7 = scmp.lt.u32.totalorder %s5553_s26, %s6574_s13 }
 0x131   : > { %p5555_p11 = pnand %p5554_p9, %p6381_p3 }
 0x132   : > { %p5560_p4 = por %p5559_p0, %p5558_p2 }
 0x133   : > { %p5556_p13 = pneg %p5555_p11 }
 0x134   : > { %p5562_p5 = por %p5561_p7, %p5560_p4 }
 0x136   : > { %p5563_p8 = pnand %p5562_p5, %p5556_p13 }
 0x138   : > { %5566 = shalt.err (!%p5563_p8)
}
 0x139   : > { %s5567_s29 = scalar_lea.vmem %s1329_s1, 16  ;;  %s6119_s18 = smov [#allocation26]  }
 0x13a   : > { %p5568_p1 = scmp.ne.s32.totalorder %s1329_s1, %s5567_s29  ;;  %s5571_s12 = sshll.u32 %s6119_s18, 4  ;;  %s5572_s12 = int_to_ptr.vmem [resolvable:$false] %s5571_s12 }
 0x13b   : > { %s5573_s23 = scalar_lea.vmem %s5572_s12, 32  ;;  %p5574_p10 = scmp.lt.s32.totalorder %s1329_s1, %s5572_s12 }
 0x13c   : > { %p5569_p12 = pnand %p5568_p1, %p6381_p3  ;;  %p5575_p9 = scmp.lt.s32.totalorder %s5573_s23, %s5567_s29 }
 0x13e   : > { %p5570_p6 = pneg %p5569_p12  ;;  %p5576_p11 = por %p5575_p9, %p5574_p10 }
 0x140   : > { %p5577_p0 = pnand %p5576_p11, %p5570_p6 }
 0x142   : > { %5580 = shalt.err (!%p5577_p0)
}
 0x143   : > { %5150 = dma.hbm_to_vmem [thread:$0]  (%p6381_p3), %s6574_s13, 16, %s1329_s1, %s7370_s11  }
 0x144   : > { %s6595_s26 = scalar_lea.hbm %s7441_s17, %s6420_s27  ;;  %s1363_s23 = scalar_lea.vmem [#allocation29], %s6417_s5 }
 0x145   : > { %s1370_s24 = sshll.u32 %s1363_s23, 4  ;;  %s7371_s29 = scalar_lea.sflag [#allocation30], %s6423_s2  ;;  %s1371_s24 = int_to_ptr.vmem [resolvable:$true] %s1370_s24 }
 0x146   : > { %s5581_s18 = scalar_lea.hbm %s6595_s26, 16  ;;  %s5585_s12 = scalar_lea.hbm %s7441_s17, 32 }
 0x147   : > { %p5582_p13 = scmp.ne.s32.totalorder %s6595_s26, %s5581_s18  ;;  %p5586_p7 = scmp.lt.u32.totalorder %s6595_s26, %s7441_s17 }
 0x148   : > { %p5587_p5 = scmp.lt.u32.totalorder %s5585_s12, %s5581_s18  ;;  %p5589_p1 = scmp.lt.u32.totalorder %s5581_s18, %s6595_s26 }
 0x149   : > { %p5583_p2 = pnand %p5582_p13, %p6381_p3 }
 0x14a   : > { %p5588_p8 = por %p5587_p5, %p5586_p7 }
 0x14b   : > { %p5584_p4 = pneg %p5583_p2 }
 0x14c   : > { %p5590_p12 = por %p5589_p1, %p5588_p8 }
 0x14e   : > { %p5591_p6 = pnand %p5590_p12, %p5584_p4 }
 0x150   : > { %5594 = shalt.err (!%p5591_p6)
}
 0x151   : > { %s5595_s13 = scalar_lea.vmem %s1371_s24, 16  ;;  %s6120_s1 = smov [#allocation29]  }
 0x152   : > { %p5596_p10 = scmp.ne.s32.totalorder %s1371_s24, %s5595_s13  ;;  %s5599_s23 = sshll.u32 %s6120_s1, 4  ;;  %s5600_s23 = int_to_ptr.vmem [resolvable:$false] %s5599_s23 }
 0x153   : > { %s5601_s11 = scalar_lea.vmem %s5600_s23, 32  ;;  %p5602_p0 = scmp.lt.s32.totalorder %s1371_s24, %s5600_s23 }
 0x154   : > { %p5597_p9 = pnand %p5596_p10, %p6381_p3  ;;  %p5603_p13 = scmp.lt.s32.totalorder %s5601_s11, %s5595_s13 }
 0x156   : > { %p5598_p11 = pneg %p5597_p9  ;;  %p5604_p2 = por %p5603_p13, %p5602_p0 }
 0x158   : > { %p5605_p5 = pnand %p5604_p2, %p5598_p11 }
 0x15a   : > { %5608 = shalt.err (!%p5605_p5)
}
 0x15b   : > { %5152 = dma.hbm_to_vmem [thread:$0]  (%p6381_p3), %s6595_s26, 16, %s1371_s24, %s7371_s29  }
 0x15c   : > { %s6616_s18 = scalar_lea.hbm %s7442_s14, %s6420_s27  ;;  %s1038_s11 = scalar_lea.vmem [#allocation2], %s6417_s5 }
 0x15d   : > { %s1045_s12 = sshll.u32 %s1038_s11, 4  ;;  %s1036_s13 = scalar_lea.sflag [#allocation3], %s6417_s5  ;;  %s1046_s12 = int_to_ptr.vmem [resolvable:$true] %s1045_s12 }
 0x15e   : > { %s5609_s1 = scalar_lea.hbm %s6616_s18, 16  ;;  %s5613_s23 = scalar_lea.hbm %s7442_s14, 32 }
 0x15f   : > { %p5610_p4 = scmp.ne.s32.totalorder %s6616_s18, %s5609_s1  ;;  %p5614_p1 = scmp.lt.u32.totalorder %s6616_s18, %s7442_s14 }
 0x160   : > { %p5615_p12 = scmp.lt.u32.totalorder %s5613_s23, %s5609_s1  ;;  %p5617_p10 = scmp.lt.u32.totalorder %s5609_s1, %s6616_s18 }
 0x161   : > { %p5611_p7 = pnand %p5610_p4, %p6381_p3 }
 0x162   : > { %p5616_p6 = por %p5615_p12, %p5614_p1 }
 0x163   : > { %p5612_p8 = pneg %p5611_p7 }
 0x164   : > { %p5618_p9 = por %p5617_p10, %p5616_p6 }
 0x166   : > { %p5619_p11 = pnand %p5618_p9, %p5612_p8 }
 0x168   : > { %5622 = shalt.err (!%p5619_p11)
}
 0x169   : > { %s5623_s26 = scalar_lea.vmem %s1046_s12, 16  ;;  %s6121_s24 = smov [#allocation2]  }
 0x16a   : > { %p5624_p0 = scmp.ne.s32.totalorder %s1046_s12, %s5623_s26  ;;  %s5627_s11 = sshll.u32 %s6121_s24, 4  ;;  %s5628_s11 = int_to_ptr.vmem [resolvable:$false] %s5627_s11 }
 0x16b   : > { %s5629_s29 = scalar_lea.vmem %s5628_s11, 32  ;;  %p5630_p5 = scmp.lt.s32.totalorder %s1046_s12, %s5628_s11 }
 0x16c   : > { %p5625_p13 = pnand %p5624_p0, %p6381_p3  ;;  %p5631_p4 = scmp.lt.s32.totalorder %s5629_s29, %s5623_s26 }
 0x16e   : > { %p5626_p2 = pneg %p5625_p13  ;;  %p5632_p7 = por %p5631_p4, %p5630_p5 }
 0x170   : > { %p5633_p1 = pnand %p5632_p7, %p5626_p2 }
 0x172   : > { %5636 = shalt.err (!%p5633_p1)
}
 0x173   : > { %5135 = dma.hbm_to_vmem [thread:$0]  (%p6381_p3), %s6616_s18, 16, %s1046_s12, %s1036_s13  }
 0x174   : > { %s6635_s1 = scalar_lea.hbm %s7438_s30, %s6420_s27  ;;  %s1080_s29 = scalar_lea.vmem [#allocation7], %s6417_s5 }
 0x175   : > { %s1087_s23 = sshll.u32 %s1080_s29, 4  ;;  %s6639_s26 = sshll.u32 %s6417_s5, 5  ;;  %s1088_s23 = int_to_ptr.vmem [resolvable:$true] %s1087_s23 }
 0x176   : > { %s5637_s24 = scalar_lea.hbm %s6635_s1, 16  ;;  %s5641_s11 = scalar_lea.hbm %s7438_s30, 32 }
 0x177   : > { %p5638_p8 = scmp.ne.s32.totalorder %s6635_s1, %s5637_s24  ;;  %p5642_p10 = scmp.lt.u32.totalorder %s6635_s1, %s7438_s30 }
 0x178   : > { %p5643_p9 = scmp.lt.u32.totalorder %s5641_s11, %s5637_s24  ;;  %p5645_p0 = scmp.lt.u32.totalorder %s5637_s24, %s6635_s1 }
 0x179   : > { %p5639_p12 = pnand %p5638_p8, %p6381_p3 }
 0x17a   : > { %p5644_p11 = por %p5643_p9, %p5642_p10 }
 0x17b   : > { %p5640_p6 = pneg %p5639_p12 }
 0x17c   : > { %p5646_p13 = por %p5645_p0, %p5644_p11 }
 0x17e   : > { %p5647_p2 = pnand %p5646_p13, %p5640_p6 }
 0x180   : > { %5650 = shalt.err (!%p5647_p2)
}
 0x181   : > { %s5651_s18 = scalar_lea.vmem %s1088_s23, 16  ;;  %s6122_s12 = smov [#allocation7]  }
 0x182   : > { %p5652_p5 = scmp.ne.s32.totalorder %s1088_s23, %s5651_s18  ;;  %s5655_s13 = sshll.u32 %s6122_s12, 4  ;;  %s5656_s13 = int_to_ptr.vmem [resolvable:$false] %s5655_s13 }
 0x183   : > { %s5657_s29 = scalar_lea.vmem %s5656_s13, 32  ;;  %p5658_p1 = scmp.lt.s32.totalorder %s1088_s23, %s5656_s13 }
 0x184   : > { %p5653_p4 = pnand %p5652_p5, %p6381_p3  ;;  %p5659_p8 = scmp.lt.s32.totalorder %s5657_s29, %s5651_s18 }
 0x186   : > { %p5654_p7 = pneg %p5653_p4  ;;  %p5660_p12 = por %p5659_p8, %p5658_p1 }
 0x188   : > { %p5661_p9 = pnand %p5660_p12, %p5654_p7 }
 0x18a   : > { %5664 = shalt.err (!%p5661_p9)
}
 0x18b   : > { %s7470_s24 = scalar_lea.sflag [#allocation6], %s6423_s2  ;;  %s7471_s11 = sld [smem:[#allocation61_spill]] }
 0x18c   : > { %5137 = dma.hbm_to_vmem [thread:$0]  (%p6381_p3), %s6635_s1, 16, %s1088_s23, %s7470_s24  }
 0x18d   : > { %s6657_s12 = sshll.u32 %s6071_s10, 9  ;;  %s1115_s18 = scalar_lea.vmem [#allocation10], %s6639_s26 }
 0x18e   : > { %s1122_s29 = sshll.u32 %s1115_s18, 4  ;;  %s6664_s29 = int_to_ptr.vmem [resolvable:$true] %s1122_s29 }
 0x191   : > { %s7472_s3 = smov %s7471_s11  ;;  %s6661_s13 = scalar_lea.hbm %s7471_s11, %s6657_s12 }
 0x192   : > { %s5665_s4 = scalar_lea.hbm %s6661_s13, 512  ;;  %s5669_s6 = scalar_lea.hbm %s7472_s3, 1024 }
 0x193   : > { %p5666_p6 = scmp.ne.s32.totalorder %s6661_s13, %s5665_s4  ;;  %p5670_p0 = scmp.lt.u32.totalorder %s6661_s13, %s7472_s3 }
 0x194   : > { %p5671_p13 = scmp.lt.u32.totalorder %s5669_s6, %s5665_s4  ;;  %p5673_p5 = scmp.lt.u32.totalorder %s5665_s4, %s6661_s13 }
 0x195   : > { %p5667_p10 = pnand %p5666_p6, %p6381_p3 }
 0x196   : > { %p5672_p2 = por %p5671_p13, %p5670_p0 }
 0x197   : > { %p5668_p11 = pneg %p5667_p10 }
 0x198   : > { %p5674_p4 = por %p5673_p5, %p5672_p2 }
 0x19a   : > { %p5675_p7 = pnand %p5674_p4, %p5668_p11 }
 0x19c   : > { %5678 = shalt.err (!%p5675_p7)
}
 0x19d   : > { %s5679_s1 = scalar_lea.vmem %s6664_s29, 512  ;;  %s6123_s23 = smov [#allocation10]  }
 0x19e   : > { %p5680_p1 = scmp.ne.s32.totalorder %s6664_s29, %s5679_s1  ;;  %s5683_s24 = sshll.u32 %s6123_s23, 4  ;;  %s5684_s24 = int_to_ptr.vmem [resolvable:$false] %s5683_s24 }
 0x19f   : > { %s5685_s11 = scalar_lea.vmem %s5684_s24, 1024  ;;  %p5686_p9 = scmp.lt.s32.totalorder %s6664_s29, %s5684_s24 }
 0x1a0   : > { %p5681_p8 = pnand %p5680_p1, %p6381_p3  ;;  %p5687_p6 = scmp.lt.s32.totalorder %s5685_s11, %s5679_s1 }
 0x1a2   : > { %p5682_p12 = pneg %p5681_p8  ;;  %p5688_p10 = por %p5687_p6, %p5686_p9 }
 0x1a4   : > { %p5689_p0 = pnand %p5688_p10, %p5682_p12 }
 0x1a6   : > { %5692 = shalt.err (!%p5689_p0)
}
 0x1a7   : > { %s7380_s6 = smov 128   ;;  %s7473_s4 = sld [smem:[#allocation63_spill]] }
 0x1a8   : > { %s7381_s18 = smov 8   ;;  %s7474_s1 = scalar_lea.sflag [#allocation9], %s6423_s2 }
 0x1a9   : > { %5139 = dma.hbm_to_vmem [thread:$0]  (%p6381_p3), %s6661_s13, 512, %s6664_s29, %s7474_s1, %s7380_s6, %s7380_s6, %s7381_s18  }
 0x1aa   : > { %s1153_s24 = scalar_lea.vmem [#allocation13], %s6639_s26 }
 0x1ab   : > { %s1160_s11 = sshll.u32 %s1153_s24, 4  ;;  %s6693_s11 = int_to_ptr.vmem [resolvable:$true] %s1160_s11 }
 0x1ad   : > { %s6690_s23 = scalar_lea.hbm %s7473_s4, %s6657_s12  ;;  %s5697_s8 = scalar_lea.hbm %s7473_s4, 1024 }
 0x1ae   : > { %s5693_s3 = scalar_lea.hbm %s6690_s23, 512  ;;  %p5698_p5 = scmp.lt.u32.totalorder %s6690_s23, %s7473_s4 }
 0x1af   : > { %p5694_p11 = scmp.ne.s32.totalorder %s6690_s23, %s5693_s3  ;;  %p5699_p4 = scmp.lt.u32.totalorder %s5697_s8, %s5693_s3 }
 0x1b0   : > { %p5701_p1 = scmp.lt.u32.totalorder %s5693_s3, %s6690_s23 }
 0x1b1   : > { %p5695_p13 = pnand %p5694_p11, %p6381_p3  ;;  %p5700_p7 = por %p5699_p4, %p5698_p5 }
 0x1b3   : > { %p5696_p2 = pneg %p5695_p13  ;;  %p5702_p8 = por %p5701_p1, %p5700_p7 }
 0x1b5   : > { %p5703_p12 = pnand %p5702_p8, %p5696_p2 }
 0x1b7   : > { %5706 = shalt.err (!%p5703_p12)
}
 0x1b8   : > { %s5707_s13 = scalar_lea.vmem %s6693_s11, 512  ;;  %s6126_s29 = smov [#allocation13]  }
 0x1b9   : > { %p5708_p9 = scmp.ne.s32.totalorder %s6693_s11, %s5707_s13  ;;  %s5711_s1 = sshll.u32 %s6126_s29, 4  ;;  %s5712_s1 = int_to_ptr.vmem [resolvable:$false] %s5711_s1 }
 0x1ba   : > { %s5713_s24 = scalar_lea.vmem %s5712_s1, 1024  ;;  %p5714_p0 = scmp.lt.s32.totalorder %s6693_s11, %s5712_s1 }
 0x1bb   : > { %p5709_p6 = pnand %p5708_p9, %p6381_p3  ;;  %p5715_p11 = scmp.lt.s32.totalorder %s5713_s24, %s5707_s13 }
 0x1bd   : > { %p5710_p10 = pneg %p5709_p6  ;;  %p5716_p13 = por %p5715_p11, %p5714_p0 }
 0x1bf   : > { %p5717_p5 = pnand %p5716_p13, %p5710_p10 }
 0x1c1   : > { %5720 = shalt.err (!%p5717_p5)
}
 0x1c2   : > { %s7475_s3 = scalar_lea.sflag [#allocation12], %s6423_s2  ;;  %s7476_s8 = sld [smem:[#allocation65_spill]] }
 0x1c3   : > { %5141 = dma.hbm_to_vmem [thread:$0]  (%p6381_p3), %s6690_s23, 512, %s6693_s11, %s7475_s3, %s7380_s6, %s7380_s6, %s7381_s18  }
 0x1c4   : > { %s1191_s29 = scalar_lea.vmem [#allocation16], %s6639_s26 }
 0x1c5   : > { %s1198_s1 = sshll.u32 %s1191_s29, 4  ;;  %s6722_s1 = int_to_ptr.vmem [resolvable:$true] %s1198_s1 }
 0x1c8   : > { %s6719_s13 = scalar_lea.hbm %s7476_s8, %s6657_s12  ;;  %s5725_s4 = scalar_lea.hbm %s7476_s8, 1024 }
 0x1c9   : > { %s5721_s24 = scalar_lea.hbm %s6719_s13, 512  ;;  %p5726_p1 = scmp.lt.u32.totalorder %s6719_s13, %s7476_s8 }
 0x1ca   : > { %p5722_p2 = scmp.ne.s32.totalorder %s6719_s13, %s5721_s24  ;;  %p5727_p8 = scmp.lt.u32.totalorder %s5725_s4, %s5721_s24 }
 0x1cb   : > { %p5729_p9 = scmp.lt.u32.totalorder %s5721_s24, %s6719_s13 }
 0x1cc   : > { %p5723_p4 = pnand %p5722_p2, %p6381_p3  ;;  %p5728_p12 = por %p5727_p8, %p5726_p1 }
 0x1ce   : > { %p5724_p7 = pneg %p5723_p4  ;;  %p5730_p6 = por %p5729_p9, %p5728_p12 }
 0x1d0   : > { %p5731_p10 = pnand %p5730_p6, %p5724_p7 }
 0x1d2   : > { %5734 = shalt.err (!%p5731_p10)
}
 0x1d3   : > { %s5735_s23 = scalar_lea.vmem %s6722_s1, 512  ;;  %s6127_s11 = smov [#allocation16]  }
 0x1d4   : > { %p5736_p0 = scmp.ne.s32.totalorder %s6722_s1, %s5735_s23  ;;  %s5739_s3 = sshll.u32 %s6127_s11, 4  ;;  %s5740_s3 = int_to_ptr.vmem [resolvable:$false] %s5739_s3 }
 0x1d5   : > { %s5741_s29 = scalar_lea.vmem %s5740_s3, 1024  ;;  %p5742_p5 = scmp.lt.s32.totalorder %s6722_s1, %s5740_s3 }
 0x1d6   : > { %p5737_p11 = pnand %p5736_p0, %p6381_p3  ;;  %p5743_p2 = scmp.lt.s32.totalorder %s5741_s29, %s5735_s23 }
 0x1d8   : > { %p5738_p13 = pneg %p5737_p11  ;;  %p5744_p4 = por %p5743_p2, %p5742_p5 }
 0x1da   : > { %p5745_p1 = pnand %p5744_p4, %p5738_p13 }
 0x1dc   : > { %5748 = shalt.err (!%p5745_p1)
}
 0x1dd   : > { %s7477_s4 = scalar_lea.sflag [#allocation15], %s6423_s2  ;;  %s7478_s24 = sld [smem:[#allocation67_spill]] }
 0x1de   : > { %5143 = dma.hbm_to_vmem [thread:$0]  (%p6381_p3), %s6719_s13, 512, %s6722_s1, %s7477_s4, %s7380_s6, %s7380_s6, %s7381_s18  }
 0x1df   : > { %s1229_s11 = scalar_lea.vmem [#allocation19], %s6639_s26 }
 0x1e0   : > { %s1236_s3 = sshll.u32 %s1229_s11, 4  ;;  %s6751_s3 = int_to_ptr.vmem [resolvable:$true] %s1236_s3 }
 0x1e3   : > { %s6748_s23 = scalar_lea.hbm %s7478_s24, %s6657_s12  ;;  %s5753_s8 = scalar_lea.hbm %s7478_s24, 1024 }
 0x1e4   : > { %s5749_s29 = scalar_lea.hbm %s6748_s23, 512  ;;  %p5754_p9 = scmp.lt.u32.totalorder %s6748_s23, %s7478_s24 }
 0x1e5   : > { %p5750_p7 = scmp.ne.s32.totalorder %s6748_s23, %s5749_s29  ;;  %p5755_p6 = scmp.lt.u32.totalorder %s5753_s8, %s5749_s29 }
 0x1e6   : > { %p5757_p0 = scmp.lt.u32.totalorder %s5749_s29, %s6748_s23 }
 0x1e7   : > { %p5751_p8 = pnand %p5750_p7, %p6381_p3  ;;  %p5756_p10 = por %p5755_p6, %p5754_p9 }
 0x1e9   : > { %p5752_p12 = pneg %p5751_p8  ;;  %p5758_p11 = por %p5757_p0, %p5756_p10 }
 0x1eb   : > { %p5759_p13 = pnand %p5758_p11, %p5752_p12 }
 0x1ed   : > { %5762 = shalt.err (!%p5759_p13)
}
 0x1ee   : > { %s5763_s13 = scalar_lea.vmem %s6751_s3, 512  ;;  %s6128_s1 = smov [#allocation19]  }
 0x1ef   : > { %p5764_p5 = scmp.ne.s32.totalorder %s6751_s3, %s5763_s13  ;;  %s5767_s4 = sshll.u32 %s6128_s1, 4  ;;  %s5768_s4 = int_to_ptr.vmem [resolvable:$false] %s5767_s4 }
 0x1f0   : > { %s5769_s11 = scalar_lea.vmem %s5768_s4, 1024  ;;  %p5770_p1 = scmp.lt.s32.totalorder %s6751_s3, %s5768_s4 }
 0x1f1   : > { %p5765_p2 = pnand %p5764_p5, %p6381_p3  ;;  %p5771_p7 = scmp.lt.s32.totalorder %s5769_s11, %s5763_s13 }
 0x1f3   : > { %p5766_p4 = pneg %p5765_p2  ;;  %p5772_p8 = por %p5771_p7, %p5770_p1 }
 0x1f5   : > { %p5773_p9 = pnand %p5772_p8, %p5766_p4 }
 0x1f7   : > { %5776 = shalt.err (!%p5773_p9)
}
 0x1f8   : > { %s7479_s8 = scalar_lea.sflag [#allocation18], %s6423_s2  ;;  %s7480_s29 = sld [smem:[#allocation69_spill]] }
 0x1f9   : > { %5145 = dma.hbm_to_vmem [thread:$0]  (%p6381_p3), %s6748_s23, 512, %s6751_s3, %s7479_s8, %s7380_s6, %s7380_s6, %s7381_s18  }
 0x1fa   : > { %s1266_s1 = scalar_lea.vmem [#allocation22], %s6417_s5 }
 0x1fb   : > { %s1273_s4 = sshll.u32 %s1266_s1, 4  ;;  %s1274_s4 = int_to_ptr.vmem [resolvable:$true] %s1273_s4 }
 0x1fe   : > { %s6777_s13 = scalar_lea.hbm %s7480_s29, %s6420_s27  ;;  %s5781_s9 = scalar_lea.hbm %s7480_s29, 32 }
 0x1ff   : > { %s5777_s11 = scalar_lea.hbm %s6777_s13, 16  ;;  %p5782_p0 = scmp.lt.u32.totalorder %s6777_s13, %s7480_s29 }
 0x200   : > { %p5778_p12 = scmp.ne.s32.totalorder %s6777_s13, %s5777_s11  ;;  %p5783_p11 = scmp.lt.u32.totalorder %s5781_s9, %s5777_s11 }
 0x201   : > { %p5785_p5 = scmp.lt.u32.totalorder %s5777_s11, %s6777_s13 }
 0x202   : > { %p5779_p6 = pnand %p5778_p12, %p6381_p3  ;;  %p5784_p13 = por %p5783_p11, %p5782_p0 }
 0x204   : > { %p5780_p10 = pneg %p5779_p6  ;;  %p5786_p2 = por %p5785_p5, %p5784_p13 }
 0x206   : > { %p5787_p4 = pnand %p5786_p2, %p5780_p10 }
 0x208   : > { %5790 = shalt.err (!%p5787_p4)
}
 0x209   : > { %s5791_s23 = scalar_lea.vmem %s1274_s4, 16  ;;  %s6129_s3 = smov [#allocation22]  }
 0x20a   : > { %p5792_p1 = scmp.ne.s32.totalorder %s1274_s4, %s5791_s23  ;;  %s5795_s8 = sshll.u32 %s6129_s3, 4  ;;  %s5796_s8 = int_to_ptr.vmem [resolvable:$false] %s5795_s8 }
 0x20b   : > { %s5797_s1 = scalar_lea.vmem %s5796_s8, 32  ;;  %p5798_p9 = scmp.lt.s32.totalorder %s1274_s4, %s5796_s8 }
 0x20c   : > { %p5793_p7 = pnand %p5792_p1, %p6381_p3  ;;  %p5799_p12 = scmp.lt.s32.totalorder %s5797_s1, %s5791_s23 }
 0x20e   : > { %p5794_p8 = pneg %p5793_p7  ;;  %p5800_p6 = por %p5799_p12, %p5798_p9 }
 0x210   : > { %p5801_p0 = pnand %p5800_p6, %p5794_p8 }
 0x212   : > { %5804 = shalt.err (!%p5801_p0)
}
 0x213   : > { %s7481_s9 = scalar_lea.sflag [#allocation21], %s6423_s2  ;;  %s7482_s11 = sld [smem:[#allocation71_spill]] }
 0x214   : > { %5147 = dma.hbm_to_vmem [thread:$0]  (%p6381_p3), %s6777_s13, 16, %s1274_s4, %s7481_s9  }
 0x215   : > { %s1301_s23 = scalar_lea.vmem [#allocation25], %s6639_s26 }
 0x216   : > { %s1308_s8 = sshll.u32 %s1301_s23, 4  ;;  %s6800_s8 = int_to_ptr.vmem [resolvable:$true] %s1308_s8 }
 0x219   : > { %s7483_s6 = smov %s7482_s11  ;;  %s6797_s3 = scalar_lea.hbm %s7482_s11, %s6657_s12 }
 0x21a   : > { %s5805_s1 = scalar_lea.hbm %s6797_s3, 512  ;;  %s5809_s18 = scalar_lea.hbm %s7483_s6, 1024 }
 0x21b   : > { %p5806_p10 = scmp.ne.s32.totalorder %s6797_s3, %s5805_s1  ;;  %p5810_p5 = scmp.lt.u32.totalorder %s6797_s3, %s7483_s6 }
 0x21c   : > { %p5811_p2 = scmp.lt.u32.totalorder %s5809_s18, %s5805_s1  ;;  %p5813_p1 = scmp.lt.u32.totalorder %s5805_s1, %s6797_s3 }
 0x21d   : > { %p5807_p11 = pnand %p5806_p10, %p6381_p3 }
 0x21e   : > { %p5812_p4 = por %p5811_p2, %p5810_p5 }
 0x21f   : > { %p5808_p13 = pneg %p5807_p11 }
 0x220   : > { %p5814_p7 = por %p5813_p1, %p5812_p4 }
 0x222   : > { %p5815_p8 = pnand %p5814_p7, %p5808_p13 }
 0x224   : > { %5818 = shalt.err (!%p5815_p8)
}
 0x225   : > { %s5819_s26 = scalar_lea.vmem %s6800_s8, 512  ;;  %s6130_s12 = smov [#allocation25]  }
 0x226   : > { %p5820_p9 = scmp.ne.s32.totalorder %s6800_s8, %s5819_s26  ;;  %s5823_s13 = sshll.u32 %s6130_s12, 4  ;;  %s5824_s13 = int_to_ptr.vmem [resolvable:$false] %s5823_s13 }
 0x227   : > { %s5825_s4 = scalar_lea.vmem %s5824_s13, 1024  ;;  %p5826_p0 = scmp.lt.s32.totalorder %s6800_s8, %s5824_s13 }
 0x228   : > { %p5821_p12 = pnand %p5820_p9, %p6381_p3  ;;  %p5827_p10 = scmp.lt.s32.totalorder %s5825_s4, %s5819_s26 }
 0x22a   : > { %p5822_p6 = pneg %p5821_p12  ;;  %p5828_p11 = por %p5827_p10, %p5826_p0 }
 0x22c   : > { %p5829_p5 = pnand %p5828_p11, %p5822_p6 }
 0x22e   : > { %5832 = shalt.err (!%p5829_p5)
}
 0x22f   : > { %s7484_s18 = smov 8   ;;  %s7485_s9 = smov 128  }
 0x230   : > { %s7486_s11 = scalar_lea.sflag [#allocation24], %s6423_s2  ;;  %s7487_s23 = sld [smem:[#allocation74_spill]] }
 0x231   : > { %5149 = dma.hbm_to_vmem [thread:$0]  (%p6381_p3), %s6797_s3, 512, %s6800_s8, %s7486_s11, %s7485_s9, %s7485_s9, %s7484_s18  }
 0x232   : > { %s1346_s26 = scalar_lea.vmem [#allocation28], %s6417_s5 }
 0x233   : > { %s1353_s12 = sshll.u32 %s1346_s26, 4  ;;  %s1354_s12 = int_to_ptr.vmem [resolvable:$true] %s1353_s12 }
 0x236   : > { %s7488_s6 = smov %s7487_s23  ;;  %s6826_s1 = scalar_lea.hbm %s7487_s23, %s6420_s27 }
 0x237   : > { %s5833_s13 = scalar_lea.hbm %s6826_s1, 16  ;;  %s5837_s4 = scalar_lea.hbm %s7488_s6, 32 }
 0x238   : > { %p5834_p13 = scmp.ne.s32.totalorder %s6826_s1, %s5833_s13  ;;  %p5838_p1 = scmp.lt.u32.totalorder %s6826_s1, %s7488_s6 }
 0x239   : > { %p5839_p7 = scmp.lt.u32.totalorder %s5837_s4, %s5833_s13  ;;  %p5841_p9 = scmp.lt.u32.totalorder %s5833_s13, %s6826_s1 }
 0x23a   : > { %p5835_p2 = pnand %p5834_p13, %p6381_p3 }
 0x23b   : > { %p5840_p8 = por %p5839_p7, %p5838_p1 }
 0x23c   : > { %p5836_p4 = pneg %p5835_p2 }
 0x23d   : > { %p5842_p12 = por %p5841_p9, %p5840_p8 }
 0x23f   : > { %p5843_p6 = pnand %p5842_p12, %p5836_p4 }
 0x241   : > { %5846 = shalt.err (!%p5843_p6)
}
 0x242   : > { %s5847_s3 = scalar_lea.vmem %s1354_s12, 16  ;;  %s6131_s8 = smov [#allocation28]  }
 0x243   : > { %p5848_p0 = scmp.ne.s32.totalorder %s1354_s12, %s5847_s3  ;;  %s5851_s18 = sshll.u32 %s6131_s8, 4  ;;  %s5852_s18 = int_to_ptr.vmem [resolvable:$false] %s5851_s18 }
 0x244   : > { %s5853_s9 = scalar_lea.vmem %s5852_s18, 32  ;;  %p5854_p5 = scmp.lt.s32.totalorder %s1354_s12, %s5852_s18 }
 0x245   : > { %p5849_p10 = pnand %p5848_p0, %p6381_p3  ;;  %p5855_p13 = scmp.lt.s32.totalorder %s5853_s9, %s5847_s3 }
 0x247   : > { %p5850_p11 = pneg %p5849_p10  ;;  %p5856_p2 = por %p5855_p13, %p5854_p5 }
 0x249   : > { %p5857_p1 = pnand %p5856_p2, %p5850_p11 }
 0x24b   : > { %5860 = shalt.err (!%p5857_p1)
}
 0x24c   : > { %s7489_s11 = scalar_lea.sflag [#allocation27], %s6423_s2  ;;  %s7490_s23 = sld [smem:[#allocation76_spill]] }
 0x24d   : > { %5151 = dma.hbm_to_vmem [thread:$0]  (%p6381_p3), %s6826_s1, 16, %s1354_s12, %s7489_s11  }
 0x24e   : > { %s1380_s4 = scalar_lea.vmem [#allocation31], %s6417_s5 }
 0x24f   : > { %s1387_s3 = sshll.u32 %s1380_s4, 4  ;;  %s1388_s3 = int_to_ptr.vmem [resolvable:$true] %s1387_s3 }
 0x252   : > { %s7491_s13 = smov %s7490_s23  ;;  %s6846_s26 = scalar_lea.hbm %s7490_s23, %s6420_s27 }
 0x253   : > { %s5861_s8 = scalar_lea.hbm %s6846_s26, 16  ;;  %s5865_s18 = scalar_lea.hbm %s7491_s13, 32 }
 0x254   : > { %p5862_p4 = scmp.ne.s32.totalorder %s6846_s26, %s5861_s8  ;;  %p5866_p9 = scmp.lt.u32.totalorder %s6846_s26, %s7491_s13 }
 0x255   : > { %p5867_p12 = scmp.lt.u32.totalorder %s5865_s18, %s5861_s8  ;;  %p5869_p0 = scmp.lt.u32.totalorder %s5861_s8, %s6846_s26 }
 0x256   : > { %p5863_p7 = pnand %p5862_p4, %p6381_p3 }
 0x257   : > { %p5868_p6 = por %p5867_p12, %p5866_p9 }
 0x258   : > { %p5864_p8 = pneg %p5863_p7 }
 0x259   : > { %p5870_p10 = por %p5869_p0, %p5868_p6 }
 0x25b   : > { %p5871_p11 = pnand %p5870_p10, %p5864_p8 }
 0x25d   : > { %5874 = shalt.err (!%p5871_p11)
}
 0x25e   : > { %s5875_s27 = scalar_lea.vmem %s1388_s3, 16  ;;  %s6132_s5 = smov [#allocation31]  }
 0x25f   : > { %p5876_p5 = scmp.ne.s32.totalorder %s1388_s3, %s5875_s27  ;;  %s5879_s1 = sshll.u32 %s6132_s5, 4  ;;  %s5880_s1 = int_to_ptr.vmem [resolvable:$false] %s5879_s1 }
 0x260   : > { %s5881_s12 = scalar_lea.vmem %s5880_s1, 32  ;;  %p5882_p1 = scmp.lt.s32.totalorder %s1388_s3, %s5880_s1 }
 0x261   : > { %p5877_p13 = pnand %p5876_p5, %p6381_p3  ;;  %p5883_p4 = scmp.lt.s32.totalorder %s5881_s12, %s5875_s27 }
 0x263   : > { %p5878_p2 = pneg %p5877_p13  ;;  %p5884_p7 = por %p5883_p4, %p5882_p1 }
 0x265   : > { %p5885_p9 = pnand %p5884_p7, %p5878_p2 }
 0x267   : > { %5888 = shalt.err (!%p5885_p9)
}
 0x268   : > { %s7492_s9 = scalar_lea.sflag [#allocation30], %s6423_s2 }
 0x269   : > { %5153 = dma.hbm_to_vmem [thread:$0]  (%p6381_p3), %s6846_s26, 16, %s1388_s3, %s7492_s9  }
 0x26a PF: > { %p4721_p8 = scmp.ge.s32.totalorder %s6079_s15, 1  ;;  %p1392_p12 = scmp.lt.s32.totalorder %s6079_s15, 5 }
 0x26c   : > { %p1393_p6 = pnand %p4721_p8, %p1392_p12 }
 0x26e   : > { %1396 = sbr.rel (%p1393_p6) target bundleno = 4996 (0x1384), region = 140 }
 0x275   : > { %s6867_s11 = sand.u32 1, %s6055_s28   ;;  %p7493_p0 = scmp.ne.s32.totalorder %s7463_s19, 0 }
 0x276   : > { %s1399_s23 = scalar_lea.sflag [#allocation3], %s6867_s11 }
 0x277   : > { %5990 = dma.done.wait (%p7493_p0), %s1399_s23, 16  }
 0x278   : > { %5992 = vsyncadd (%p7493_p0), %s1399_s23, 4294967280  ;;  %s6876_s25 = sand.u32 1, %s6367_s16  }
 0x279   : > { %s1407_s2 = scalar_lea.sflag [#allocation6], %s6876_s25 }
 0x27a   : > { %5994 = dma.done.wait (%p7493_p0), %s1407_s2, 32  }
 0x27b   : > { %5996 = vsyncadd (%p7493_p0), %s1407_s2, 4294967264  ;;  %s1423_s8 = scalar_lea.sflag [#allocation9], %s6876_s25 }
 0x27c   : > { %5998 = dma.done.wait (%p7493_p0), %s1423_s8, 528  }
 0x27d   : > { %6000 = vsyncadd (%p7493_p0), %s1423_s8, 4294966768  ;;  %s4722_s16 = sshll.u32 %s6867_s11, 5  ;;  %s1440_s5 = scalar_lea.sflag [#allocation12], %s6876_s25 }
 0x27e   : > { %s6892_s27 = scalar_lea.vmem [#allocation10], %s4722_s16 }
 0x27f   : > { %7494 = sst [smem:[#allocation95_spill]] %s6892_s27 }
 0x280   : > { %6002 = dma.done.wait (%p7493_p0), %s1440_s5, 528  }
 0x281   : > { %6004 = vsyncadd (%p7493_p0), %s1440_s5, 4294966768  ;;  %s6900_s12 = scalar_lea.vmem [#allocation13], %s4722_s16  ;;  %s1457_s9 = scalar_lea.sflag [#allocation15], %s6876_s25 }
 0x282   : > { %6006 = dma.done.wait (%p7493_p0), %s1457_s9, 528  }
 0x283   : > { %6008 = vsyncadd (%p7493_p0), %s1457_s9, 4294966768  ;;  %s6908_s2 = scalar_lea.vmem [#allocation16], %s4722_s16  ;;  %s1474_s8 = scalar_lea.sflag [#allocation18], %s6876_s25 }
 0x284   : > { %7495 = sst [smem:[#allocation96_spill]] %s6908_s2 }
 0x285   : > { %6010 = dma.done.wait (%p7493_p0), %s1474_s8, 528  }
 0x286   : > { %6012 = vsyncadd (%p7493_p0), %s1474_s8, 4294966768  ;;  %s6916_s5 = scalar_lea.vmem [#allocation19], %s4722_s16  ;;  %s1491_s23 = scalar_lea.sflag [#allocation21], %s6876_s25 }
 0x287   : > { %7496 = sst [smem:[#allocation97_spill]] %s6916_s5 }
 0x288   : > { %6014 = dma.done.wait (%p7493_p0), %s1491_s23, 32  }
 0x289   : > { %6016 = vsyncadd (%p7493_p0), %s1491_s23, 4294967264  ;;  %s1507_s1 = scalar_lea.sflag [#allocation24], %s6876_s25 }
 0x28a   : > { %6018 = dma.done.wait (%p7493_p0), %s1507_s1, 528  }
 0x28b   : > { %6020 = vsyncadd (%p7493_p0), %s1507_s1, 4294966768  ;;  %s6931_s8 = scalar_lea.vmem [#allocation25], %s4722_s16  ;;  %s1524_s18 = scalar_lea.sflag [#allocation27], %s6876_s25 }
 0x28c   : > { %7497 = sst [smem:[#allocation98_spill]] %s6931_s8 }
 0x28d   : > { %6022 = dma.done.wait (%p7493_p0), %s1524_s18, 32  }
 0x28e   : > { %6024 = vsyncadd (%p7493_p0), %s1524_s18, 4294967264  ;;  %s1540_s3 = scalar_lea.sflag [#allocation30], %s6876_s25 }
 0x28f   : > { %6026 = dma.done.wait (%p7493_p0), %s1540_s3, 32  }
 0x290   : > { %6028 = vsyncadd (%p7493_p0), %s1540_s3, 4294967264  ;;  %s7498_s16 = sld [smem:[#allocation85_spill]]  ;;  %s7499_s1 = sld [smem:[#allocation84_spill]] }
 0x291   : > { %s7500_s26 = sld [smem:[#allocation49_spill]]  ;;  %s7501_s4 = sld [smem:[#allocation47_spill]] }
 0x292   : > { %s7502_s6 = sld [smem:[#allocation48_spill]]  ;;  %s7503_s18 = sld [smem:[#allocation50_spill]] }
 0x293   : > { %s7504_s13 = sld [smem:[#allocation51_spill]]  ;;  %s7505_s14 = sld [smem:[#allocation52_spill]] }
 0x294   : > { %s7506_s17 = sld [smem:[#allocation54_spill]]  ;;  %s7507_s23 = sld [smem:[#allocation53_spill]] }
 0x295   : > { %s6947_s25 = sand.u32 1, %s6043_s22   ;;  %s7509_s9 = sld [smem:[#allocation55_spill]] }
 0x296   : > { %7508 = sst [smem:[#allocation99_spill]] %s6947_s25  ;;  %s4727_s20 = sshll.u32 %s6947_s25, 3 }
 0x297   : > { %s7510_s19 = sld [smem:[#allocation57_spill]]  ;;  %p1756_p3 = scmp.lt.s32.totalorder %s7498_s16, 1 }
 0x298   : > { %s7511_s3 = sld [smem:[#allocation73_spill]]  ;;  %p1779_p10 = scmp.lt.s32.totalorder %s7499_s1, 1 }
 0x299   : > { %s7563_s16 = smov (!%p1756_p3, %s7498_s16), 1  ;;  %p4742_p11 = scmp.ne.s32.totalorder %s7499_s1, 0 }
 0x29a   : > { %s6956_s21 = sshll.u32 %s7563_s16, 3  ;;  %s1766_s24 = scalar_lea.vmem %s7500_s26, %s7563_s16  ;;  %vm1807_vm0 = vcmask (!%p4742_p11), 261120  }
 0x29b   : > { %s1759_s29 = scalar_lea.vmem %s7501_s4, %s6956_s21  ;;  %s1763_s30 = scalar_lea.vmem %s7502_s6, %s6956_s21 }
 0x29c   : > { %s1770_s10 = scalar_lea.vmem %s7503_s18, %s6956_s21  ;;  %s1774_s28 = scalar_lea.vmem %s7504_s13, %s6956_s21  ;;  %v1806_v0 = vld [vmem:[%s1759_s29] sm:$0xff] (!%p4742_p11) }
 0x29d   : > { %s1778_s22 = scalar_lea.vmem %s7505_s14, %s6956_s21  ;;  %s1550_s4 = scalar_lea.vmem [#allocation31], %s6867_s11 }
 0x29e   : > { %s6971_s0 = scalar_select %p1779_p10, %s7499_s1, 1 }
 0x29f   : > { %s6988_s6 = scalar_lea.vmem [#allocation32], %s4727_s20  ;;  %s6990_s13 = scalar_lea.vmem [#allocation33], %s4727_s20 }
 0x2a0   : > { %s4803_s15 = sshll.u32 %s6971_s0, 5  ;;  %s1786_s7 = scalar_lea.vmem %s7506_s17, %s6971_s0  ;;  %1808 = vst.msk [vmem:[%s6988_s6] sm:$0xff] (!%p4742_p11), %vm1807_vm0, %v1806_v0 }
 0x2a1   : > { %s1783_s25 = scalar_lea.vmem %s7507_s23, %s4803_s15  ;;  %s6978_s8 = scalar_lea.vmem %s7509_s9, %s4803_s15 }
 0x2a2   : > { %s6981_s5 = scalar_lea.vmem %s7510_s19, %s4803_s15  ;;  %s4806_s2 = sshll.u32 %s6971_s0, 6 }
 0x2a3   : > { %s6985_s27 = scalar_lea.vmem %s7511_s3, %s4806_s2  ;;  %1805 = sbr.rel (%p4742_p11) target bundleno = 682 (0x2aa), region = 220 }
 0x2aa PF: > { %v1812_v1 = vld [vmem:[%s1783_s25] sm:$0xff]  ;;  %v1813_v2 = vld [vmem:[%s1783_s25 + $0x8] sm:$0xff]  ;;  %v1814_v3 = vld [vmem:[%s1783_s25 + $0x10] sm:$0xff]  ;;  %v6133_v4 = vmov 0.0|0.0   ;;  %vm6134_vm1 = vmmov 0   ;;  %v6135_v7 = vmov 0.0  }
 0x2ab   : > { %5075 = vmatprep.subr.bf16.mxu1 %v6133_v4  ;;  %v5076_v5 = vpack.c.bf16 %v1813_v2, %v1812_v1  ;;  %v1815_v6 = vld [vmem:[%s1783_s25 + $0x18] sm:$0xff]  ;;  %4896 = vmatprep.mubr.msk.f32.mxu1 %vm6134_vm1, %v6135_v7  ;;  %v1810_v10 = vld [vmem:[%s1763_s30] sm:$0xff]  ;;  %vm1823_vm2 = vcmask 261120   ;;  %s6136_s30 = smov 120   ;;  %s6137_s20 = smov 96   ;;  %v1898_v17 = vld [vmem:[%s6978_s8 + $0x8] sm:$0xff] }
 0x2ac   : > { %4910 = vmatprep.subr.mxu0 %v6135_v7  ;;  %4912 = vmatprep.mubr.msk.f32.mxu0 %vm6134_vm1, %v6135_v7  ;;  %v5079_v8 = vpack.c.bf16 %v1815_v6, %v1814_v3  ;;  %v7001_v9 = vld [vmem:[%s6988_s6] sm:$0xff]  ;;  %v1899_v18 = vld [vmem:[%s6978_s8 + $0x10] sm:$0xff]  ;;  %s6138_s15 = smov 80   ;;  %s6139_s29 = smov 88   ;;  %vm1985_vm3 = vcmask 64512   ;;  %vm2670_vm4 = vcmask 130048  }
 0x2ad   : > { %5077 = vmatpush3.bf16.msra.mxu1 %v5076_v5  ;;  %v1811_v11 = vadd.f32 %v1810_v10, %v7001_v9  ;;  %v4743_v12 = vld [vmem:[%s1786_s7] ss:$0 sm:$0xff]  ;;  %v1900_v20 = vld [vmem:[%s6978_s8 + $0x18] sm:$0xff]  ;;  %s6140_s0 = smov 72   ;;  %s6141_s7 = smov 112   ;;  %vm2672_vm5 = vcmask 195584  }
 0x2ae   : > { %5078 = vmatprep.subr.bf16.mxu1 %v6133_v4  ;;  %v1897_v16 = vld [vmem:[%s6978_s8] sm:$0xff]  ;;  %v5085_v21 = vpack.c.bf16 %v1900_v20, %v1899_v18  ;;  %s6142_s26 = smov 104   ;;  %s6143_s9 = smov 8   ;;  %vm3936_vm6 = vcmask 523264  }
 0x2af   : > { %v5082_v19 = vpack.c.bf16 %v1898_v17, %v1897_v16  ;;  %v4749_v30 = vld [vmem:[%s1766_s24] ss:$0 sm:$0xff]  ;;  %s7515_s24 = scalar_lea.vmem [#allocation2], %s6867_s11  ;;  %s6144_s8 = smov 16  }
 0x2b0   : > { %v4745_v50 = vld [vmem:[%s7515_s24] ss:$0 sm:$0xff]  ;;  %s7516_s23 = scalar_lea.vmem [#allocation5], %s6867_s11  ;;  %s7517_s16 = sld [smem:[#allocation95_spill]] }
 0x2b1   : > { %5080 = vmatpush3.bf16.msra.mxu1 %v5079_v8  ;;  %s7522_s25 = scalar_lea.vmem [#allocation14], %s6867_s11  ;;  %s7524_s19 = scalar_lea.vmem [#allocation11], %s6867_s11 }
 0x2b2   : > { %5081 = vmatprep.subr.bf16.mxu1 %v6133_v4  ;;  %s7526_s21 = scalar_lea.vmem [#allocation17], %s6867_s11  ;;  %s7528_s17 = sld [smem:[#allocation98_spill]] }
 0x2b3   : > { %s7529_s14 = scalar_lea.vmem [#allocation20], %s6867_s11 }
 0x2b4   : > { %4897 = vmatmul.mubr.msk.f32.vlgmr.msra.gmra.mrb[0].mxu1 %vm1823_vm2, %v1811_v11 }
 0x2b5   : > { %4907 = vmatprep.mubr.msk.f32.mxu1 %vm6134_vm1, %v6135_v7  ;;  %5083 = vmatpush3.bf16.msra.mxu1 %v5082_v19 }
 0x2b6   : > { %5084 = vmatprep.subr.bf16.mxu1 %v6133_v4 }
 0x2b9   : > { %5086 = vmatpush3.bf16.msra.mxu1 %v5085_v21 }
 0x2ba   : > { %4915 = vmatprep.subr.mxu1 %v6135_v7 }
 0x2bc   : > { %4908 = vmatmul.mubr.msk.f32.vlgmr.msra.gmra.mrb[2].mxu1 %vm1823_vm2, %v7001_v9 }
 0x2bd   : > { %4917 = vmatprep.mubr.msk.f32.mxu1 %vm6134_vm1, %v6135_v7 }
 0x387   : > { %v1893_v13 = vpop.f32.mrb[0].mxu1 }
 0x388   : > { %v1894_v14 = vadd.f32 %v4743_v12, %v1893_v13  ;;  %v4898_v15 = vpop.f32.mrb[1].mxu1 }
 0x38a   : > { %2152 = vrot.lane.b32.xlu1 %v1894_v14, %s6136_s30  ;;  %1983 = vrot.lane.b32.xlu0 %v1894_v14, %s6137_s20  ;;  %s7531_s20 = scalar_lea.vmem [#allocation23], %s6867_s11 }
 0x38e   : > { %2323 = vrot.lane.b32.xlu1 %v1894_v14, %s6138_s15  ;;  %2154 = vrot.lane.b32.xlu0 %v1894_v14, %s6139_s29  ;;  %s7532_s15 = scalar_lea.vmem [#allocation26], %s6867_s11  ;;  %s7533_s29 = sld [smem:[#allocation85_spill]] }
 0x38f   : > { %v1977_v51 = vpop.f32.mrb[2].mxu1 }
 0x390   : > { %v1978_v52 = vadd.f32 %v4745_v50, %v1977_v51  ;;  %v4909_v53 = vpop.f32.mrb[3].mxu1 }
 0x392   : > { %2491 = vrot.lane.b32.xlu1 %v1894_v14, %s6140_s0  ;;  %2321 = vrot.lane.b32.xlu0 %v1894_v14, %s6141_s7  ;;  %s7534_s0 = sld [smem:[#allocation78_spill]] }
 0x393   : > { %4916 = vmatpush3.msra.mxu1 %v1978_v52 }
 0x394   : > { %4925 = vmatprep.subr.mxu1 %v6135_v7  ;;  %s4794_s2 = sshll.u32 %s7533_s29, 7 }
 0x396   : > { %2489 = vrot.lane.b32.xlu0 %v1894_v14, %s6142_s26 }
 0x398   : > { %s7535_s24 = smov %s7534_s0 }
 0x3fc   : > { %v2153_v22 = vpop.permute.xlu1 %2152  ;;  %v1984_v23 = vpop.permute.xlu0 %1983 }
 0x3fd   : > { %4911 = vmatpush3.xpose.msk.msra.mxu0 %vm1985_vm3, %v1984_v23 }
 0x3fe   : > { %4920 = vmatprep.subr.mxu0 %v6135_v7 }
 0x400   : > { %4913 = vmatmul.mubr.msk.f32.vlgmr.msra.gmra.mrb[0].mxu0 %vm1985_vm3, %v1894_v14  ;;  %v2155_v24 = vpop.permute.xlu0 %2154  ;;  %v2324_v25 = vpop.permute.xlu1 %2323 }
 0x401   : > { %4921 = vmatpush3.xpose.msk.msra.mxu0 %vm1985_vm3, %v2155_v24  ;;  %4922 = vmatprep.mubr.msk.f32.mxu0 %vm6134_vm1, %v6135_v7 }
 0x402   : > { %4930 = vmatprep.subr.mxu0 %v6135_v7 }
 0x404   : > { %4923 = vmatmul.mubr.msk.f32.vlgmr.msra.gmra.mrb[2].mxu0 %vm1985_vm3, %v2153_v22  ;;  %v2322_v26 = vpop.permute.xlu0 %2321  ;;  %v2492_v27 = vpop.permute.xlu1 %2491 }
 0x405   : > { %4931 = vmatpush3.xpose.msk.msra.mxu0 %vm1985_vm3, %v2324_v25  ;;  %4932 = vmatprep.mubr.msk.f32.mxu0 %vm6134_vm1, %v6135_v7 }
 0x406   : > { %4940 = vmatprep.subr.mxu0 %v6135_v7 }
 0x408   : > { %4933 = vmatmul.mubr.msk.f32.vlgmr.msra.gmra.mrb[4].mxu0 %vm1985_vm3, %v2322_v26  ;;  %v2490_v28 = vpop.permute.xlu0 %2489 }
 0x409   : > { %4941 = vmatpush3.xpose.msk.msra.mxu0 %vm1985_vm3, %v2492_v27  ;;  %4942 = vmatprep.mubr.msk.f32.mxu0 %vm6134_vm1, %v6135_v7 }
 0x40a   : > { %5087 = vmatprep.subr.bf16.mxu0 %v6133_v4 }
 0x40c   : > { %4943 = vmatmul.mubr.msk.f32.vlgmr.msra.gmra.mrb[6].mxu0 %vm1985_vm3, %v2490_v28 }
 0x40d   : > { %4958 = vmatprep.mubr.msk.f32.mxu0 %vm6134_vm1, %v6135_v7 }
 0x4d3   : > { %v2056_v29 = vpop.f32.mrb[0].mxu0 }
 0x4d4   : > { %v2060_v31 = vmul.f32 0.35355338, %v2056_v29  ;;  %v4914_v32 = vpop.f32.mrb[1].mxu0 }
 0x4d5   : > { %v2675_v32 = vld [vmem:[%s6981_s5] sm:$0xff] }
 0x4d6   : > { %v2067_v33 = vadd.f32 %v4749_v30, %v2060_v31 }
 0x4d7   : > { %v2226_v34 = vpop.f32.mrb[2].mxu0 }
 0x4d8   : > { %v2230_v35 = vmul.f32 0.35355338, %v2226_v34  ;;  %v4924_v36 = vpop.f32.mrb[3].mxu0  ;;  %v2068_v37 = vsel %vm1985_vm3, %v2067_v33, -inf  ;;  %v2677_v34 = vld [vmem:[%s6981_s5 + $0x10] sm:$0xff] }
 0x4d9   : > { %2069 = vmax.xlane.f32.xlu1 %v2068_v37  ;;  %v2678_v36 = vld [vmem:[%s6981_s5 + $0x18] sm:$0xff] }
 0x4da   : > { %v2231_v38 = vadd.f32 %v4749_v30, %v2230_v35  ;;  %v5091_v37 = vpack.c.bf16 %v2678_v36, %v2677_v34 }
 0x4db   : > { %v2395_v39 = vpop.f32.mrb[4].mxu0 }
 0x4dc   : > { %v2399_v40 = vmul.f32 0.35355338, %v2395_v39  ;;  %v4934_v41 = vpop.f32.mrb[5].mxu0  ;;  %v2232_v42 = vsel %vm1985_vm3, %v2231_v38, -inf }
 0x4dd   : > { %2233 = vmax.xlane.f32.xlu0 %v2232_v42 }
 0x4de   : > { %v2400_v43 = vadd.f32 %v4749_v30, %v2399_v40 }
 0x4df   : > { %v2563_v44 = vpop.f32.mrb[6].mxu0 }
 0x4e0   : > { %v2567_v45 = vmul.f32 0.35355338, %v2563_v44  ;;  %v4944_v46 = vpop.f32.mrb[7].mxu0  ;;  %v2401_v47 = vsel %vm1985_vm3, %v2400_v43, -inf }
 0x4e1   : > { %2402 = vmax.xlane.f32.xlu0 %v2401_v47 }
 0x4e2   : > { %v2568_v48 = vadd.f32 %v4749_v30, %v2567_v45 }
 0x4e4   : > { %v2569_v49 = vsel %vm1985_vm3, %v2568_v48, -inf }
 0x4e5   : > { %2570 = vmax.xlane.f32.xlu1 %v2569_v49 }
 0x566   : > { %v2070_v54 = vpop.xlane.xlu1 %2069 }
 0x567   : > { %v2071_v55 = vsub.f32 %v2067_v33, %v2070_v54  ;;  %v2676_v33 = vld [vmem:[%s6981_s5 + $0x8] sm:$0xff]  ;;  %s6145_s5 = smov 24  }
 0x568   : > { %v5088_v35 = vpack.c.bf16 %v2676_v33, %v2675_v32 }
 0x569   : > { %v2072_v56 = vmul.f32 1.442695, %v2071_v55 }
 0x56a   : > { %v2234_v57 = vpop.xlane.xlu0 %2233  ;;  %5089 = vmatpush3.bf16.msra.mxu0 %v5088_v35 }
 0x56b   : > { %5319 = vpow2.f32 %v2072_v56  ;;  %v2235_v58 = vsub.f32 %v2231_v38, %v2234_v57  ;;  %5090 = vmatprep.subr.bf16.mxu0 %v6133_v4 }
 0x56d   : > { %v2236_v59 = vmul.f32 1.442695, %v2235_v58 }
 0x56e   : > { %v2403_v60 = vpop.xlane.xlu0 %2402  ;;  %5092 = vmatpush3.bf16.msra.mxu0 %v5091_v37 }
 0x56f   : > { %5321 = vpow2.f32 %v2236_v59  ;;  %v2404_v61 = vsub.f32 %v2400_v43, %v2403_v60  ;;  %5099 = vmatprep.subr.bf16.mxu0 %v6133_v4 }
 0x571   : > { %v2405_v62 = vmul.f32 1.442695, %v2404_v61 }
 0x572   : > { %v2571_v6 = vpop.xlane.xlu1 %2570 }
 0x573   : > { %5323 = vpow2.f32 %v2405_v62  ;;  %v2572_v8 = vsub.f32 %v2568_v48, %v2571_v6  ;;  %v2881_v6 = vld [vmem:[%s6900_s12 + $0x18] sm:$0xff] }
 0x575   : > { %v5320_v63 = vpop.eup %5319  ;;  %v2573_v10 = vmul.f32 1.442695, %v2572_v8 }
 0x576   : > { %v2074_v0 = vsel %vm1985_vm3, %v5320_v63, 0.0 }
 0x577   : > { %2075 = vadd.xlane.f32.xlu0 %v2074_v0  ;;  %5325 = vpow2.f32 %v2573_v10  ;;  %v2879_v0 = vld [vmem:[%s6900_s12 + $0x8] sm:$0xff] }
 0x578   : > { %v2795_v10 = vld [vmem:[%s7517_s16 + $0x10] sm:$0xff] }
 0x579   : > { %v5322_v1 = vpop.eup %5321 }
 0x57a   : > { %v2238_v2 = vsel %vm1985_vm3, %v5322_v1, 0.0 }
 0x57b   : > { %2239 = vadd.xlane.f32.xlu1 %v2238_v2  ;;  %v2794_v2 = vld [vmem:[%s7517_s16 + $0x8] sm:$0xff] }
 0x57d   : > { %v5324_v3 = vpop.eup %5323 }
 0x57e   : > { %v2407_v5 = vsel %vm1985_vm3, %v5324_v3, 0.0 }
 0x57f   : > { %2408 = vadd.xlane.f32.xlu0 %v2407_v5 }
 0x581   : > { %v5326_v11 = vpop.eup %5325 }
 0x582   : > { %v2575_v12 = vsel %vm1985_vm3, %v5326_v11, 0.0 }
 0x58c   : > { %2412 = vrot.lane.b32.xlu1 %v1978_v52, %s6141_s7 }
 0x595   : > { %2244 = vrot.lane.b32.xlu0 %v1978_v52, %s6136_s30 }
 0x5b0   : > { %2576 = vadd.xlane.f32.xlu1 %v2575_v12  ;;  %v2877_v12 = vld [vmem:[%s1778_s22] sm:$0xff]  ;;  %s7520_s22 = scalar_lea.vmem [#allocation7], %s6867_s11 }
 0x5c1   : > { %2580 = vrot.lane.b32.xlu1 %v1978_v52, %s6142_s26  ;;  %v4760_v52 = vld [vmem:[%s7516_s23] ss:$0 sm:$0xff] }
 0x604   : > { %v2076_v13 = vpop.xlane.xlu0 %2075 }
 0x605   : > { %5327 = vrcp.f32 %v2076_v13 }
 0x608   : > { %v2240_v14 = vpop.xlane.xlu1 %2239 }
 0x609   : > { %5329 = vrcp.f32 %v2240_v14 }
 0x60c   : > { %v2409_v15 = vpop.xlane.xlu0 %2408  ;;  %v2413_v21 = vpop.permute.xlu1 %2412 }
 0x60d   : > { %5331 = vrcp.f32 %v2409_v15 }
 0x60f   : > { %v5328_v16 = vpop.eup %5327 }
 0x610   : > { %v2078_v17 = vmul.f32 %v5328_v16, %v5320_v63  ;;  %v2245_v18 = vpop.permute.xlu0 %2244  ;;  %v2878_v63 = vld [vmem:[%s6900_s12] sm:$0xff] }
 0x612   : > { %4918 = vmatmul.mubr.msk.f32.vlgmr.msra.gmra.mrb[4].mxu1 %vm1985_vm3, %v2078_v17 }
 0x613   : > { %v5330_v19 = vpop.eup %5329  ;;  %4926 = vmatpush3.msra.mxu1 %v2245_v18  ;;  %4927 = vmatprep.mubr.msk.f32.mxu1 %vm6134_vm1, %v6135_v7  ;;  %v4762_v18 = vld [vmem:[%s7520_s22] ss:$0 sm:$0xff] }
 0x614   : > { %v2242_v20 = vmul.f32 %v5330_v19, %v5322_v1  ;;  %4935 = vmatprep.subr.mxu1 %v6135_v7  ;;  %v5100_v1 = vpack.c.bf16 %v2879_v0, %v2878_v63 }
 0x616   : > { %4928 = vmatmul.mubr.msk.f32.vlgmr.msra.gmra.mrb[6].mxu1 %vm1985_vm3, %v2242_v20  ;;  %v2320_v26 = vadd.f32 %v2242_v20, %v2078_v17 }
 0x617   : > { %v5332_v22 = vpop.eup %5331  ;;  %4936 = vmatpush3.msra.mxu1 %v2413_v21  ;;  %4937 = vmatprep.mubr.msk.f32.mxu1 %vm6134_vm1, %v6135_v7 }
 0x618   : > { %v2411_v23 = vmul.f32 %v5332_v22, %v5324_v3  ;;  %4945 = vmatprep.subr.mxu1 %v6135_v7  ;;  %v2880_v3 = vld [vmem:[%s6900_s12 + $0x10] sm:$0xff]  ;;  %s7521_s12 = scalar_lea.vmem [#allocation8], %s6867_s11 }
 0x619   : > { %v5103_v8 = vpack.c.bf16 %v2881_v6, %v2880_v3  ;;  %v4763_v20 = vld [vmem:[%s7521_s12] ss:$0 sm:$0xff] }
 0x61a   : > { %4938 = vmatmul.mubr.msk.f32.vlgmr.msra.gmra.mrb[8].mxu1 %vm1985_vm3, %v2411_v23  ;;  %v2488_v29 = vadd.f32 %v2411_v23, %v2320_v26  ;;  %v2791_v22 = vld [vmem:[%s1770_s10] sm:$0xff]  ;;  %s7523_s10 = sld [smem:[#allocation96_spill]] }
 0x61b   : > { %4947 = vmatprep.mubr.msk.f32.mxu1 %vm6134_vm1, %v6135_v7 }
 0x620   : > { %v2963_v34 = vld [vmem:[%s7523_s10] sm:$0xff]  ;;  %v2964_v35 = vld [vmem:[%s7523_s10 + $0x8] sm:$0xff]  ;;  %v2965_v36 = vld [vmem:[%s7523_s10 + $0x10] sm:$0xff] }
 0x621   : > { %v5106_v37 = vpack.c.bf16 %v2964_v35, %v2963_v34 }
 0x63d   : > { %v2577_v24 = vpop.xlane.xlu1 %2576 }
 0x63e   : > { %5333 = vrcp.f32 %v2577_v24 }
 0x641   : > { %v2581_v25 = vpop.permute.xlu1 %2580 }
 0x642   : > { %4946 = vmatpush3.msra.mxu1 %v2581_v25  ;;  %v4766_v25 = vld [vmem:[%s7522_s25] ss:$0 sm:$0xff] }
 0x643   : > { %5093 = vmatprep.subr.bf16.mxu1 %v6133_v4 }
 0x648   : > { %v5334_v27 = vpop.eup %5333 }
 0x649   : > { %v2579_v28 = vmul.f32 %v5334_v27, %v5326_v11  ;;  %v2796_v11 = vld [vmem:[%s7517_s16 + $0x18] sm:$0xff] }
 0x64a   : > { %v5097_v13 = vpack.c.bf16 %v2796_v11, %v2795_v10 }
 0x64b   : > { %4948 = vmatmul.mubr.msk.f32.vlgmr.msra.gmra.mrb[10].mxu1 %vm1985_vm3, %v2579_v28  ;;  %v2656_v30 = vadd.f32 %v2579_v28, %v2488_v29  ;;  %v4764_v29 = vld [vmem:[%s7524_s19] ss:$0 sm:$0xff] }
 0x64c   : > { %4969 = vmatprep.mubr.msk.f32.mxu1 %vm6134_vm1, %v6135_v7 }
 0x64d   : > { %v2674_v31 = vmul.f32 0.25, %v2656_v30 }
 0x64f   : > { %2790 = vst.msk [vmem:[%s6990_s13] sm:$0xff] %vm1985_vm3, %v2674_v31 }
 0x6e5   : > { %v2148_v38 = vpop.f32.mrb[4].mxu1 }
 0x6e6   : > { %v4919_v39 = vpop.f32.mrb[5].mxu1 }
 0x6e9   : > { %v2316_v40 = vpop.f32.mrb[6].mxu1 }
 0x6ea   : > { %2658 = vrot.lane.b32.xlu0 %v2316_v40, %s6143_s9  ;;  %v4929_v41 = vpop.f32.mrb[7].mxu1  ;;  %v2962_v40 = vld [vmem:[%s1774_s28] sm:$0xff]  ;;  %s7527_s28 = sld [smem:[#allocation97_spill]] }
 0x6ed   : > { %v2484_v42 = vpop.f32.mrb[8].mxu1 }
 0x6ee   : > { %2662 = vrot.lane.b32.xlu1 %v2484_v42, %s6144_s8  ;;  %v4939_v43 = vpop.f32.mrb[9].mxu1 }
 0x71e   : > { %v2652_v44 = vpop.f32.mrb[10].mxu1 }
 0x71f   : > { %2666 = vrot.lane.b32.xlu0 %v2652_v44, %s6145_s5  ;;  %v4949_v45 = vpop.f32.mrb[11].mxu1 }
 0x75c   : > { %v2659_v46 = vpop.permute.xlu0 %2658 }
 0x75d   : > { %v2669_v48 = vsel %vm1985_vm3, %v2148_v38, %v2659_v46  ;;  %v2966_v38 = vld [vmem:[%s7523_s10 + $0x18] sm:$0xff] }
 0x75e   : > { %v5109_v39 = vpack.c.bf16 %v2966_v38, %v2965_v36 }
 0x760   : > { %v2663_v47 = vpop.permute.xlu1 %2662 }
 0x761   : > { %v2671_v49 = vsel %vm2670_vm4, %v2669_v48, %v2663_v47 }
 0x791   : > { %v2667_v50 = vpop.permute.xlu0 %2666 }
 0x792   : > { %v2673_v51 = vsel %vm2672_vm5, %v2671_v49, %v2667_v50 }
 0x793   : > { %4959 = vmatmul.mubr.msk.f32.vlgmr.msra.gmra.mrb[8].mxu0 %vm1823_vm2, %v2673_v51 }
 0x794   : > { %4980 = vmatprep.mubr.msk.f32.mxu0 %vm6134_vm1, %v6135_v7  ;;  %5101 = vmatpush3.bf16.msra.mxu0 %v5100_v1  ;;  %v4768_v1 = vld [vmem:[%s7526_s21] ss:$0 sm:$0xff] }
 0x795   : > { %5102 = vmatprep.subr.bf16.mxu0 %v6133_v4 }
 0x798   : > { %5104 = vmatpush3.bf16.msra.mxu0 %v5103_v8 }
 0x799   : > { %4994 = vmatprep.subr.mxu0 %v6135_v7 }
 0x79b   : > { %4981 = vmatmul.mubr.msk.f32.vlgmr.msra.gmra.mrb[10].mxu0 %vm1823_vm2, %v2877_v12 }
 0x79c   : > { %4996 = vmatprep.mubr.msk.f32.mxu0 %vm6134_vm1, %v6135_v7 }
 0x866   : > { %v2755_v53 = vpop.f32.mrb[8].mxu0 }
 0x867   : > { %v2756_v54 = vadd.f32 %v4760_v52, %v2755_v53  ;;  %v4960_v55 = vpop.f32.mrb[9].mxu0 }
 0x869   : > { %v2759_v56 = vadd.f32 %v2756_v54, %v7001_v9  ;;  %v2793_v9 = vld [vmem:[%s7517_s16] sm:$0xff]  ;;  %s6146_s16 = smov [#allocation33]  }
 0x86a   : > { %v5094_v5 = vpack.c.bf16 %v2794_v2, %v2793_v9  ;;  %s5893_s1 = sshll.u32 %s6146_s16, 4  ;;  %s5894_s1 = int_to_ptr.vmem [resolvable:$false] %s5893_s1 }
 0x86b   : > { %v2762_v57 = vsel %vm1823_vm2, %v2759_v56, 0.0  ;;  %s5895_s18 = scalar_lea.vmem %s5894_s1, 256 }
 0x86c   : > { %2763 = vadd.xlane.f32.xlu1 %v2762_v57  ;;  %5095 = vmatpush3.bf16.msra.mxu1 %v5094_v5 }
 0x86d   : > { %5096 = vmatprep.subr.bf16.mxu1 %v6133_v4 }
 0x86e   : > { %v2958_v26 = vpop.f32.mrb[10].mxu0 }
 0x86f   : > { %v2959_v27 = vadd.f32 %v4766_v25, %v2958_v26  ;;  %v4982_v28 = vpop.f32.mrb[11].mxu0 }
 0x870   : > { %5098 = vmatpush3.bf16.msra.mxu1 %v5097_v13 }
 0x871   : > { %5105 = vmatprep.subr.bf16.mxu1 %v6133_v4  ;;  %4995 = vmatpush3.xpose.msk.msra.mxu0 %vm1985_vm3, %v2959_v27 }
 0x872   : > { %5004 = vmatprep.subr.mxu0 %v6135_v7 }
 0x8f9   : > { %v2764_v58 = vpop.xlane.xlu1 %2763 }
 0x8fa   : > { %v2766_v59 = vmul.f32 0.03125, %v2764_v58 }
 0x8fc   : > { %v2767_v60 = vsub.f32 %v2759_v56, %v2766_v59 }
 0x8fe   : > { %v2768_v61 = vmul.f32 %v2767_v60, %v2767_v60 }
 0x900   : > { %v2769_v62 = vsel %vm1823_vm2, %v2768_v61, 0.0 }
 0x901   : > { %2770 = vadd.xlane.f32.xlu0 %v2769_v62 }
 0x917   : > { %3210 = vrot.lane.b32.xlu0 %v2959_v27, %s6136_s30 }
 0x98e   : > { %v2771_v14 = vpop.xlane.xlu0 %2770 }
 0x98f   : > { %v2772_v15 = vmul.f32 0.03125, %v2771_v14 }
 0x991   : > { %v2773_v16 = vadd.f32 1e-05, %v2772_v15 }
 0x992   : > { %v3211_v33 = vpop.permute.xlu0 %3210 }
 0x993   : > { %5335 = vrsqrt.f32 %v2773_v16 }
 0x99d   : > { %v5336_v17 = vpop.eup %5335 }
 0x99e   : > { %v2775_v19 = vmul.f32 %v5336_v17, %v2767_v60 }
 0x9a0   : > { %v2782_v21 = vmul.f32 %v4762_v18, %v2775_v19 }
 0x9a2   : > { %v7127_v23 = vadd.f32 %v4763_v20, %v2782_v21 }
 0x9a4   : > { %v2792_v24 = vadd.f32 %v2791_v22, %v7127_v23 }
 0x9a6   : > { %4970 = vmatmul.mubr.msk.f32.vlgmr.msra.gmra.mrb[12].mxu1 %vm1823_vm2, %v2792_v24 }
 0x9a7   : > { %4991 = vmatprep.mubr.msk.f32.mxu1 %vm6134_vm1, %v6135_v7  ;;  %5107 = vmatpush3.bf16.msra.mxu1 %v5106_v37 }
 0x9a8   : > { %5108 = vmatprep.subr.bf16.mxu1 %v6133_v4 }
 0x9ab   : > { %5110 = vmatpush3.bf16.msra.mxu1 %v5109_v39 }
 0x9ac   : > { %4999 = vmatprep.subr.mxu1 %v6135_v7 }
 0x9ae   : > { %4992 = vmatmul.mubr.msk.f32.vlgmr.msra.gmra.mrb[14].mxu1 %vm1823_vm2, %v2962_v40 }
 0x9af   : > { %5001 = vmatprep.mubr.msk.f32.mxu1 %vm6134_vm1, %v6135_v7 }
 0xa79   : > { %v2873_v30 = vpop.f32.mrb[12].mxu1 }
 0xa7a   : > { %v2874_v31 = vadd.f32 %v4764_v29, %v2873_v30  ;;  %v4971_v32 = vpop.f32.mrb[13].mxu1 }
 0xa7c   : > { %3375 = vrot.lane.b32.xlu0 %v2874_v31, %s6141_s7  ;;  %3208 = vrot.lane.b32.xlu1 %v2874_v31, %s6136_s30 }
 0xa7d   : > { %4997 = vmatmul.mubr.msk.f32.vlgmr.msra.gmra.mrb[12].mxu0 %vm1985_vm3, %v2874_v31 }
 0xa7e   : > { %5005 = vmatpush3.xpose.msk.msra.mxu0 %vm1985_vm3, %v3211_v33  ;;  %5006 = vmatprep.mubr.msk.f32.mxu0 %vm6134_vm1, %v6135_v7 }
 0xa7f   : > { %5014 = vmatprep.subr.mxu0 %v6135_v7 }
 0xa80   : > { %3541 = vrot.lane.b32.xlu0 %v2874_v31, %s6142_s26  ;;  %3377 = vrot.lane.b32.xlu1 %v2959_v27, %s6141_s7 }
 0xa81   : > { %v3043_v9 = vpop.f32.mrb[14].mxu1 }
 0xa82   : > { %v3044_v2 = vadd.f32 %v4768_v1, %v3043_v9  ;;  %v4993_v3 = vpop.f32.mrb[15].mxu1 }
 0xa84   : > { %3543 = vrot.lane.b32.xlu1 %v2959_v27, %s6142_s26  ;;  %5000 = vmatpush3.msra.mxu1 %v3044_v2 }
 0xa85   : > { %5009 = vmatprep.subr.mxu1 %v6135_v7 }
 0xaee   : > { %v3209_v41 = vpop.permute.xlu1 %3208  ;;  %v3376_v43 = vpop.permute.xlu0 %3375 }
 0xaef   : > { %5007 = vmatmul.mubr.msk.f32.vlgmr.msra.gmra.mrb[14].mxu0 %vm1985_vm3, %v3209_v41 }
 0xaf0   : > { %5016 = vmatprep.mubr.msk.f32.mxu0 %vm6134_vm1, %v6135_v7 }
 0xaf2   : > { %v3378_v42 = vpop.permute.xlu1 %3377  ;;  %v3542_v45 = vpop.permute.xlu0 %3541 }
 0xaf3   : > { %5015 = vmatpush3.xpose.msk.msra.mxu0 %vm1985_vm3, %v3378_v42  ;;  %v3722_v42 = vld [vmem:[%s7527_s28] sm:$0xff] }
 0xaf4   : > { %5024 = vmatprep.subr.mxu0 %v6135_v7 }
 0xaf6   : > { %v3544_v44 = vpop.permute.xlu1 %3543  ;;  %5017 = vmatmul.mubr.msk.f32.vlgmr.msra.gmra.mrb[16].mxu0 %vm1985_vm3, %v3376_v43  ;;  %v3723_v43 = vld [vmem:[%s7527_s28 + $0x8] sm:$0xff] }
 0xaf7   : > { %5025 = vmatpush3.xpose.msk.msra.mxu0 %vm1985_vm3, %v3544_v44  ;;  %5026 = vmatprep.mubr.msk.f32.mxu0 %vm6134_vm1, %v6135_v7  ;;  %v3724_v44 = vld [vmem:[%s7527_s28 + $0x10] sm:$0xff] }
 0xaf8   : > { %5111 = vmatprep.subr.bf16.mxu0 %v6133_v4 }
 0xafa   : > { %5027 = vmatmul.mubr.msk.f32.vlgmr.msra.gmra.mrb[18].mxu0 %vm1985_vm3, %v3542_v45  ;;  %v5112_v45 = vpack.c.bf16 %v3723_v43, %v3722_v42 }
 0xafb   : > { %5042 = vmatprep.mubr.msk.f32.mxu0 %vm6134_vm1, %v6135_v7 }
 0xafc   : > { %5113 = vmatpush3.bf16.msra.mxu0 %v5112_v45 }
 0xafd   : > { %5114 = vmatprep.subr.bf16.mxu0 %v6133_v4 }
 0xb50   : > { %v3119_v46 = vpop.f32.mrb[12].mxu0 }
 0xb51   : > { %v3123_v47 = vmul.f32 0.35355338, %v3119_v46  ;;  %v4998_v48 = vpop.f32.mrb[13].mxu0  ;;  %v3725_v46 = vld [vmem:[%s7527_s28 + $0x18] sm:$0xff] }
 0xb53   : > { %v3124_v49 = vsel %vm1985_vm3, %v3123_v47, -inf }
 0xb54   : > { %3125 = vmax.xlane.f32.xlu1 %v3124_v49 }
 0xbc2   : > { %v3282_v50 = vpop.f32.mrb[14].mxu0 }
 0xbc3   : > { %v3286_v51 = vmul.f32 0.35355338, %v3282_v50  ;;  %v5008_v52 = vpop.f32.mrb[15].mxu0 }
 0xbc5   : > { %v3287_v53 = vsel %vm1985_vm3, %v3286_v51, -inf }
 0xbc6   : > { %3288 = vmax.xlane.f32.xlu0 %v3287_v53 }
 0xbc9   : > { %v3449_v54 = vpop.f32.mrb[16].mxu0 }
 0xbca   : > { %v3453_v55 = vmul.f32 0.35355338, %v3449_v54  ;;  %v5018_v56 = vpop.f32.mrb[17].mxu0 }
 0xbcc   : > { %v3454_v57 = vsel %vm1985_vm3, %v3453_v55, -inf }
 0xbcd   : > { %3455 = vmax.xlane.f32.xlu0 %v3454_v57  ;;  %v3615_v58 = vpop.f32.mrb[18].mxu0 }
 0xbce   : > { %v3619_v59 = vmul.f32 0.35355338, %v3615_v58  ;;  %v5028_v60 = vpop.f32.mrb[19].mxu0 }
 0xbcf   : > { %v4782_v60 = vld [vmem:[%s7529_s14] ss:$0 sm:$0xff] }
 0xbd0   : > { %v3620_v61 = vsel %vm1985_vm3, %v3619_v59, -inf }
 0xbd1   : > { %3621 = vmax.xlane.f32.xlu1 %v3620_v61 }
 0xbe1   : > { %v3126_v62 = vpop.xlane.xlu1 %3125 }
 0xbe2   : > { %v3127_v63 = vsub.f32 %v3123_v47, %v3126_v62  ;;  %v5115_v47 = vpack.c.bf16 %v3725_v46, %v3724_v44 }
 0xbe4   : > { %v3128_v0 = vmul.f32 1.442695, %v3127_v63  ;;  %5116 = vmatpush3.bf16.msra.mxu0 %v5115_v47 }
 0xbe5   : > { %5123 = vmatprep.subr.bf16.mxu0 %v6133_v4 }
 0xbe6   : > { %5337 = vpow2.f32 %v3128_v0 }
 0xbf0   : > { %v5338_v5 = vpop.eup %5337 }
 0xbf1   : > { %v3130_v6 = vsel %vm1985_vm3, %v5338_v5, 0.0 }
 0xbf2   : > { %3131 = vadd.xlane.f32.xlu0 %v3130_v6  ;;  %v3836_v6 = vld [vmem:[%s7528_s17] sm:$0xff] }
 0xc53   : > { %v3289_v8 = vpop.xlane.xlu0 %3288 }
 0xc54   : > { %v3290_v10 = vsub.f32 %v3286_v51, %v3289_v8  ;;  %v3837_v8 = vld [vmem:[%s7528_s17 + $0x8] sm:$0xff] }
 0xc56   : > { %v3291_v11 = vmul.f32 1.442695, %v3290_v10  ;;  %v5118_v10 = vpack.c.bf16 %v3837_v8, %v3836_v6 }
 0xc58   : > { %5339 = vpow2.f32 %v3291_v11  ;;  %v3839_v11 = vld [vmem:[%s7528_s17 + $0x18] sm:$0xff] }
 0xc5a   : > { %v3456_v12 = vpop.xlane.xlu0 %3455 }
 0xc5b   : > { %v3457_v13 = vsub.f32 %v3453_v55, %v3456_v12 }
 0xc5d   : > { %v3458_v14 = vmul.f32 1.442695, %v3457_v13  ;;  %v3921_v13 = vld [vmem:[%s6985_s27] sm:$0xff] }
 0xc5e   : > { %v3622_v20 = vpop.xlane.xlu1 %3621 }
 0xc5f   : > { %5341 = vpow2.f32 %v3458_v14  ;;  %v3623_v21 = vsub.f32 %v3619_v59, %v3622_v20  ;;  %v3922_v14 = vld [vmem:[%s6985_s27 + $0x8] sm:$0xff] }
 0xc60   : > { %v3926_v20 = vld [vmem:[%s6985_s27 + $0x28] sm:$0xff] }
 0xc61   : > { %v3624_v22 = vmul.f32 1.442695, %v3623_v21 }
 0xc62   : > { %v5340_v15 = vpop.eup %5339 }
 0xc63   : > { %v3293_v16 = vsel %vm1985_vm3, %v5340_v15, 0.0 }
 0xc64   : > { %3294 = vadd.xlane.f32.xlu1 %v3293_v16  ;;  %v5124_v16 = vpack.c.bf16 %v3922_v14, %v3921_v13 }
 0xc69   : > { %v5342_v17 = vpop.eup %5341 }
 0xc6a   : > { %v3460_v18 = vsel %vm1985_vm3, %v5342_v17, 0.0 }
 0xc6b   : > { %3461 = vadd.xlane.f32.xlu0 %v3460_v18 }
 0xc75   : > { %3465 = vrot.lane.b32.xlu1 %v3044_v2, %s6141_s7  ;;  %s7536_s7 = scalar_lea.vmem [#allocation28], %s6867_s11 }
 0xc7f   : > { %v3132_v19 = vpop.xlane.xlu0 %3131 }
 0xc80   : > { %5343 = vrcp.f32 %v3132_v19  ;;  %v3925_v19 = vld [vmem:[%s6985_s27 + $0x20] sm:$0xff] }
 0xc81   : > { %3299 = vrot.lane.b32.xlu0 %v3044_v2, %s6136_s30  ;;  %5345 = vpow2.f32 %v3624_v22  ;;  %v5130_v21 = vpack.c.bf16 %v3926_v20, %v3925_v19  ;;  %s7530_s30 = scalar_lea.vmem [#allocation22], %s6867_s11 }
 0xc8a   : > { %v5344_v24 = vpop.eup %5343 }
 0xc8b   : > { %v3134_v25 = vmul.f32 %v5344_v24, %v5338_v5  ;;  %v5346_v26 = vpop.eup %5345 }
 0xc8c   : > { %v3626_v27 = vsel %vm1985_vm3, %v5346_v26, 0.0 }
 0xc8d   : > { %5002 = vmatmul.mubr.msk.f32.vlgmr.msra.gmra.mrb[16].mxu1 %vm1985_vm3, %v3134_v25 }
 0xc8e   : > { %5011 = vmatprep.mubr.msk.f32.mxu1 %vm6134_vm1, %v6135_v7 }
 0xc99   : > { %3627 = vadd.xlane.f32.xlu1 %v3626_v27  ;;  %v4784_v27 = vld [vmem:[%s7530_s30] ss:$0 sm:$0xff] }
 0xcaa   : > { %3631 = vrot.lane.b32.xlu1 %v3044_v2, %s6142_s26  ;;  %s7537_s26 = sld [smem:[#allocation99_spill]] }
 0xcf1   : > { %v3295_v28 = vpop.xlane.xlu1 %3294 }
 0xcf2   : > { %5347 = vrcp.f32 %v3295_v28 }
 0xcf5   : > { %v3466_v33 = vpop.permute.xlu1 %3465 }
 0xcf8   : > { %v3462_v29 = vpop.xlane.xlu0 %3461 }
 0xcf9   : > { %5349 = vrcp.f32 %v3462_v29  ;;  %v4785_v29 = vld [vmem:[%s7531_s20] ss:$0 sm:$0xff] }
 0xcfc   : > { %v5348_v30 = vpop.eup %5347  ;;  %v3300_v31 = vpop.permute.xlu0 %3299 }
 0xcfd   : > { %v3297_v32 = vmul.f32 %v5348_v30, %v5340_v15  ;;  %5010 = vmatpush3.msra.mxu1 %v3300_v31  ;;  %v3923_v15 = vld [vmem:[%s6985_s27 + $0x10] sm:$0xff] }
 0xcfe   : > { %5019 = vmatprep.subr.mxu1 %v6135_v7 }
 0xcff   : > { %5012 = vmatmul.mubr.msk.f32.vlgmr.msra.gmra.mrb[18].mxu1 %vm1985_vm3, %v3297_v32  ;;  %v3927_v32 = vld [vmem:[%s6985_s27 + $0x30] sm:$0xff] }
 0xd00   : > { %5020 = vmatpush3.msra.mxu1 %v3466_v33  ;;  %5021 = vmatprep.mubr.msk.f32.mxu1 %vm6134_vm1, %v6135_v7  ;;  %v3928_v33 = vld [vmem:[%s6985_s27 + $0x38] sm:$0xff] }
 0xd01   : > { %5029 = vmatprep.subr.mxu1 %v6135_v7 }
 0xd03   : > { %v5350_v34 = vpop.eup %5349 }
 0xd04   : > { %v3464_v35 = vmul.f32 %v5350_v34, %v5342_v17  ;;  %v3924_v17 = vld [vmem:[%s6985_s27 + $0x18] sm:$0xff]  ;;  %v5133_v34 = vpack.c.bf16 %v3928_v33, %v3927_v32  ;;  %s7538_s27 = sld [smem:[#allocation93_spill]] }
 0xd05   : > { %v5127_v18 = vpack.c.bf16 %v3924_v17, %v3923_v15 }
 0xd06   : > { %5022 = vmatmul.mubr.msk.f32.vlgmr.msra.gmra.mrb[20].mxu1 %vm1985_vm3, %v3464_v35 }
 0xd07   : > { %5031 = vmatprep.mubr.msk.f32.mxu1 %vm6134_vm1, %v6135_v7 }
 0xd0a   : > { %p7539_p13 = scmp.ne.s32.totalorder %s7538_s27, 0 }
 0xd26   : > { %v3628_v36 = vpop.xlane.xlu1 %3627 }
 0xd27   : > { %5351 = vrcp.f32 %v3628_v36 }
 0xd2a   : > { %v3632_v37 = vpop.permute.xlu1 %3631 }
 0xd2b   : > { %5030 = vmatpush3.msra.mxu1 %v3632_v37 }
 0xd2c   : > { %5117 = vmatprep.subr.bf16.mxu1 %v6133_v4 }
 0xd31   : > { %v5352_v38 = vpop.eup %5351 }
 0xd32   : > { %v3630_v39 = vmul.f32 %v5352_v38, %v5346_v26 }
 0xd34   : > { %5032 = vmatmul.mubr.msk.f32.vlgmr.msra.gmra.mrb[22].mxu1 %vm1985_vm3, %v3630_v39  ;;  %v4788_v39 = vld [vmem:[%s7536_s7] ss:$0 sm:$0xff] }
 0xd35   : > { %5053 = vmatprep.mubr.msk.f32.mxu1 %vm6134_vm1, %v6135_v7  ;;  %5119 = vmatpush3.bf16.msra.mxu1 %v5118_v10 }
 0xd36   : > { %5120 = vmatprep.subr.bf16.mxu1 %v6133_v4 }
 0xd60   : > { %v3204_v40 = vpop.f32.mrb[16].mxu1 }
 0xd61   : > { %v5003_v41 = vpop.f32.mrb[17].mxu1 }
 0xdd2   : > { %v3371_v48 = vpop.f32.mrb[18].mxu1 }
 0xdd3   : > { %3708 = vrot.lane.b32.xlu0 %v3371_v48, %s6143_s9  ;;  %v5013_v49 = vpop.f32.mrb[19].mxu1  ;;  %s7255_s9 = scalar_lea.hbm %s7534_s0, %s4794_s2 }
 0xdd9   : > { %v3537_v50 = vpop.f32.mrb[20].mxu1 }
 0xdda   : > { %3712 = vrot.lane.b32.xlu1 %v3537_v50, %s6144_s8  ;;  %v5023_v51 = vpop.f32.mrb[21].mxu1  ;;  %s4073_s8 = sshll.u32 %s6990_s13, 4  ;;  %s4074_s8 = int_to_ptr.vmem [resolvable:$true] %s4073_s8 }
 0xddb   : > { %s5889_s23 = scalar_lea.vmem %s4074_s8, 128  ;;  %p5896_p4 = scmp.lt.s32.totalorder %s4074_s8, %s5894_s1 }
 0xddc   : > { %p5890_p5 = scmp.ne.s32.totalorder %s4074_s8, %s5889_s23  ;;  %p5897_p7 = scmp.lt.s32.totalorder %s5895_s18, %s5889_s23 }
 0xdde   : > { %p5891_p2 = pnand %p5890_p5, %p7539_p13  ;;  %p5898_p9 = por %p5897_p7, %p5896_p4 }
 0xde0   : > { %p5892_p1 = pneg %p5891_p2 }
 0xde2   : > { %p5899_p8 = pnand %p5898_p9, %p5892_p1 }
 0xe07   : > { %v3703_v52 = vpop.f32.mrb[22].mxu1 }
 0xe08   : > { %3716 = vrot.lane.b32.xlu0 %v3703_v52, %s6145_s5  ;;  %v5033_v53 = vpop.f32.mrb[23].mxu1  ;;  %s4047_s5 = scalar_lea.sflag [#allocation34], %s7537_s26 }
 0xe45   : > { %v3709_v54 = vpop.permute.xlu0 %3708 }
 0xe46   : > { %v3719_v56 = vsel %vm1985_vm3, %v3204_v40, %v3709_v54 }
 0xe4c   : > { %v3713_v55 = vpop.permute.xlu1 %3712 }
 0xe4d   : > { %v3720_v57 = vsel %vm2670_vm4, %v3719_v56, %v3713_v55 }
 0xe7a   : > { %v3717_v58 = vpop.permute.xlu0 %3716 }
 0xe7b   : > { %v3721_v59 = vsel %vm2672_vm5, %v3720_v57, %v3717_v58 }
 0xe7c   : > { %5043 = vmatmul.mubr.msk.f32.vlgmr.msra.gmra.mrb[20].mxu0 %vm1823_vm2, %v3721_v59 }
 0xe7d   : > { %5072 = vmatprep.mubr.msk.f32.mxu0 %vm6134_vm1, %v6135_v7  ;;  %5125 = vmatpush3.bf16.msra.mxu0 %v5124_v16 }
 0xe7e   : > { %5126 = vmatprep.subr.bf16.mxu0 %v6133_v4 }
 0xe81   : > { %5128 = vmatpush3.bf16.msra.mxu0 %v5127_v18 }
 0xe82   : > { %5129 = vmatprep.subr.bf16.mxu0 %v6133_v4 }
 0xe85   : > { %5131 = vmatpush3.bf16.msra.mxu0 %v5130_v21 }
 0xe86   : > { %5132 = vmatprep.subr.bf16.mxu0 %v6133_v4  ;;  %v4786_v4 = vld [vmem:[%s7532_s15] ss:$0 sm:$0xff] }
 0xe89   : > { %5134 = vmatpush3.bf16.msra.mxu0 %v5133_v34 }
 0xf4f   : > { %v3802_v61 = vpop.f32.mrb[20].mxu0 }
 0xf50   : > { %v3803_v62 = vadd.f32 %v4782_v60, %v3802_v61  ;;  %v5044_v63 = vpop.f32.mrb[21].mxu0 }
 0xf52   : > { %v3806_v0 = vadd.f32 %v3803_v62, %v7127_v23  ;;  %v3838_v23 = vld [vmem:[%s7528_s17 + $0x10] sm:$0xff] }
 0xf53   : > { %v5121_v12 = vpack.c.bf16 %v3839_v11, %v3838_v23 }
 0xf54   : > { %v3809_v1 = vsel %vm1823_vm2, %v3806_v0, 0.0 }
 0xf55   : > { %3810 = vadd.xlane.f32.xlu1 %v3809_v1  ;;  %5122 = vmatpush3.bf16.msra.mxu1 %v5121_v12 }
 0xfe2   : > { %v3811_v9 = vpop.xlane.xlu1 %3810 }
 0xfe3   : > { %v3812_v2 = vmul.f32 0.03125, %v3811_v9 }
 0xfe5   : > { %v3813_v3 = vsub.f32 %v3806_v0, %v3812_v2 }
 0xfe7   : > { %v3814_v5 = vmul.f32 %v3813_v3, %v3813_v3 }
 0xfe9   : > { %v3815_v7 = vsel %vm1823_vm2, %v3814_v5, 0.0 }
 0xfea   : > { %3816 = vadd.xlane.f32.xlu0 %v3815_v7 }
0x1077   : > { %v3817_v22 = vpop.xlane.xlu0 %3816 }
0x1078   : > { %v3818_v24 = vmul.f32 0.03125, %v3817_v22 }
0x107a   : > { %v3819_v25 = vadd.f32 1e-05, %v3818_v24 }
0x107c   : > { %5353 = vrsqrt.f32 %v3819_v25 }
0x1086   : > { %v5354_v26 = vpop.eup %5353 }
0x1087   : > { %v3821_v28 = vmul.f32 %v5354_v26, %v3813_v3 }
0x1089   : > { %v3828_v30 = vmul.f32 %v4784_v27, %v3821_v28 }
0x108b   : > { %v3835_v31 = vadd.f32 %v4785_v29, %v3828_v30 }
0x108d   : > { %5054 = vmatmul.mubr.msk.f32.vlgmr.msra.gmra.mrb[24].mxu1 %vm1823_vm2, %v3835_v31 }
0x1160   : > { %v3916_v35 = vpop.f32.mrb[24].mxu1 }
0x1161   : > { %v3917_v36 = vadd.f32 %v4786_v4, %v3916_v35  ;;  %v5055_v37 = vpop.f32.mrb[25].mxu1 }
0x1163   : > { %v3920_v38 = vmax.f32 %v3917_v36, 0.0 }
0x1165   : > { %5073 = vmatmul.mubr.msk.f32.vlgmr.msra.gmra.mrb[22].mxu0 %vm3936_vm6, %v3920_v38 }
0x1238   : > { %v4006_v40 = vpop.f32.mrb[22].mxu0 }
0x1239   : > { %v4007_v41 = vadd.f32 %v4788_v39, %v4006_v40  ;;  %v5074_v42 = vpop.f32.mrb[23].mxu0 }
0x123b   : > { %v4010_v43 = vadd.f32 %v4007_v41, %v3835_v31 }
0x123d   : > { %v4013_v44 = vsel %vm1823_vm2, %v4010_v43, 0.0 }
0x123e   : > { %4014 = vadd.xlane.f32.xlu0 %v4013_v44 }
0x12cb   : > { %v4015_v45 = vpop.xlane.xlu0 %4014 }
0x12cc   : > { %v4016_v46 = vmul.f32 0.03125, %v4015_v45 }
0x12ce   : > { %v4017_v47 = vsub.f32 %v4010_v43, %v4016_v46 }
0x12d0   : > { %v4018_v48 = vmul.f32 %v4017_v47, %v4017_v47 }
0x12d2   : > { %v4019_v49 = vsel %vm1823_vm2, %v4018_v48, 0.0 }
0x12d3   : > { %4020 = vadd.xlane.f32.xlu1 %v4019_v49 }
0x12d4   : > { %5902 = shalt.err (!%p5899_p8)
}
0x12d5   : > { %s5903_s13 = scalar_lea.hbm %s7255_s9, 128  ;;  %s5907_s22 = scalar_lea.hbm %s7535_s24, 256 }
0x12d6   : > { %p5904_p12 = scmp.ne.s32.totalorder %s7255_s9, %s5903_s13  ;;  %p5908_p3 = scmp.lt.u32.totalorder %s7255_s9, %s7535_s24 }
0x12d7   : > { %p5909_p10 = scmp.lt.u32.totalorder %s5907_s22, %s5903_s13  ;;  %p5911_p5 = scmp.lt.u32.totalorder %s5903_s13, %s7255_s9 }
0x12d8   : > { %p5905_p6 = pnand %p5904_p12, %p7539_p13 }
0x12d9   : > { %p5910_p11 = por %p5909_p10, %p5908_p3 }
0x12da   : > { %p5906_p0 = pneg %p5905_p6 }
0x12db   : > { %p5912_p2 = por %p5911_p5, %p5910_p11 }
0x12dd   : > { %p5913_p1 = pnand %p5912_p2, %p5906_p0 }
0x12df   : > { %5916 = shalt.err (!%p5913_p1)
}
0x12e0   : > { %s7540_s12 = sld [smem:[#allocation77_spill]]  ;;  %s7541_s25 = scalar_lea.vmem [#allocation29], %s6867_s11  ;;  %v4791_v56 = vld [vmem:[%s1550_s4] ss:$0 sm:$0xff] }
0x12e1   : > { %5174 = dma.vmem_to_hbm [thread:$0]  (%p7539_p13), %s4074_s8, 128, %s7255_s9, %s4047_s5   ;;  %v4790_v54 = vld [vmem:[%s7541_s25] ss:$0 sm:$0xff] }
0x12e2   : > { %s4060_s10 = sshll.u32 %s6988_s6, 4  ;;  %s4042_s3 = scalar_lea.sflag [#allocation4], %s7537_s26  ;;  %s7282_s10 = int_to_ptr.vmem [resolvable:$true] %s4060_s10 }
0x12e3   : > { %s5917_s21 = scalar_lea.vmem %s7282_s10, 128  ;;  %s6147_s11 = smov [#allocation32]  }
0x12e4   : > { %p5918_p4 = scmp.ne.s32.totalorder %s7282_s10, %s5917_s21  ;;  %s5921_s4 = sshll.u32 %s6147_s11, 4  ;;  %s5922_s4 = int_to_ptr.vmem [resolvable:$false] %s5921_s4 }
0x12e5   : > { %s5923_s28 = scalar_lea.vmem %s5922_s4, 256  ;;  %p5924_p8 = scmp.lt.s32.totalorder %s7282_s10, %s5922_s4 }
0x12e6   : > { %s7280_s19 = scalar_lea.hbm %s7540_s12, %s4794_s2  ;;  %p5919_p7 = pnand %p5918_p4, %p7539_p13 }
0x12e7   : > { %p5925_p12 = scmp.lt.s32.totalorder %s5923_s28, %s5917_s21 }
0x12e8   : > { %p5920_p9 = pneg %p5919_p7 }
0x12e9   : > { %p5926_p6 = por %p5925_p12, %p5924_p8 }
0x12eb   : > { %p5927_p0 = pnand %p5926_p6, %p5920_p9 }
0x1360   : > { %v4021_v50 = vpop.xlane.xlu1 %4020 }
0x1361   : > { %v4022_v51 = vmul.f32 0.03125, %v4021_v50 }
0x1363   : > { %v4023_v52 = vadd.f32 1e-05, %v4022_v51 }
0x1365   : > { %5355 = vrsqrt.f32 %v4023_v52 }
0x136f   : > { %v5356_v53 = vpop.eup %5355 }
0x1370   : > { %v4025_v55 = vmul.f32 %v5356_v53, %v4017_v47 }
0x1372   : > { %v4032_v57 = vmul.f32 %v4790_v54, %v4025_v55 }
0x1374   : > { %v4039_v58 = vadd.f32 %v4791_v56, %v4032_v57 }
0x1376   : > { %4040 = vst.msk [vmem:[%s6988_s6] sm:$0xff] %vm1823_vm2, %v4039_v58 }
0x1377   : > { %5930 = shalt.err (!%p5927_p0)
}
0x1378   : > { %s5931_s6 = scalar_lea.hbm %s7280_s19, 128  ;;  %s5935_s17 = scalar_lea.hbm %s7540_s12, 256 }
0x1379   : > { %p5932_p3 = scmp.ne.s32.totalorder %s7280_s19, %s5931_s6  ;;  %p5936_p5 = scmp.lt.u32.totalorder %s7280_s19, %s7540_s12 }
0x137a   : > { %p5937_p2 = scmp.lt.u32.totalorder %s5935_s17, %s5931_s6  ;;  %p5939_p4 = scmp.lt.u32.totalorder %s5931_s6, %s7280_s19 }
0x137b   : > { %p5933_p10 = pnand %p5932_p3, %p7539_p13 }
0x137c   : > { %p5938_p1 = por %p5937_p2, %p5936_p5 }
0x137d   : > { %p5934_p11 = pneg %p5933_p10 }
0x137e   : > { %p5940_p7 = por %p5939_p4, %p5938_p1 }
0x1380   : > { %p5941_p9 = pnand %p5940_p7, %p5934_p11 }
0x1382   : > { %5944 = shalt.err (!%p5941_p9)
}
0x1383   : > { %5173 = dma.vmem_to_hbm [thread:$0]  (%p7539_p13), %s7282_s10, 128, %s7280_s19, %s4042_s3  }
0x1384 PF: > { %s7542_s14 = sld [smem:[#allocation88_spill]]  ;;  %s7543_s30 = sld [smem:[#allocation79_spill]] }
0x1385   : > { %s7544_s20 = sld [smem:[#allocation94_spill]] }
0x138a   : > { %p5184_p8 = scmp.ge.s32.totalorder %s7542_s14, 2  ;;  %s4085_s15 = sand.u32 1, %s7543_s30  }
0x138b   : > { %p7545_p12 = scmp.ne.s32.totalorder %s7544_s20, 0  ;;  %s4086_s29 = scalar_lea.sflag [#allocation4], %s4085_s15 }
0x138d   : > { %p5178_p6 = pnand %p5184_p8, %p7545_p12 }
0x138f   : > { %6030 = dma.done.wait (!%p5178_p6), %s4086_s29, 128  }
0x1390   : > { %6032 = vsyncadd (!%p5178_p6), %s4086_s29, 4294967168  ;;  %s4095_s0 = scalar_lea.sflag [#allocation34], %s4085_s15 }
0x1391   : > { %6034 = dma.done.wait (!%p5178_p6), %s4095_s0, 128  }
0x1392   : > { %6036 = vsyncadd (!%p5178_p6), %s4095_s0, 4294967168  ;;  %s110_s15 = sadd.s32 1, %s7542_s14   ;;  %s7546_s0 = sld [smem:[#allocation80_spill]] }
0x1393   : > { %p107_p0 = scmp.ge.s32.totalorder %s110_s15, 6   ;;  %s7547_s22 = sld [smem:[#allocation81_spill]] }
0x1394   : > { %s7548_s23 = sld [smem:[#allocation92_spill]]  ;;  %s7549_s26 = sld [smem:[#allocation82_spill]] }
0x1395   : > { %s7550_s28 = sld [smem:[#allocation83_spill]]  ;;  %s7551_s1 = sld [smem:[#allocation91_spill]] }
0x1396   : > { %s7552_s2 = sld [smem:[#allocation86_spill]]  ;;  %s7553_s7 = sld [smem:[#allocation87_spill]] }
0x1397   : > { %s7554_s10 = sld [smem:[#allocation89_spill]]  ;;  %s7555_s11 = sld [smem:[#allocation90_spill]] }
0x1398   :  { %109 = sbr.rel (!%p107_p0) target bundleno = 98 (0x62), region = 486 }
0x139f   :  { %4100 = vsyncpa [#allocation3], 1 }
0x13a0   :  { %4102 = vsyncpa [#allocation3 + $0x1], 1 }
0x13a1   :  { %4103 = vsyncpa [#allocation6], 1 }
0x13a2   :  { %4105 = vsyncpa [#allocation6 + $0x1], 1 }
0x13a3   :  { %4106 = vsyncpa [#allocation9], 1 }
0x13a4   :  { %4108 = vsyncpa [#allocation9 + $0x1], 1 }
0x13a5   :  { %4109 = vsyncpa [#allocation12], 1 }
0x13a6   :  { %4111 = vsyncpa [#allocation12 + $0x1], 1 }
0x13a7   :  { %4112 = vsyncpa [#allocation15], 1 }
0x13a8   :  { %4114 = vsyncpa [#allocation15 + $0x1], 1 }
0x13a9   :  { %4115 = vsyncpa [#allocation18], 1 }
0x13aa   :  { %4117 = vsyncpa [#allocation18 + $0x1], 1 }
0x13ab   :  { %4118 = vsyncpa [#allocation21], 1 }
0x13ac   :  { %4120 = vsyncpa [#allocation21 + $0x1], 1 }
0x13ad   :  { %4121 = vsyncpa [#allocation24], 1 }
0x13ae   :  { %4123 = vsyncpa [#allocation24 + $0x1], 1 }
0x13af   :  { %4124 = vsyncpa [#allocation27], 1 }
0x13b0   :  { %4126 = vsyncpa [#allocation27 + $0x1], 1 }
0x13b1   :  { %4127 = vsyncpa [#allocation30], 1 }
0x13b2   :  { %4129 = vsyncpa [#allocation30 + $0x1], 1 }
0x13b3   :  { %4130 = vsyncpa [#allocation4], 1 }
0x13b4   :  { %4132 = vsyncpa [#allocation4 + $0x1], 1 }
0x13b5   :  { %4133 = vsyncpa [#allocation34], 1 }
0x13b6   :  { %4135 = vsyncpa [#allocation34 + $0x1], 1 }

</bundles_post_ra>
